<compile_context>
chip_gen: v7x
topology: tpu7x:2x2x1
jax: 0.10.0
libtpu: 0.0.40
codegen_flags: <defaults>
</compile_context>

<pallas_src>
import math

import jax
import jax.numpy as jnp
import numpy as np
from jax.experimental import pallas as pl
from jax.experimental.pallas import tpu as pltpu

# ----- model dimensions (small, Llama-like) -----
B = 2          # batch
S = 8          # sequence length
D = 128        # hidden size
H = 4          # attention heads
HD = D // H    # head dim = 32
I = 256        # MLP intermediate size
L = 2          # number of decoder layers
BS = B * S     # folded batch*seq rows
EPS = 1e-6
ROPE_THETA = 10000.0


# ----------------------------------------------------------------------------
# shared math helpers (used inside the Pallas kernel and in the JAX reference)
# ----------------------------------------------------------------------------
def _rmsnorm(x, w):
    var = jnp.mean(x * x, axis=-1, keepdims=True)
    return x * jax.lax.rsqrt(var + EPS) * w


def _rotate_half(x):
    half = x.shape[-1] // 2
    return jnp.concatenate([-x[:, half:], x[:, :half]], axis=-1)


# ----------------------------------------------------------------------------
# Fused Pallas kernel: full decoder stack + final norm in one invocation
# ----------------------------------------------------------------------------
def llama_stack_kernel(x_ref, ln1_ref, wqkv_ref, wqkrot_ref, wo_ref, ln2_ref,
                       wgu_ref, wd_ref, norm_ref, cos_ref, sin_ref, bias_ref,
                       out_ref):
    x = x_ref[...]                      # (BS, D) f32 — batch folded into rows
    cos = cos_ref[...]                  # (BS, D) f32 — tiled per batch & head
    sin = sin_ref[...]                  # (BS, D) f32
    bias = bias_ref[...]                # (BS, BS) additive causal/batch mask

    out_ref[0] = x                      # all_hidden_states[0] = inputs_embeds
    scale = 1.0 / math.sqrt(HD)

    for l in range(L):                  # static unroll over layers
        # ---------------- self-attention block ----------------
        hn = _rmsnorm(x, ln1_ref[l])                 # input_layernorm, (BS, D)
        hnb = hn.astype(jnp.bfloat16)

        qkv = jnp.dot(hnb, wqkv_ref[l],
                      preferred_element_type=jnp.float32)    # (BS, 3D)
        qkr = jnp.dot(hnb, wqkrot_ref[l],
                      preferred_element_type=jnp.float32)    # (BS, 2D)
        q = qkv[:, :D]
        k = qkv[:, D:2 * D]
        v = qkv[:, 2 * D:]
        # RoPE on full-width slabs; rotate_half is pre-folded into wqkrot cols
        q = q * cos + qkr[:, :D] * sin
        k = k * cos + qkr[:, D:] * sin

        attn = jnp.zeros((BS, D), jnp.float32)
        for hh in range(H):                           # static loop over heads
            sl = slice(hh * HD, (hh + 1) * HD)
            qh = q[:, sl]
            kh = k[:, sl]
            vh = v[:, sl]
            s = jnp.dot(qh, kh.T,
                        preferred_element_type=jnp.float32) * scale + bias
            m = jnp.max(s, axis=-1, keepdims=True)
            p = jnp.exp(s - m)
            p = p * pl.reciprocal(jnp.sum(p, axis=-1, keepdims=True),
                                  approx=True)
            ho = jnp.dot(p, vh, preferred_element_type=jnp.float32)  # (BS,HD)
            # accumulate per-head output projection (no concat needed)
            attn = attn + jnp.dot(ho.astype(jnp.bfloat16), wo_ref[l, hh],
                                  preferred_element_type=jnp.float32)
        h1 = x + attn                                 # residual

        # ---------------- MLP block (SwiGLU) ----------------
        h2 = _rmsnorm(h1, ln2_ref[l])                 # post_attention_layernorm
        h2b = h2.astype(jnp.bfloat16)
        gu = jnp.dot(h2b, wgu_ref[l],
                     preferred_element_type=jnp.float32)      # (BS, 2I)
        g = gu[:, :I]
        u = gu[:, I:]
        act = g * jax.nn.sigmoid(g) * u               # SiLU(gate) * up
        mlp = jnp.dot(act.astype(jnp.bfloat16), wd_ref[l],
                      preferred_element_type=jnp.float32)
        x = h1 + mlp                                  # residual

        if l < L - 1:
            out_ref[l + 1] = x                        # hidden state fed to l+1

    out_ref[L] = _rmsnorm(x, norm_ref[...])           # final model norm


# ----------------------------------------------------------------------------
# Wrapper around pallas_call
# ----------------------------------------------------------------------------
def _full(shape):
    # whole-array block (everything is VMEM resident for the single grid step)
    return pl.BlockSpec(shape, lambda i, _n=len(shape): (0,) * _n)


def custom_llama_forward(inputs_embeds, packed, cos_full, sin_full, attn_bias):
    """Mirrors CustomLlamaModel.forward: returns tuple of all hidden states."""
    ln1, wqkv, wqkrot, wo, ln2, wgu, wd, norm = packed
    x2 = inputs_embeds.reshape(BS, D)
    operands = (x2, ln1, wqkv, wqkrot, wo, ln2, wgu, wd, norm,
                cos_full, sin_full, attn_bias)

    hs = pl.pallas_call(
        llama_stack_kernel,
        out_shape=jax.ShapeDtypeStruct((L + 1, BS, D), jnp.float32),
        grid=(1,),
        in_specs=[_full(op.shape) for op in operands],
        out_specs=_full((L + 1, BS, D)),
        compiler_params=pltpu.CompilerParams(
            dimension_semantics=("arbitrary",),
            vmem_limit_bytes=32 * 1024 * 1024),
    )(*operands)

    return tuple(hs[i].reshape(B, S, D) for i in range(L + 1))


# ----------------------------------------------------------------------------
# Parameters / RoPE tables / mask (deterministic, synthetic)
# ----------------------------------------------------------------------------
def init_params(key):
    def dense(k, shape):
        return (0.02 * jax.random.normal(k, shape, dtype=jnp.float32)
                ).astype(jnp.bfloat16)

    layer_keys = jax.random.split(key, L + 1)
    layers = []
    for lk in layer_keys[:L]:
        ks = jax.random.split(lk, 9)
        layers.append(dict(
            ln1=jnp.ones((1, D), jnp.float32) + 0.01 * jax.random.normal(ks[7], (1, D)),
            wq=dense(ks[0], (D, D)),
            wk=dense(ks[1], (D, D)),
            wv=dense(ks[2], (D, D)),
            wo=dense(ks[3], (D, D)),
            ln2=jnp.ones((1, D), jnp.float32) + 0.01 * jax.random.normal(ks[8], (1, D)),
            wg=dense(ks[4], (D, I)),
            wu=dense(ks[5], (D, I)),
            wd=dense(ks[6], (I, D)),
        ))
    norm_w = jnp.ones((1, D), jnp.float32) + 0.01 * jax.random.normal(layer_keys[-1], (1, D))
    return dict(layers=layers, norm=norm_w)


def _rot_cols(w):
    """Fold rotate_half into weight columns: (h @ w_rot) == rotate_half(h @ w).

    For each head, output column j<HD/2 becomes -col(j+HD/2), and column
    j>=HD/2 becomes +col(j-HD/2).  Exact (permutation + sign) in bf16.
    """
    w4 = w.reshape(D, H, 2, HD // 2)
    return jnp.concatenate([-w4[:, :, 1, :], w4[:, :, 0, :]], axis=-1
                           ).reshape(D, D)


def pack_params(params):
    layers = params["layers"]
    ln1 = jnp.stack([p["ln1"] for p in layers])                          # (L,1,D) f32
    wqkv = jnp.stack([jnp.concatenate([p["wq"], p["wk"], p["wv"]], axis=1)
                      for p in layers])                                  # (L,D,3D) bf16
    wqkrot = jnp.stack([jnp.concatenate([_rot_cols(p["wq"]),
                                         _rot_cols(p["wk"])], axis=1)
                        for p in layers])                                # (L,D,2D) bf16
    wo = jnp.stack([p["wo"].reshape(H, HD, D) for p in layers])          # (L,H,HD,D) bf16
    ln2 = jnp.stack([p["ln2"] for p in layers])                          # (L,1,D) f32
    wgu = jnp.stack([jnp.concatenate([p["wg"], p["wu"]], axis=1)
                     for p in layers])                                   # (L,D,2I) bf16
    wd = jnp.stack([p["wd"] for p in layers])                            # (L,I,D) bf16
    return ln1, wqkv, wqkrot, wo, ln2, wgu, wd, params["norm"]


def rope_tables():
    # position_ids = arange(seq_len) (as in the module forward)
    inv_freq = 1.0 / (ROPE_THETA ** (jnp.arange(0, HD, 2, dtype=jnp.float32) / HD))
    pos = jnp.arange(S, dtype=jnp.float32)
    freqs = jnp.outer(pos, inv_freq)                       # (S, HD/2)
    emb = jnp.concatenate([freqs, freqs], axis=-1)         # (S, HD)
    return jnp.cos(emb), jnp.sin(emb)


def rope_full(cos, sin):
    # tile over batch (rows) and heads (lanes) for the folded (BS, D) layout
    return jnp.tile(cos, (B, H)), jnp.tile(sin, (B, H))


def causal_batch_bias():
    r = jnp.arange(BS)
    same_batch = (r[:, None] // S) == (r[None, :] // S)
    causal = r[:, None] >= r[None, :]
    return jnp.where(same_batch & causal, 0.0, -1e30).astype(jnp.float32)


# ----------------------------------------------------------------------------
# Pure-JAX reference (same parameters, f32 / HIGHEST precision) for verification
# ----------------------------------------------------------------------------
def _ref_layer(x, p, cos, sin):
    hp = jax.lax.Precision.HIGHEST
    f32 = lambda w: w.astype(jnp.float32)
    h = _rmsnorm(x, p["ln1"])
    q = jnp.dot(h, f32(p["wq"]), precision=hp)
    k = jnp.dot(h, f32(p["wk"]), precision=hp)
    v = jnp.dot(h, f32(p["wv"]), precision=hp)
    scale = 1.0 / math.sqrt(HD)
    causal = jnp.tril(jnp.ones((S, S), dtype=bool))
    outs = []
    for hh in range(H):
        sl = slice(hh * HD, (hh + 1) * HD)
        qh = q[:, sl] * cos + _rotate_half(q[:, sl]) * sin
        kh = k[:, sl] * cos + _rotate_half(k[:, sl]) * sin
        sc = jnp.dot(qh, kh.T, precision=hp) * scale
        sc = jnp.where(causal, sc, jnp.float32(-1e30))
        pr = jax.nn.softmax(sc, axis=-1)
        outs.append(jnp.dot(pr, v[:, sl], precision=hp))
    attn = jnp.concatenate(outs, axis=-1)
    h1 = x + jnp.dot(attn, f32(p["wo"]), precision=hp)
    h2 = _rmsnorm(h1, p["ln2"])
    g = jnp.dot(h2, f32(p["wg"]), precision=hp)
    u = jnp.dot(h2, f32(p["wu"]), precision=hp)
    mlp = jnp.dot(jax.nn.silu(g) * u, f32(p["wd"]), precision=hp)
    return h1 + mlp


def reference_forward(inputs_embeds, params, cos, sin):
    hidden = inputs_embeds
    all_hidden = ()
    for lp in params["layers"]:
        all_hidden += (hidden,)
        hidden = jax.vmap(lambda xb, _p=lp: _ref_layer(xb, _p, cos, sin))(hidden)
    hidden = jax.vmap(lambda xb: _rmsnorm(xb, params["norm"]))(hidden)
    all_hidden += (hidden,)
    return all_hidden


# ----------------------------------------------------------------------------
if __name__ == "__main__":
    key = jax.random.PRNGKey(0)
    k_emb, k_par = jax.random.split(key)

    inputs_embeds = jax.random.normal(k_emb, (B, S, D), dtype=jnp.float32)
    params = init_params(k_par)
    cos, sin = rope_tables()

    packed = pack_params(params)
    cos_full, sin_full = rope_full(cos, sin)
    attn_bias = causal_batch_bias()

    all_hidden = custom_llama_forward(inputs_embeds, packed,
                                      cos_full, sin_full, attn_bias)
    all_hidden = jax.block_until_ready(all_hidden)

    ref = reference_forward(inputs_embeds, params, cos, sin)
    assert len(all_hidden) == L + 1
    for got, want in zip(all_hidden, ref):
        np.testing.assert_allclose(np.asarray(got), np.asarray(want),
                                   rtol=2e-3, atol=2e-3)

    print("KERNEL_OK")
</pallas_src>

<mosaic_0001>
module attributes {stable_mosaic.version = 11 : i64} {
  func.func @llama_stack_kernel(%arg0: i32, %arg1: memref<16x128xf32, #tpu.memory_space<vmem>>, %arg2: memref<2x1x128xf32, #tpu.memory_space<vmem>>, %arg3: memref<2x128x384xbf16, #tpu.memory_space<vmem>>, %arg4: memref<2x128x256xbf16, #tpu.memory_space<vmem>>, %arg5: memref<2x4x32x128xbf16, #tpu.memory_space<vmem>>, %arg6: memref<2x1x128xf32, #tpu.memory_space<vmem>>, %arg7: memref<2x128x512xbf16, #tpu.memory_space<vmem>>, %arg8: memref<2x256x128xbf16, #tpu.memory_space<vmem>>, %arg9: memref<1x128xf32, #tpu.memory_space<vmem>>, %arg10: memref<16x128xf32, #tpu.memory_space<vmem>>, %arg11: memref<16x128xf32, #tpu.memory_space<vmem>>, %arg12: memref<16x16xf32, #tpu.memory_space<vmem>>, %arg13: memref<3x16x128xf32, #tpu.memory_space<vmem>>) attributes {dimension_semantics = [#tpu.dimension_semantics<arbitrary>], iteration_bounds = array<i64: 1>, scalar_prefetch = 0 : i64, scratch_operands = 0 : i64, tpu.core_type = #tpu.core_type<tc>, window_params = [{pipeline_mode = #tpu.pipeline_mode<synchronous>, transform_indices = @transform_0, window_bounds = array<i64: 16, 128>}, {pipeline_mode = #tpu.pipeline_mode<synchronous>, transform_indices = @transform_1, window_bounds = array<i64: 2, 1, 128>}, {pipeline_mode = #tpu.pipeline_mode<synchronous>, transform_indices = @transform_2, window_bounds = array<i64: 2, 128, 384>}, {pipeline_mode = #tpu.pipeline_mode<synchronous>, transform_indices = @transform_3, window_bounds = array<i64: 2, 128, 256>}, {pipeline_mode = #tpu.pipeline_mode<synchronous>, transform_indices = @transform_4, window_bounds = array<i64: 2, 4, 32, 128>}, {pipeline_mode = #tpu.pipeline_mode<synchronous>, transform_indices = @transform_5, window_bounds = array<i64: 2, 1, 128>}, {pipeline_mode = #tpu.pipeline_mode<synchronous>, transform_indices = @transform_6, window_bounds = array<i64: 2, 128, 512>}, {pipeline_mode = #tpu.pipeline_mode<synchronous>, transform_indices = @transform_7, window_bounds = array<i64: 2, 256, 128>}, {pipeline_mode = #tpu.pipeline_mode<synchronous>, transform_indices = @transform_8, window_bounds = array<i64: 1, 128>}, {pipeline_mode = #tpu.pipeline_mode<synchronous>, transform_indices = @transform_9, window_bounds = array<i64: 16, 128>}, {pipeline_mode = #tpu.pipeline_mode<synchronous>, transform_indices = @transform_10, window_bounds = array<i64: 16, 128>}, {pipeline_mode = #tpu.pipeline_mode<synchronous>, transform_indices = @transform_11, window_bounds = array<i64: 16, 16>}, {pipeline_mode = #tpu.pipeline_mode<synchronous>, transform_indices = @transform_12, window_bounds = array<i64: 3, 16, 128>}]} {
    %c0 = arith.constant 0 : index
    %c0_0 = arith.constant 0 : index
    %0 = vector.load %arg1[%c0, %c0_0] : memref<16x128xf32, #tpu.memory_space<vmem>>, vector<16x128xf32>
    %c0_1 = arith.constant 0 : index
    %c0_2 = arith.constant 0 : index
    %1 = vector.load %arg10[%c0_1, %c0_2] : memref<16x128xf32, #tpu.memory_space<vmem>>, vector<16x128xf32>
    %c0_3 = arith.constant 0 : index
    %c0_4 = arith.constant 0 : index
    %2 = vector.load %arg11[%c0_3, %c0_4] : memref<16x128xf32, #tpu.memory_space<vmem>>, vector<16x128xf32>
    %c0_5 = arith.constant 0 : index
    %c0_6 = arith.constant 0 : index
    %3 = vector.load %arg12[%c0_5, %c0_6] : memref<16x16xf32, #tpu.memory_space<vmem>>, vector<16x16xf32>
    %c0_7 = arith.constant 0 : index
    %c0_8 = arith.constant 0 : index
    %c0_9 = arith.constant 0 : index
    %4 = vector.load %arg13[%c0_7, %c0_8, %c0_9] : memref<3x16x128xf32, #tpu.memory_space<vmem>>, vector<1x16x128xf32>
    %5 = vector.shape_cast %4 : vector<1x16x128xf32> to vector<16x128xf32>
    %6 = vector.shape_cast %0 : vector<16x128xf32> to vector<1x16x128xf32>
    tpu.vector_store %arg13[%c0_7, %c0_8, %c0_9], %6 {strides = array<i32>} : memref<3x16x128xf32, #tpu.memory_space<vmem>>, vector<1x16x128xf32>,
    %c0_10 = arith.constant 0 : index
    %c0_11 = arith.constant 0 : index
    %c0_12 = arith.constant 0 : index
    %7 = vector.load %arg2[%c0_10, %c0_11, %c0_12] : memref<2x1x128xf32, #tpu.memory_space<vmem>>, vector<1x1x128xf32>
    %8 = vector.shape_cast %7 : vector<1x1x128xf32> to vector<1x128xf32>
    %9 = arith.mulf %0, %0 : vector<16x128xf32>
    %cst = arith.constant dense<0.000000e+00> : vector<16xf32>
    %10 = vector.multi_reduction <add>, %9, %cst [1] : vector<16x128xf32> to vector<16xf32>
    %11 = vector.shape_cast %10 : vector<16xf32> to vector<16x1xf32>
    %cst_13 = arith.constant 1.280000e+02 : f32
    %12 = vector.broadcast %cst_13 : f32 to vector<16x1xf32>
    %13 = arith.divf %11, %12 : vector<16x1xf32>
    %cst_14 = arith.constant 9.99999997E-7 : f32
    %14 = vector.broadcast %cst_14 : f32 to vector<16x1xf32>
    %15 = arith.addf %13, %14 : vector<16x1xf32>
    %16 = math.rsqrt %15 : vector<16x1xf32>
    %17 = vector.broadcast %16 : vector<16x1xf32> to vector<16x128xf32>
    %18 = arith.mulf %0, %17 : vector<16x128xf32>
    %19 = vector.broadcast %8 : vector<1x128xf32> to vector<16x128xf32>
    %20 = arith.mulf %18, %19 : vector<16x128xf32>
    %21 = arith.truncf %20 : vector<16x128xf32> to vector<16x128xbf16>
    %c0_15 = arith.constant 0 : index
    %c0_16 = arith.constant 0 : index
    %c0_17 = arith.constant 0 : index
    %22 = vector.load %arg3[%c0_15, %c0_16, %c0_17] : memref<2x128x384xbf16, #tpu.memory_space<vmem>>, vector<1x128x384xbf16>
    %23 = vector.shape_cast %22 : vector<1x128x384xbf16> to vector<128x384xbf16>
    %cst_18 = arith.constant dense<0.000000e+00> : vector<16x384xf32>
    %24 = tpu.matmul %21, %23, %cst_18 {dimension_numbers = #tpu.dot_dimension_numbers<[1], [0], [0], [1], [0, 0, 1, 1], [], []>} : vector<16x128xbf16>, vector<128x384xbf16>, vector<16x384xf32> -> vector<16x384xf32>
    %c0_19 = arith.constant 0 : index
    %c0_20 = arith.constant 0 : index
    %c0_21 = arith.constant 0 : index
    %25 = vector.load %arg4[%c0_19, %c0_20, %c0_21] : memref<2x128x256xbf16, #tpu.memory_space<vmem>>, vector<1x128x256xbf16>
    %26 = vector.shape_cast %25 : vector<1x128x256xbf16> to vector<128x256xbf16>
    %cst_22 = arith.constant dense<0.000000e+00> : vector<16x256xf32>
    %27 = tpu.matmul %21, %26, %cst_22 {dimension_numbers = #tpu.dot_dimension_numbers<[1], [0], [0], [1], [0, 0, 1, 1], [], []>} : vector<16x128xbf16>, vector<128x256xbf16>, vector<16x256xf32> -> vector<16x256xf32>
    %28 = vector.extract_strided_slice %24 {offsets = [0, 0], sizes = [16, 128], strides = [1, 1]} : vector<16x384xf32> to vector<16x128xf32>
    %29 = vector.extract_strided_slice %24 {offsets = [0, 128], sizes = [16, 128], strides = [1, 1]} : vector<16x384xf32> to vector<16x128xf32>
    %30 = vector.extract_strided_slice %24 {offsets = [0, 256], sizes = [16, 128], strides = [1, 1]} : vector<16x384xf32> to vector<16x128xf32>
    %31 = arith.mulf %28, %1 : vector<16x128xf32>
    %32 = vector.extract_strided_slice %27 {offsets = [0, 0], sizes = [16, 128], strides = [1, 1]} : vector<16x256xf32> to vector<16x128xf32>
    %33 = arith.mulf %32, %2 : vector<16x128xf32>
    %34 = arith.addf %31, %33 : vector<16x128xf32>
    %35 = arith.mulf %29, %1 : vector<16x128xf32>
    %36 = vector.extract_strided_slice %27 {offsets = [0, 128], sizes = [16, 128], strides = [1, 1]} : vector<16x256xf32> to vector<16x128xf32>
    %37 = arith.mulf %36, %2 : vector<16x128xf32>
    %38 = arith.addf %35, %37 : vector<16x128xf32>
    %cst_23 = arith.constant 0.000000e+00 : f32
    %39 = vector.broadcast %cst_23 : f32 to vector<16x128xf32>
    %40 = vector.extract_strided_slice %34 {offsets = [0, 0], sizes = [16, 32], strides = [1, 1]} : vector<16x128xf32> to vector<16x32xf32>
    %41 = vector.extract_strided_slice %38 {offsets = [0, 0], sizes = [16, 32], strides = [1, 1]} : vector<16x128xf32> to vector<16x32xf32>
    %42 = vector.extract_strided_slice %30 {offsets = [0, 0], sizes = [16, 32], strides = [1, 1]} : vector<16x128xf32> to vector<16x32xf32>
    %43 = tpu.transpose %41, [1, 0] : vector<16x32xf32> -> vector<32x16xf32>
    %cst_24 = arith.constant dense<0.000000e+00> : vector<16x16xf32>
    %44 = tpu.matmul %40, %43, %cst_24 {dimension_numbers = #tpu.dot_dimension_numbers<[1], [0], [0], [1], [0, 0, 1, 1], [], []>} : vector<16x32xf32>, vector<32x16xf32>, vector<16x16xf32> -> vector<16x16xf32>
    %cst_25 = arith.constant 0.176776692 : f32
    %45 = vector.broadcast %cst_25 : f32 to vector<16x16xf32>
    %46 = arith.mulf %44, %45 : vector<16x16xf32>
    %47 = arith.addf %46, %3 : vector<16x16xf32>
    %cst_26 = arith.constant dense<0xFF800000> : vector<16xf32>
    %48 = vector.multi_reduction <maximumf>, %47, %cst_26 [1] : vector<16x16xf32> to vector<16xf32>
    %49 = vector.shape_cast %48 : vector<16xf32> to vector<16x1xf32>
    %50 = vector.broadcast %49 : vector<16x1xf32> to vector<16x16xf32>
    %51 = arith.subf %47, %50 : vector<16x16xf32>
    %52 = math.exp %51 : vector<16x16xf32>
    %cst_27 = arith.constant dense<0.000000e+00> : vector<16xf32>
    %53 = vector.multi_reduction <add>, %52, %cst_27 [1] : vector<16x16xf32> to vector<16xf32>
    %54 = vector.shape_cast %53 : vector<16xf32> to vector<16x1xf32>
    %55 = tpu.reciprocal %54 {approx = true} : vector<16x1xf32> -> vector<16x1xf32>
    %56 = vector.broadcast %55 : vector<16x1xf32> to vector<16x16xf32>
    %57 = arith.mulf %52, %56 : vector<16x16xf32>
    %cst_28 = arith.constant dense<0.000000e+00> : vector<16x32xf32>
    %58 = tpu.matmul %57, %42, %cst_28 {dimension_numbers = #tpu.dot_dimension_numbers<[1], [0], [0], [1], [0, 0, 1, 1], [], []>} : vector<16x16xf32>, vector<16x32xf32>, vector<16x32xf32> -> vector<16x32xf32>
    %59 = arith.truncf %58 : vector<16x32xf32> to vector<16x32xbf16>
    %c0_29 = arith.constant 0 : index
    %c0_30 = arith.constant 0 : index
    %c0_31 = arith.constant 0 : index
    %c0_32 = arith.constant 0 : index
    %60 = vector.load %arg5[%c0_29, %c0_30, %c0_31, %c0_32] : memref<2x4x32x128xbf16, #tpu.memory_space<vmem>>, vector<1x1x32x128xbf16>
    %61 = vector.shape_cast %60 : vector<1x1x32x128xbf16> to vector<32x128xbf16>
    %cst_33 = arith.constant dense<0.000000e+00> : vector<16x128xf32>
    %62 = tpu.matmul %59, %61, %cst_33 {dimension_numbers = #tpu.dot_dimension_numbers<[1], [0], [0], [1], [0, 0, 1, 1], [], []>} : vector<16x32xbf16>, vector<32x128xbf16>, vector<16x128xf32> -> vector<16x128xf32>
    %63 = arith.addf %39, %62 : vector<16x128xf32>
    %64 = vector.extract_strided_slice %34 {offsets = [0, 32], sizes = [16, 32], strides = [1, 1]} : vector<16x128xf32> to vector<16x32xf32>
    %65 = vector.extract_strided_slice %38 {offsets = [0, 32], sizes = [16, 32], strides = [1, 1]} : vector<16x128xf32> to vector<16x32xf32>
    %66 = vector.extract_strided_slice %30 {offsets = [0, 32], sizes = [16, 32], strides = [1, 1]} : vector<16x128xf32> to vector<16x32xf32>
    %67 = tpu.transpose %65, [1, 0] : vector<16x32xf32> -> vector<32x16xf32>
    %cst_34 = arith.constant dense<0.000000e+00> : vector<16x16xf32>
    %68 = tpu.matmul %64, %67, %cst_34 {dimension_numbers = #tpu.dot_dimension_numbers<[1], [0], [0], [1], [0, 0, 1, 1], [], []>} : vector<16x32xf32>, vector<32x16xf32>, vector<16x16xf32> -> vector<16x16xf32>
    %cst_35 = arith.constant 0.176776692 : f32
    %69 = vector.broadcast %cst_35 : f32 to vector<16x16xf32>
    %70 = arith.mulf %68, %69 : vector<16x16xf32>
    %71 = arith.addf %70, %3 : vector<16x16xf32>
    %cst_36 = arith.constant dense<0xFF800000> : vector<16xf32>
    %72 = vector.multi_reduction <maximumf>, %71, %cst_36 [1] : vector<16x16xf32> to vector<16xf32>
    %73 = vector.shape_cast %72 : vector<16xf32> to vector<16x1xf32>
    %74 = vector.broadcast %73 : vector<16x1xf32> to vector<16x16xf32>
    %75 = arith.subf %71, %74 : vector<16x16xf32>
    %76 = math.exp %75 : vector<16x16xf32>
    %cst_37 = arith.constant dense<0.000000e+00> : vector<16xf32>
    %77 = vector.multi_reduction <add>, %76, %cst_37 [1] : vector<16x16xf32> to vector<16xf32>
    %78 = vector.shape_cast %77 : vector<16xf32> to vector<16x1xf32>
    %79 = tpu.reciprocal %78 {approx = true} : vector<16x1xf32> -> vector<16x1xf32>
    %80 = vector.broadcast %79 : vector<16x1xf32> to vector<16x16xf32>
    %81 = arith.mulf %76, %80 : vector<16x16xf32>
    %cst_38 = arith.constant dense<0.000000e+00> : vector<16x32xf32>
    %82 = tpu.matmul %81, %66, %cst_38 {dimension_numbers = #tpu.dot_dimension_numbers<[1], [0], [0], [1], [0, 0, 1, 1], [], []>} : vector<16x16xf32>, vector<16x32xf32>, vector<16x32xf32> -> vector<16x32xf32>
    %83 = arith.truncf %82 : vector<16x32xf32> to vector<16x32xbf16>
    %c0_39 = arith.constant 0 : index
    %c1 = arith.constant 1 : index
    %c0_40 = arith.constant 0 : index
    %c0_41 = arith.constant 0 : index
    %84 = vector.load %arg5[%c0_39, %c1, %c0_40, %c0_41] : memref<2x4x32x128xbf16, #tpu.memory_space<vmem>>, vector<1x1x32x128xbf16>
    %85 = vector.shape_cast %84 : vector<1x1x32x128xbf16> to vector<32x128xbf16>
    %cst_42 = arith.constant dense<0.000000e+00> : vector<16x128xf32>
    %86 = tpu.matmul %83, %85, %cst_42 {dimension_numbers = #tpu.dot_dimension_numbers<[1], [0], [0], [1], [0, 0, 1, 1], [], []>} : vector<16x32xbf16>, vector<32x128xbf16>, vector<16x128xf32> -> vector<16x128xf32>
    %87 = arith.addf %63, %86 : vector<16x128xf32>
    %88 = vector.extract_strided_slice %34 {offsets = [0, 64], sizes = [16, 32], strides = [1, 1]} : vector<16x128xf32> to vector<16x32xf32>
    %89 = vector.extract_strided_slice %38 {offsets = [0, 64], sizes = [16, 32], strides = [1, 1]} : vector<16x128xf32> to vector<16x32xf32>
    %90 = vector.extract_strided_slice %30 {offsets = [0, 64], sizes = [16, 32], strides = [1, 1]} : vector<16x128xf32> to vector<16x32xf32>
    %91 = tpu.transpose %89, [1, 0] : vector<16x32xf32> -> vector<32x16xf32>
    %cst_43 = arith.constant dense<0.000000e+00> : vector<16x16xf32>
    %92 = tpu.matmul %88, %91, %cst_43 {dimension_numbers = #tpu.dot_dimension_numbers<[1], [0], [0], [1], [0, 0, 1, 1], [], []>} : vector<16x32xf32>, vector<32x16xf32>, vector<16x16xf32> -> vector<16x16xf32>
    %cst_44 = arith.constant 0.176776692 : f32
    %93 = vector.broadcast %cst_44 : f32 to vector<16x16xf32>
    %94 = arith.mulf %92, %93 : vector<16x16xf32>
    %95 = arith.addf %94, %3 : vector<16x16xf32>
    %cst_45 = arith.constant dense<0xFF800000> : vector<16xf32>
    %96 = vector.multi_reduction <maximumf>, %95, %cst_45 [1] : vector<16x16xf32> to vector<16xf32>
    %97 = vector.shape_cast %96 : vector<16xf32> to vector<16x1xf32>
    %98 = vector.broadcast %97 : vector<16x1xf32> to vector<16x16xf32>
    %99 = arith.subf %95, %98 : vector<16x16xf32>
    %100 = math.exp %99 : vector<16x16xf32>
    %cst_46 = arith.constant dense<0.000000e+00> : vector<16xf32>
    %101 = vector.multi_reduction <add>, %100, %cst_46 [1] : vector<16x16xf32> to vector<16xf32>
    %102 = vector.shape_cast %101 : vector<16xf32> to vector<16x1xf32>
    %103 = tpu.reciprocal %102 {approx = true} : vector<16x1xf32> -> vector<16x1xf32>
    %104 = vector.broadcast %103 : vector<16x1xf32> to vector<16x16xf32>
    %105 = arith.mulf %100, %104 : vector<16x16xf32>
    %cst_47 = arith.constant dense<0.000000e+00> : vector<16x32xf32>
    %106 = tpu.matmul %105, %90, %cst_47 {dimension_numbers = #tpu.dot_dimension_numbers<[1], [0], [0], [1], [0, 0, 1, 1], [], []>} : vector<16x16xf32>, vector<16x32xf32>, vector<16x32xf32> -> vector<16x32xf32>
    %107 = arith.truncf %106 : vector<16x32xf32> to vector<16x32xbf16>
    %c0_48 = arith.constant 0 : index
    %c2 = arith.constant 2 : index
    %c0_49 = arith.constant 0 : index
    %c0_50 = arith.constant 0 : index
    %108 = vector.load %arg5[%c0_48, %c2, %c0_49, %c0_50] : memref<2x4x32x128xbf16, #tpu.memory_space<vmem>>, vector<1x1x32x128xbf16>
    %109 = vector.shape_cast %108 : vector<1x1x32x128xbf16> to vector<32x128xbf16>
    %cst_51 = arith.constant dense<0.000000e+00> : vector<16x128xf32>
    %110 = tpu.matmul %107, %109, %cst_51 {dimension_numbers = #tpu.dot_dimension_numbers<[1], [0], [0], [1], [0, 0, 1, 1], [], []>} : vector<16x32xbf16>, vector<32x128xbf16>, vector<16x128xf32> -> vector<16x128xf32>
    %111 = arith.addf %87, %110 : vector<16x128xf32>
    %112 = vector.extract_strided_slice %34 {offsets = [0, 96], sizes = [16, 32], strides = [1, 1]} : vector<16x128xf32> to vector<16x32xf32>
    %113 = vector.extract_strided_slice %38 {offsets = [0, 96], sizes = [16, 32], strides = [1, 1]} : vector<16x128xf32> to vector<16x32xf32>
    %114 = vector.extract_strided_slice %30 {offsets = [0, 96], sizes = [16, 32], strides = [1, 1]} : vector<16x128xf32> to vector<16x32xf32>
    %115 = tpu.transpose %113, [1, 0] : vector<16x32xf32> -> vector<32x16xf32>
    %cst_52 = arith.constant dense<0.000000e+00> : vector<16x16xf32>
    %116 = tpu.matmul %112, %115, %cst_52 {dimension_numbers = #tpu.dot_dimension_numbers<[1], [0], [0], [1], [0, 0, 1, 1], [], []>} : vector<16x32xf32>, vector<32x16xf32>, vector<16x16xf32> -> vector<16x16xf32>
    %cst_53 = arith.constant 0.176776692 : f32
    %117 = vector.broadcast %cst_53 : f32 to vector<16x16xf32>
    %118 = arith.mulf %116, %117 : vector<16x16xf32>
    %119 = arith.addf %118, %3 : vector<16x16xf32>
    %cst_54 = arith.constant dense<0xFF800000> : vector<16xf32>
    %120 = vector.multi_reduction <maximumf>, %119, %cst_54 [1] : vector<16x16xf32> to vector<16xf32>
    %121 = vector.shape_cast %120 : vector<16xf32> to vector<16x1xf32>
    %122 = vector.broadcast %121 : vector<16x1xf32> to vector<16x16xf32>
    %123 = arith.subf %119, %122 : vector<16x16xf32>
    %124 = math.exp %123 : vector<16x16xf32>
    %cst_55 = arith.constant dense<0.000000e+00> : vector<16xf32>
    %125 = vector.multi_reduction <add>, %124, %cst_55 [1] : vector<16x16xf32> to vector<16xf32>
    %126 = vector.shape_cast %125 : vector<16xf32> to vector<16x1xf32>
    %127 = tpu.reciprocal %126 {approx = true} : vector<16x1xf32> -> vector<16x1xf32>
    %128 = vector.broadcast %127 : vector<16x1xf32> to vector<16x16xf32>
    %129 = arith.mulf %124, %128 : vector<16x16xf32>
    %cst_56 = arith.constant dense<0.000000e+00> : vector<16x32xf32>
    %130 = tpu.matmul %129, %114, %cst_56 {dimension_numbers = #tpu.dot_dimension_numbers<[1], [0], [0], [1], [0, 0, 1, 1], [], []>} : vector<16x16xf32>, vector<16x32xf32>, vector<16x32xf32> -> vector<16x32xf32>
    %131 = arith.truncf %130 : vector<16x32xf32> to vector<16x32xbf16>
    %c0_57 = arith.constant 0 : index
    %c3 = arith.constant 3 : index
    %c0_58 = arith.constant 0 : index
    %c0_59 = arith.constant 0 : index
    %132 = vector.load %arg5[%c0_57, %c3, %c0_58, %c0_59] : memref<2x4x32x128xbf16, #tpu.memory_space<vmem>>, vector<1x1x32x128xbf16>
    %133 = vector.shape_cast %132 : vector<1x1x32x128xbf16> to vector<32x128xbf16>
    %cst_60 = arith.constant dense<0.000000e+00> : vector<16x128xf32>
    %134 = tpu.matmul %131, %133, %cst_60 {dimension_numbers = #tpu.dot_dimension_numbers<[1], [0], [0], [1], [0, 0, 1, 1], [], []>} : vector<16x32xbf16>, vector<32x128xbf16>, vector<16x128xf32> -> vector<16x128xf32>
    %135 = arith.addf %111, %134 : vector<16x128xf32>
    %136 = arith.addf %0, %135 : vector<16x128xf32>
    %c0_61 = arith.constant 0 : index
    %c0_62 = arith.constant 0 : index
    %c0_63 = arith.constant 0 : index
    %137 = vector.load %arg6[%c0_61, %c0_62, %c0_63] : memref<2x1x128xf32, #tpu.memory_space<vmem>>, vector<1x1x128xf32>
    %138 = vector.shape_cast %137 : vector<1x1x128xf32> to vector<1x128xf32>
    %139 = arith.mulf %136, %136 : vector<16x128xf32>
    %cst_64 = arith.constant dense<0.000000e+00> : vector<16xf32>
    %140 = vector.multi_reduction <add>, %139, %cst_64 [1] : vector<16x128xf32> to vector<16xf32>
    %141 = vector.shape_cast %140 : vector<16xf32> to vector<16x1xf32>
    %cst_65 = arith.constant 1.280000e+02 : f32
    %142 = vector.broadcast %cst_65 : f32 to vector<16x1xf32>
    %143 = arith.divf %141, %142 : vector<16x1xf32>
    %cst_66 = arith.constant 9.99999997E-7 : f32
    %144 = vector.broadcast %cst_66 : f32 to vector<16x1xf32>
    %145 = arith.addf %143, %144 : vector<16x1xf32>
    %146 = math.rsqrt %145 : vector<16x1xf32>
    %147 = vector.broadcast %146 : vector<16x1xf32> to vector<16x128xf32>
    %148 = arith.mulf %136, %147 : vector<16x128xf32>
    %149 = vector.broadcast %138 : vector<1x128xf32> to vector<16x128xf32>
    %150 = arith.mulf %148, %149 : vector<16x128xf32>
    %151 = arith.truncf %150 : vector<16x128xf32> to vector<16x128xbf16>
    %c0_67 = arith.constant 0 : index
    %c0_68 = arith.constant 0 : index
    %c0_69 = arith.constant 0 : index
    %152 = vector.load %arg7[%c0_67, %c0_68, %c0_69] : memref<2x128x512xbf16, #tpu.memory_space<vmem>>, vector<1x128x512xbf16>
    %153 = vector.shape_cast %152 : vector<1x128x512xbf16> to vector<128x512xbf16>
    %cst_70 = arith.constant dense<0.000000e+00> : vector<16x512xf32>
    %154 = tpu.matmul %151, %153, %cst_70 {dimension_numbers = #tpu.dot_dimension_numbers<[1], [0], [0], [1], [0, 0, 1, 1], [], []>} : vector<16x128xbf16>, vector<128x512xbf16>, vector<16x512xf32> -> vector<16x512xf32>
    %155 = vector.extract_strided_slice %154 {offsets = [0, 0], sizes = [16, 256], strides = [1, 1]} : vector<16x512xf32> to vector<16x256xf32>
    %156 = vector.extract_strided_slice %154 {offsets = [0, 256], sizes = [16, 256], strides = [1, 1]} : vector<16x512xf32> to vector<16x256xf32>
    %157 = arith.negf %155 : vector<16x256xf32>
    %158 = math.exp %157 : vector<16x256xf32>
    %cst_71 = arith.constant 1.000000e+00 : f32
    %159 = vector.broadcast %cst_71 : f32 to vector<16x256xf32>
    %160 = arith.addf %159, %158 : vector<16x256xf32>
    %161 = arith.divf %159, %160 : vector<16x256xf32>
    %162 = arith.mulf %155, %161 : vector<16x256xf32>
    %163 = arith.mulf %162, %156 : vector<16x256xf32>
    %164 = arith.truncf %163 : vector<16x256xf32> to vector<16x256xbf16>
    %c0_72 = arith.constant 0 : index
    %c0_73 = arith.constant 0 : index
    %c0_74 = arith.constant 0 : index
    %165 = vector.load %arg8[%c0_72, %c0_73, %c0_74] : memref<2x256x128xbf16, #tpu.memory_space<vmem>>, vector<1x256x128xbf16>
    %166 = vector.shape_cast %165 : vector<1x256x128xbf16> to vector<256x128xbf16>
    %cst_75 = arith.constant dense<0.000000e+00> : vector<16x128xf32>
    %167 = tpu.matmul %164, %166, %cst_75 {dimension_numbers = #tpu.dot_dimension_numbers<[1], [0], [0], [1], [0, 0, 1, 1], [], []>} : vector<16x256xbf16>, vector<256x128xbf16>, vector<16x128xf32> -> vector<16x128xf32>
    %168 = arith.addf %136, %167 : vector<16x128xf32>
    %c1_76 = arith.constant 1 : index
    %c0_77 = arith.constant 0 : index
    %c0_78 = arith.constant 0 : index
    %169 = vector.load %arg13[%c1_76, %c0_77, %c0_78] : memref<3x16x128xf32, #tpu.memory_space<vmem>>, vector<1x16x128xf32>
    %170 = vector.shape_cast %169 : vector<1x16x128xf32> to vector<16x128xf32>
    %171 = vector.shape_cast %168 : vector<16x128xf32> to vector<1x16x128xf32>
    tpu.vector_store %arg13[%c1_76, %c0_77, %c0_78], %171 {strides = array<i32>} : memref<3x16x128xf32, #tpu.memory_space<vmem>>, vector<1x16x128xf32>,
    %c1_79 = arith.constant 1 : index
    %c0_80 = arith.constant 0 : index
    %c0_81 = arith.constant 0 : index
    %172 = vector.load %arg2[%c1_79, %c0_80, %c0_81] : memref<2x1x128xf32, #tpu.memory_space<vmem>>, vector<1x1x128xf32>
    %173 = vector.shape_cast %172 : vector<1x1x128xf32> to vector<1x128xf32>
    %174 = arith.mulf %168, %168 : vector<16x128xf32>
    %cst_82 = arith.constant dense<0.000000e+00> : vector<16xf32>
    %175 = vector.multi_reduction <add>, %174, %cst_82 [1] : vector<16x128xf32> to vector<16xf32>
    %176 = vector.shape_cast %175 : vector<16xf32> to vector<16x1xf32>
    %cst_83 = arith.constant 1.280000e+02 : f32
    %177 = vector.broadcast %cst_83 : f32 to vector<16x1xf32>
    %178 = arith.divf %176, %177 : vector<16x1xf32>
    %cst_84 = arith.constant 9.99999997E-7 : f32
    %179 = vector.broadcast %cst_84 : f32 to vector<16x1xf32>
    %180 = arith.addf %178, %179 : vector<16x1xf32>
    %181 = math.rsqrt %180 : vector<16x1xf32>
    %182 = vector.broadcast %181 : vector<16x1xf32> to vector<16x128xf32>
    %183 = arith.mulf %168, %182 : vector<16x128xf32>
    %184 = vector.broadcast %173 : vector<1x128xf32> to vector<16x128xf32>
    %185 = arith.mulf %183, %184 : vector<16x128xf32>
    %186 = arith.truncf %185 : vector<16x128xf32> to vector<16x128xbf16>
    %c1_85 = arith.constant 1 : index
    %c0_86 = arith.constant 0 : index
    %c0_87 = arith.constant 0 : index
    %187 = vector.load %arg3[%c1_85, %c0_86, %c0_87] : memref<2x128x384xbf16, #tpu.memory_space<vmem>>, vector<1x128x384xbf16>
    %188 = vector.shape_cast %187 : vector<1x128x384xbf16> to vector<128x384xbf16>
    %cst_88 = arith.constant dense<0.000000e+00> : vector<16x384xf32>
    %189 = tpu.matmul %186, %188, %cst_88 {dimension_numbers = #tpu.dot_dimension_numbers<[1], [0], [0], [1], [0, 0, 1, 1], [], []>} : vector<16x128xbf16>, vector<128x384xbf16>, vector<16x384xf32> -> vector<16x384xf32>
    %c1_89 = arith.constant 1 : index
    %c0_90 = arith.constant 0 : index
    %c0_91 = arith.constant 0 : index
    %190 = vector.load %arg4[%c1_89, %c0_90, %c0_91] : memref<2x128x256xbf16, #tpu.memory_space<vmem>>, vector<1x128x256xbf16>
    %191 = vector.shape_cast %190 : vector<1x128x256xbf16> to vector<128x256xbf16>
    %cst_92 = arith.constant dense<0.000000e+00> : vector<16x256xf32>
    %192 = tpu.matmul %186, %191, %cst_92 {dimension_numbers = #tpu.dot_dimension_numbers<[1], [0], [0], [1], [0, 0, 1, 1], [], []>} : vector<16x128xbf16>, vector<128x256xbf16>, vector<16x256xf32> -> vector<16x256xf32>
    %193 = vector.extract_strided_slice %189 {offsets = [0, 0], sizes = [16, 128], strides = [1, 1]} : vector<16x384xf32> to vector<16x128xf32>
    %194 = vector.extract_strided_slice %189 {offsets = [0, 128], sizes = [16, 128], strides = [1, 1]} : vector<16x384xf32> to vector<16x128xf32>
    %195 = vector.extract_strided_slice %189 {offsets = [0, 256], sizes = [16, 128], strides = [1, 1]} : vector<16x384xf32> to vector<16x128xf32>
    %196 = arith.mulf %193, %1 : vector<16x128xf32>
    %197 = vector.extract_strided_slice %192 {offsets = [0, 0], sizes = [16, 128], strides = [1, 1]} : vector<16x256xf32> to vector<16x128xf32>
    %198 = arith.mulf %197, %2 : vector<16x128xf32>
    %199 = arith.addf %196, %198 : vector<16x128xf32>
    %200 = arith.mulf %194, %1 : vector<16x128xf32>
    %201 = vector.extract_strided_slice %192 {offsets = [0, 128], sizes = [16, 128], strides = [1, 1]} : vector<16x256xf32> to vector<16x128xf32>
    %202 = arith.mulf %201, %2 : vector<16x128xf32>
    %203 = arith.addf %200, %202 : vector<16x128xf32>
    %cst_93 = arith.constant 0.000000e+00 : f32
    %204 = vector.broadcast %cst_93 : f32 to vector<16x128xf32>
    %205 = vector.extract_strided_slice %199 {offsets = [0, 0], sizes = [16, 32], strides = [1, 1]} : vector<16x128xf32> to vector<16x32xf32>
    %206 = vector.extract_strided_slice %203 {offsets = [0, 0], sizes = [16, 32], strides = [1, 1]} : vector<16x128xf32> to vector<16x32xf32>
    %207 = vector.extract_strided_slice %195 {offsets = [0, 0], sizes = [16, 32], strides = [1, 1]} : vector<16x128xf32> to vector<16x32xf32>
    %208 = tpu.transpose %206, [1, 0] : vector<16x32xf32> -> vector<32x16xf32>
    %cst_94 = arith.constant dense<0.000000e+00> : vector<16x16xf32>
    %209 = tpu.matmul %205, %208, %cst_94 {dimension_numbers = #tpu.dot_dimension_numbers<[1], [0], [0], [1], [0, 0, 1, 1], [], []>} : vector<16x32xf32>, vector<32x16xf32>, vector<16x16xf32> -> vector<16x16xf32>
    %cst_95 = arith.constant 0.176776692 : f32
    %210 = vector.broadcast %cst_95 : f32 to vector<16x16xf32>
    %211 = arith.mulf %209, %210 : vector<16x16xf32>
    %212 = arith.addf %211, %3 : vector<16x16xf32>
    %cst_96 = arith.constant dense<0xFF800000> : vector<16xf32>
    %213 = vector.multi_reduction <maximumf>, %212, %cst_96 [1] : vector<16x16xf32> to vector<16xf32>
    %214 = vector.shape_cast %213 : vector<16xf32> to vector<16x1xf32>
    %215 = vector.broadcast %214 : vector<16x1xf32> to vector<16x16xf32>
    %216 = arith.subf %212, %215 : vector<16x16xf32>
    %217 = math.exp %216 : vector<16x16xf32>
    %cst_97 = arith.constant dense<0.000000e+00> : vector<16xf32>
    %218 = vector.multi_reduction <add>, %217, %cst_97 [1] : vector<16x16xf32> to vector<16xf32>
    %219 = vector.shape_cast %218 : vector<16xf32> to vector<16x1xf32>
    %220 = tpu.reciprocal %219 {approx = true} : vector<16x1xf32> -> vector<16x1xf32>
    %221 = vector.broadcast %220 : vector<16x1xf32> to vector<16x16xf32>
    %222 = arith.mulf %217, %221 : vector<16x16xf32>
    %cst_98 = arith.constant dense<0.000000e+00> : vector<16x32xf32>
    %223 = tpu.matmul %222, %207, %cst_98 {dimension_numbers = #tpu.dot_dimension_numbers<[1], [0], [0], [1], [0, 0, 1, 1], [], []>} : vector<16x16xf32>, vector<16x32xf32>, vector<16x32xf32> -> vector<16x32xf32>
    %224 = arith.truncf %223 : vector<16x32xf32> to vector<16x32xbf16>
    %c1_99 = arith.constant 1 : index
    %c0_100 = arith.constant 0 : index
    %c0_101 = arith.constant 0 : index
    %c0_102 = arith.constant 0 : index
    %225 = vector.load %arg5[%c1_99, %c0_100, %c0_101, %c0_102] : memref<2x4x32x128xbf16, #tpu.memory_space<vmem>>, vector<1x1x32x128xbf16>
    %226 = vector.shape_cast %225 : vector<1x1x32x128xbf16> to vector<32x128xbf16>
    %cst_103 = arith.constant dense<0.000000e+00> : vector<16x128xf32>
    %227 = tpu.matmul %224, %226, %cst_103 {dimension_numbers = #tpu.dot_dimension_numbers<[1], [0], [0], [1], [0, 0, 1, 1], [], []>} : vector<16x32xbf16>, vector<32x128xbf16>, vector<16x128xf32> -> vector<16x128xf32>
    %228 = arith.addf %204, %227 : vector<16x128xf32>
    %229 = vector.extract_strided_slice %199 {offsets = [0, 32], sizes = [16, 32], strides = [1, 1]} : vector<16x128xf32> to vector<16x32xf32>
    %230 = vector.extract_strided_slice %203 {offsets = [0, 32], sizes = [16, 32], strides = [1, 1]} : vector<16x128xf32> to vector<16x32xf32>
    %231 = vector.extract_strided_slice %195 {offsets = [0, 32], sizes = [16, 32], strides = [1, 1]} : vector<16x128xf32> to vector<16x32xf32>
    %232 = tpu.transpose %230, [1, 0] : vector<16x32xf32> -> vector<32x16xf32>
    %cst_104 = arith.constant dense<0.000000e+00> : vector<16x16xf32>
    %233 = tpu.matmul %229, %232, %cst_104 {dimension_numbers = #tpu.dot_dimension_numbers<[1], [0], [0], [1], [0, 0, 1, 1], [], []>} : vector<16x32xf32>, vector<32x16xf32>, vector<16x16xf32> -> vector<16x16xf32>
    %cst_105 = arith.constant 0.176776692 : f32
    %234 = vector.broadcast %cst_105 : f32 to vector<16x16xf32>
    %235 = arith.mulf %233, %234 : vector<16x16xf32>
    %236 = arith.addf %235, %3 : vector<16x16xf32>
    %cst_106 = arith.constant dense<0xFF800000> : vector<16xf32>
    %237 = vector.multi_reduction <maximumf>, %236, %cst_106 [1] : vector<16x16xf32> to vector<16xf32>
    %238 = vector.shape_cast %237 : vector<16xf32> to vector<16x1xf32>
    %239 = vector.broadcast %238 : vector<16x1xf32> to vector<16x16xf32>
    %240 = arith.subf %236, %239 : vector<16x16xf32>
    %241 = math.exp %240 : vector<16x16xf32>
    %cst_107 = arith.constant dense<0.000000e+00> : vector<16xf32>
    %242 = vector.multi_reduction <add>, %241, %cst_107 [1] : vector<16x16xf32> to vector<16xf32>
    %243 = vector.shape_cast %242 : vector<16xf32> to vector<16x1xf32>
    %244 = tpu.reciprocal %243 {approx = true} : vector<16x1xf32> -> vector<16x1xf32>
    %245 = vector.broadcast %244 : vector<16x1xf32> to vector<16x16xf32>
    %246 = arith.mulf %241, %245 : vector<16x16xf32>
    %cst_108 = arith.constant dense<0.000000e+00> : vector<16x32xf32>
    %247 = tpu.matmul %246, %231, %cst_108 {dimension_numbers = #tpu.dot_dimension_numbers<[1], [0], [0], [1], [0, 0, 1, 1], [], []>} : vector<16x16xf32>, vector<16x32xf32>, vector<16x32xf32> -> vector<16x32xf32>
    %248 = arith.truncf %247 : vector<16x32xf32> to vector<16x32xbf16>
    %c1_109 = arith.constant 1 : index
    %c1_110 = arith.constant 1 : index
    %c0_111 = arith.constant 0 : index
    %c0_112 = arith.constant 0 : index
    %249 = vector.load %arg5[%c1_109, %c1_110, %c0_111, %c0_112] : memref<2x4x32x128xbf16, #tpu.memory_space<vmem>>, vector<1x1x32x128xbf16>
    %250 = vector.shape_cast %249 : vector<1x1x32x128xbf16> to vector<32x128xbf16>
    %cst_113 = arith.constant dense<0.000000e+00> : vector<16x128xf32>
    %251 = tpu.matmul %248, %250, %cst_113 {dimension_numbers = #tpu.dot_dimension_numbers<[1], [0], [0], [1], [0, 0, 1, 1], [], []>} : vector<16x32xbf16>, vector<32x128xbf16>, vector<16x128xf32> -> vector<16x128xf32>
    %252 = arith.addf %228, %251 : vector<16x128xf32>
    %253 = vector.extract_strided_slice %199 {offsets = [0, 64], sizes = [16, 32], strides = [1, 1]} : vector<16x128xf32> to vector<16x32xf32>
    %254 = vector.extract_strided_slice %203 {offsets = [0, 64], sizes = [16, 32], strides = [1, 1]} : vector<16x128xf32> to vector<16x32xf32>
    %255 = vector.extract_strided_slice %195 {offsets = [0, 64], sizes = [16, 32], strides = [1, 1]} : vector<16x128xf32> to vector<16x32xf32>
    %256 = tpu.transpose %254, [1, 0] : vector<16x32xf32> -> vector<32x16xf32>
    %cst_114 = arith.constant dense<0.000000e+00> : vector<16x16xf32>
    %257 = tpu.matmul %253, %256, %cst_114 {dimension_numbers = #tpu.dot_dimension_numbers<[1], [0], [0], [1], [0, 0, 1, 1], [], []>} : vector<16x32xf32>, vector<32x16xf32>, vector<16x16xf32> -> vector<16x16xf32>
    %cst_115 = arith.constant 0.176776692 : f32
    %258 = vector.broadcast %cst_115 : f32 to vector<16x16xf32>
    %259 = arith.mulf %257, %258 : vector<16x16xf32>
    %260 = arith.addf %259, %3 : vector<16x16xf32>
    %cst_116 = arith.constant dense<0xFF800000> : vector<16xf32>
    %261 = vector.multi_reduction <maximumf>, %260, %cst_116 [1] : vector<16x16xf32> to vector<16xf32>
    %262 = vector.shape_cast %261 : vector<16xf32> to vector<16x1xf32>
    %263 = vector.broadcast %262 : vector<16x1xf32> to vector<16x16xf32>
    %264 = arith.subf %260, %263 : vector<16x16xf32>
    %265 = math.exp %264 : vector<16x16xf32>
    %cst_117 = arith.constant dense<0.000000e+00> : vector<16xf32>
    %266 = vector.multi_reduction <add>, %265, %cst_117 [1] : vector<16x16xf32> to vector<16xf32>
    %267 = vector.shape_cast %266 : vector<16xf32> to vector<16x1xf32>
    %268 = tpu.reciprocal %267 {approx = true} : vector<16x1xf32> -> vector<16x1xf32>
    %269 = vector.broadcast %268 : vector<16x1xf32> to vector<16x16xf32>
    %270 = arith.mulf %265, %269 : vector<16x16xf32>
    %cst_118 = arith.constant dense<0.000000e+00> : vector<16x32xf32>
    %271 = tpu.matmul %270, %255, %cst_118 {dimension_numbers = #tpu.dot_dimension_numbers<[1], [0], [0], [1], [0, 0, 1, 1], [], []>} : vector<16x16xf32>, vector<16x32xf32>, vector<16x32xf32> -> vector<16x32xf32>
    %272 = arith.truncf %271 : vector<16x32xf32> to vector<16x32xbf16>
    %c1_119 = arith.constant 1 : index
    %c2_120 = arith.constant 2 : index
    %c0_121 = arith.constant 0 : index
    %c0_122 = arith.constant 0 : index
    %273 = vector.load %arg5[%c1_119, %c2_120, %c0_121, %c0_122] : memref<2x4x32x128xbf16, #tpu.memory_space<vmem>>, vector<1x1x32x128xbf16>
    %274 = vector.shape_cast %273 : vector<1x1x32x128xbf16> to vector<32x128xbf16>
    %cst_123 = arith.constant dense<0.000000e+00> : vector<16x128xf32>
    %275 = tpu.matmul %272, %274, %cst_123 {dimension_numbers = #tpu.dot_dimension_numbers<[1], [0], [0], [1], [0, 0, 1, 1], [], []>} : vector<16x32xbf16>, vector<32x128xbf16>, vector<16x128xf32> -> vector<16x128xf32>
    %276 = arith.addf %252, %275 : vector<16x128xf32>
    %277 = vector.extract_strided_slice %199 {offsets = [0, 96], sizes = [16, 32], strides = [1, 1]} : vector<16x128xf32> to vector<16x32xf32>
    %278 = vector.extract_strided_slice %203 {offsets = [0, 96], sizes = [16, 32], strides = [1, 1]} : vector<16x128xf32> to vector<16x32xf32>
    %279 = vector.extract_strided_slice %195 {offsets = [0, 96], sizes = [16, 32], strides = [1, 1]} : vector<16x128xf32> to vector<16x32xf32>
    %280 = tpu.transpose %278, [1, 0] : vector<16x32xf32> -> vector<32x16xf32>
    %cst_124 = arith.constant dense<0.000000e+00> : vector<16x16xf32>
    %281 = tpu.matmul %277, %280, %cst_124 {dimension_numbers = #tpu.dot_dimension_numbers<[1], [0], [0], [1], [0, 0, 1, 1], [], []>} : vector<16x32xf32>, vector<32x16xf32>, vector<16x16xf32> -> vector<16x16xf32>
    %cst_125 = arith.constant 0.176776692 : f32
    %282 = vector.broadcast %cst_125 : f32 to vector<16x16xf32>
    %283 = arith.mulf %281, %282 : vector<16x16xf32>
    %284 = arith.addf %283, %3 : vector<16x16xf32>
    %cst_126 = arith.constant dense<0xFF800000> : vector<16xf32>
    %285 = vector.multi_reduction <maximumf>, %284, %cst_126 [1] : vector<16x16xf32> to vector<16xf32>
    %286 = vector.shape_cast %285 : vector<16xf32> to vector<16x1xf32>
    %287 = vector.broadcast %286 : vector<16x1xf32> to vector<16x16xf32>
    %288 = arith.subf %284, %287 : vector<16x16xf32>
    %289 = math.exp %288 : vector<16x16xf32>
    %cst_127 = arith.constant dense<0.000000e+00> : vector<16xf32>
    %290 = vector.multi_reduction <add>, %289, %cst_127 [1] : vector<16x16xf32> to vector<16xf32>
    %291 = vector.shape_cast %290 : vector<16xf32> to vector<16x1xf32>
    %292 = tpu.reciprocal %291 {approx = true} : vector<16x1xf32> -> vector<16x1xf32>
    %293 = vector.broadcast %292 : vector<16x1xf32> to vector<16x16xf32>
    %294 = arith.mulf %289, %293 : vector<16x16xf32>
    %cst_128 = arith.constant dense<0.000000e+00> : vector<16x32xf32>
    %295 = tpu.matmul %294, %279, %cst_128 {dimension_numbers = #tpu.dot_dimension_numbers<[1], [0], [0], [1], [0, 0, 1, 1], [], []>} : vector<16x16xf32>, vector<16x32xf32>, vector<16x32xf32> -> vector<16x32xf32>
    %296 = arith.truncf %295 : vector<16x32xf32> to vector<16x32xbf16>
    %c1_129 = arith.constant 1 : index
    %c3_130 = arith.constant 3 : index
    %c0_131 = arith.constant 0 : index
    %c0_132 = arith.constant 0 : index
    %297 = vector.load %arg5[%c1_129, %c3_130, %c0_131, %c0_132] : memref<2x4x32x128xbf16, #tpu.memory_space<vmem>>, vector<1x1x32x128xbf16>
    %298 = vector.shape_cast %297 : vector<1x1x32x128xbf16> to vector<32x128xbf16>
    %cst_133 = arith.constant dense<0.000000e+00> : vector<16x128xf32>
    %299 = tpu.matmul %296, %298, %cst_133 {dimension_numbers = #tpu.dot_dimension_numbers<[1], [0], [0], [1], [0, 0, 1, 1], [], []>} : vector<16x32xbf16>, vector<32x128xbf16>, vector<16x128xf32> -> vector<16x128xf32>
    %300 = arith.addf %276, %299 : vector<16x128xf32>
    %301 = arith.addf %168, %300 : vector<16x128xf32>
    %c1_134 = arith.constant 1 : index
    %c0_135 = arith.constant 0 : index
    %c0_136 = arith.constant 0 : index
    %302 = vector.load %arg6[%c1_134, %c0_135, %c0_136] : memref<2x1x128xf32, #tpu.memory_space<vmem>>, vector<1x1x128xf32>
    %303 = vector.shape_cast %302 : vector<1x1x128xf32> to vector<1x128xf32>
    %304 = arith.mulf %301, %301 : vector<16x128xf32>
    %cst_137 = arith.constant dense<0.000000e+00> : vector<16xf32>
    %305 = vector.multi_reduction <add>, %304, %cst_137 [1] : vector<16x128xf32> to vector<16xf32>
    %306 = vector.shape_cast %305 : vector<16xf32> to vector<16x1xf32>
    %cst_138 = arith.constant 1.280000e+02 : f32
    %307 = vector.broadcast %cst_138 : f32 to vector<16x1xf32>
    %308 = arith.divf %306, %307 : vector<16x1xf32>
    %cst_139 = arith.constant 9.99999997E-7 : f32
    %309 = vector.broadcast %cst_139 : f32 to vector<16x1xf32>
    %310 = arith.addf %308, %309 : vector<16x1xf32>
    %311 = math.rsqrt %310 : vector<16x1xf32>
    %312 = vector.broadcast %311 : vector<16x1xf32> to vector<16x128xf32>
    %313 = arith.mulf %301, %312 : vector<16x128xf32>
    %314 = vector.broadcast %303 : vector<1x128xf32> to vector<16x128xf32>
    %315 = arith.mulf %313, %314 : vector<16x128xf32>
    %316 = arith.truncf %315 : vector<16x128xf32> to vector<16x128xbf16>
    %c1_140 = arith.constant 1 : index
    %c0_141 = arith.constant 0 : index
    %c0_142 = arith.constant 0 : index
    %317 = vector.load %arg7[%c1_140, %c0_141, %c0_142] : memref<2x128x512xbf16, #tpu.memory_space<vmem>>, vector<1x128x512xbf16>
    %318 = vector.shape_cast %317 : vector<1x128x512xbf16> to vector<128x512xbf16>
    %cst_143 = arith.constant dense<0.000000e+00> : vector<16x512xf32>
    %319 = tpu.matmul %316, %318, %cst_143 {dimension_numbers = #tpu.dot_dimension_numbers<[1], [0], [0], [1], [0, 0, 1, 1], [], []>} : vector<16x128xbf16>, vector<128x512xbf16>, vector<16x512xf32> -> vector<16x512xf32>
    %320 = vector.extract_strided_slice %319 {offsets = [0, 0], sizes = [16, 256], strides = [1, 1]} : vector<16x512xf32> to vector<16x256xf32>
    %321 = vector.extract_strided_slice %319 {offsets = [0, 256], sizes = [16, 256], strides = [1, 1]} : vector<16x512xf32> to vector<16x256xf32>
    %322 = arith.negf %320 : vector<16x256xf32>
    %323 = math.exp %322 : vector<16x256xf32>
    %cst_144 = arith.constant 1.000000e+00 : f32
    %324 = vector.broadcast %cst_144 : f32 to vector<16x256xf32>
    %325 = arith.addf %324, %323 : vector<16x256xf32>
    %326 = arith.divf %324, %325 : vector<16x256xf32>
    %327 = arith.mulf %320, %326 : vector<16x256xf32>
    %328 = arith.mulf %327, %321 : vector<16x256xf32>
    %329 = arith.truncf %328 : vector<16x256xf32> to vector<16x256xbf16>
    %c1_145 = arith.constant 1 : index
    %c0_146 = arith.constant 0 : index
    %c0_147 = arith.constant 0 : index
    %330 = vector.load %arg8[%c1_145, %c0_146, %c0_147] : memref<2x256x128xbf16, #tpu.memory_space<vmem>>, vector<1x256x128xbf16>
    %331 = vector.shape_cast %330 : vector<1x256x128xbf16> to vector<256x128xbf16>
    %cst_148 = arith.constant dense<0.000000e+00> : vector<16x128xf32>
    %332 = tpu.matmul %329, %331, %cst_148 {dimension_numbers = #tpu.dot_dimension_numbers<[1], [0], [0], [1], [0, 0, 1, 1], [], []>} : vector<16x256xbf16>, vector<256x128xbf16>, vector<16x128xf32> -> vector<16x128xf32>
    %333 = arith.addf %301, %332 : vector<16x128xf32>
    %c0_149 = arith.constant 0 : index
    %c0_150 = arith.constant 0 : index
    %334 = vector.load %arg9[%c0_149, %c0_150] : memref<1x128xf32, #tpu.memory_space<vmem>>, vector<1x128xf32>
    %335 = arith.mulf %333, %333 : vector<16x128xf32>
    %cst_151 = arith.constant dense<0.000000e+00> : vector<16xf32>
    %336 = vector.multi_reduction <add>, %335, %cst_151 [1] : vector<16x128xf32> to vector<16xf32>
    %337 = vector.shape_cast %336 : vector<16xf32> to vector<16x1xf32>
    %cst_152 = arith.constant 1.280000e+02 : f32
    %338 = vector.broadcast %cst_152 : f32 to vector<16x1xf32>
    %339 = arith.divf %337, %338 : vector<16x1xf32>
    %cst_153 = arith.constant 9.99999997E-7 : f32
    %340 = vector.broadcast %cst_153 : f32 to vector<16x1xf32>
    %341 = arith.addf %339, %340 : vector<16x1xf32>
    %342 = math.rsqrt %341 : vector<16x1xf32>
    %343 = vector.broadcast %342 : vector<16x1xf32> to vector<16x128xf32>
    %344 = arith.mulf %333, %343 : vector<16x128xf32>
    %345 = vector.broadcast %334 : vector<1x128xf32> to vector<16x128xf32>
    %346 = arith.mulf %344, %345 : vector<16x128xf32>
    %c2_154 = arith.constant 2 : index
    %c0_155 = arith.constant 0 : index
    %c0_156 = arith.constant 0 : index
    %347 = vector.load %arg13[%c2_154, %c0_155, %c0_156] : memref<3x16x128xf32, #tpu.memory_space<vmem>>, vector<1x16x128xf32>
    %348 = vector.shape_cast %347 : vector<1x16x128xf32> to vector<16x128xf32>
    %349 = vector.shape_cast %346 : vector<16x128xf32> to vector<1x16x128xf32>
    tpu.vector_store %arg13[%c2_154, %c0_155, %c0_156], %349 {strides = array<i32>} : memref<3x16x128xf32, #tpu.memory_space<vmem>>, vector<1x16x128xf32>,
    return
  }
  func.func @transform_0(%arg0: i32) -> (i32, i32) {
    %c0_i32 = arith.constant 0 : i32
    %c0_i32_0 = arith.constant 0 : i32
    %c0_i32_1 = arith.constant 0 : i32
    return %c0_i32, %c0_i32_0 : i32, i32
  }
  func.func @transform_1(%arg0: i32) -> (i32, i32, i32) {
    %c0_i32 = arith.constant 0 : i32
    %c0_i32_0 = arith.constant 0 : i32
    %c0_i32_1 = arith.constant 0 : i32
    %c0_i32_2 = arith.constant 0 : i32
    return %c0_i32, %c0_i32_0, %c0_i32_1 : i32, i32, i32
  }
  func.func @transform_2(%arg0: i32) -> (i32, i32, i32) {
    %c0_i32 = arith.constant 0 : i32
    %c0_i32_0 = arith.constant 0 : i32
    %c0_i32_1 = arith.constant 0 : i32
    %c0_i32_2 = arith.constant 0 : i32
    return %c0_i32, %c0_i32_0, %c0_i32_1 : i32, i32, i32
  }
  func.func @transform_3(%arg0: i32) -> (i32, i32, i32) {
    %c0_i32 = arith.constant 0 : i32
    %c0_i32_0 = arith.constant 0 : i32
    %c0_i32_1 = arith.constant 0 : i32
    %c0_i32_2 = arith.constant 0 : i32
    return %c0_i32, %c0_i32_0, %c0_i32_1 : i32, i32, i32
  }
  func.func @transform_4(%arg0: i32) -> (i32, i32, i32, i32) {
    %c0_i32 = arith.constant 0 : i32
    %c0_i32_0 = arith.constant 0 : i32
    %c0_i32_1 = arith.constant 0 : i32
    %c0_i32_2 = arith.constant 0 : i32
    %c0_i32_3 = arith.constant 0 : i32
    return %c0_i32, %c0_i32_0, %c0_i32_1, %c0_i32_2 : i32, i32, i32, i32
  }
  func.func @transform_5(%arg0: i32) -> (i32, i32, i32) {
    %c0_i32 = arith.constant 0 : i32
    %c0_i32_0 = arith.constant 0 : i32
    %c0_i32_1 = arith.constant 0 : i32
    %c0_i32_2 = arith.constant 0 : i32
    return %c0_i32, %c0_i32_0, %c0_i32_1 : i32, i32, i32
  }
  func.func @transform_6(%arg0: i32) -> (i32, i32, i32) {
    %c0_i32 = arith.constant 0 : i32
    %c0_i32_0 = arith.constant 0 : i32
    %c0_i32_1 = arith.constant 0 : i32
    %c0_i32_2 = arith.constant 0 : i32
    return %c0_i32, %c0_i32_0, %c0_i32_1 : i32, i32, i32
  }
  func.func @transform_7(%arg0: i32) -> (i32, i32, i32) {
    %c0_i32 = arith.constant 0 : i32
    %c0_i32_0 = arith.constant 0 : i32
    %c0_i32_1 = arith.constant 0 : i32
    %c0_i32_2 = arith.constant 0 : i32
    return %c0_i32, %c0_i32_0, %c0_i32_1 : i32, i32, i32
  }
  func.func @transform_8(%arg0: i32) -> (i32, i32) {
    %c0_i32 = arith.constant 0 : i32
    %c0_i32_0 = arith.constant 0 : i32
    %c0_i32_1 = arith.constant 0 : i32
    return %c0_i32, %c0_i32_0 : i32, i32
  }
  func.func @transform_9(%arg0: i32) -> (i32, i32) {
    %c0_i32 = arith.constant 0 : i32
    %c0_i32_0 = arith.constant 0 : i32
    %c0_i32_1 = arith.constant 0 : i32
    return %c0_i32, %c0_i32_0 : i32, i32
  }
  func.func @transform_10(%arg0: i32) -> (i32, i32) {
    %c0_i32 = arith.constant 0 : i32
    %c0_i32_0 = arith.constant 0 : i32
    %c0_i32_1 = arith.constant 0 : i32
    return %c0_i32, %c0_i32_0 : i32, i32
  }
  func.func @transform_11(%arg0: i32) -> (i32, i32) {
    %c0_i32 = arith.constant 0 : i32
    %c0_i32_0 = arith.constant 0 : i32
    %c0_i32_1 = arith.constant 0 : i32
    return %c0_i32, %c0_i32_0 : i32, i32
  }
  func.func @transform_12(%arg0: i32) -> (i32, i32, i32) {
    %c0_i32 = arith.constant 0 : i32
    %c0_i32_0 = arith.constant 0 : i32
    %c0_i32_1 = arith.constant 0 : i32
    %c0_i32_2 = arith.constant 0 : i32
    return %c0_i32, %c0_i32_0, %c0_i32_1 : i32, i32, i32
  }
}

</mosaic_0001>

<bundles_post_ra>
// kernel: tpu_custom_call.1
= control target key start
LH: loop header
LB: loop body
LE: loop exit
PB: predicated region body
PF: predicated region fallthrough
CT: control target
= control target key end

     0   :  { %17 = vsyncpa [#allocation3], 0  ;;  %s6202_s0 = inlined_call_operand.hbm [shape: f32[16,128], index: 0, kind: input, shape index: {}]   ;;  %s6203_s1 = inlined_call_operand.vmem [shape: f32[2,1,128], index: 1, kind: input, shape index: {}]   ;;  %s6204_s2 = inlined_call_operand.hbm [shape: bf16[2,128,384], index: 2, kind: input, shape index: {}]   ;;  %s6205_s3 = inlined_call_operand.hbm [shape: bf16[2,128,256], index: 3, kind: input, shape index: {}]   ;;  %s6206_s4 = inlined_call_operand.hbm [shape: bf16[2,4,32,128], index: 4, kind: input, shape index: {}]   ;;  %s6207_s5 = inlined_call_operand.hbm [shape: f32[2,1,128], index: 5, kind: input, shape index: {}]   ;;  %s6208_s6 = inlined_call_operand.hbm [shape: bf16[2,128,512], index: 6, kind: input, shape index: {}]   ;;  %s6209_s7 = inlined_call_operand.hbm [shape: bf16[2,256,128], index: 7, kind: input, shape index: {}]   ;;  %s6210_s8 = inlined_call_operand.hbm [shape: f32[1,128], index: 8, kind: input, shape index: {}]   ;;  %s6211_s9 = inlined_call_operand.vmem [shape: f32[16,128], index: 9, kind: input, shape index: {}]   ;;  %s6212_s10 = inlined_call_operand.vmem [shape: f32[16,128], index: 10, kind: input, shape index: {}]   ;;  %s6213_s11 = inlined_call_operand.hbm [shape: f32[16,16], index: 11, kind: input, shape index: {}]   ;;  %s6214_s12 = inlined_call_operand.hbm [shape: f32[3,16,128], index: 12, kind: output, shape index: {}]  }
   0x1   :  { %18 = vsyncpa [#allocation6], 0 }
   0x2   :  { %19 = vsyncpa [#allocation9], 0 }
   0x3   :  { %20 = vsyncpa [#allocation12], 0 }
   0x4   :  { %21 = vsyncpa [#allocation15], 0 }
   0x5   :  { %22 = vsyncpa [#allocation4], 0  ;;  %s5611_s21 = smov [#allocation5]   ;;  %s5379_s25 = scalar_lea.hbm %s6204_s2, 6144 }
   0x6   :  { %s42_s22 = sshll.u32 %s5611_s21, 4  ;;  %p5380_p0 = scmp.ne.s32.totalorder %s6204_s2, %s5379_s25  ;;  %s43_s22 = int_to_ptr.vmem [resolvable:$true] %s42_s22 }
   0x7   :  { %p5383_p1 = scmp.lt.u32.totalorder %s5379_s25, %s6204_s2 }
   0x9   :  { %p5385_p2 = pnand %p5383_p1, %p5380_p0 }
   0xb   :  { %5388 = shalt.err (!%p5385_p2)
}
   0xc   :  { %s5389_s30 = scalar_lea.vmem %s43_s22, 6144  ;;  %p5394_p4 = scmp.lt.s32.totalorder %s43_s22, %s43_s22 }
   0xd   :  { %p5390_p3 = scmp.ne.s32.totalorder %s43_s22, %s5389_s30  ;;  %p5395_p5 = scmp.lt.s32.totalorder %s5389_s30, %s5389_s30 }
   0xf   :  { %p5396_p6 = por %p5395_p5, %p5394_p4 }
  0x11   :  { %p5397_p7 = pnand %p5396_p6, %p5390_p3 }
  0x13   :  { %5400 = shalt.err (!%p5397_p7)
}
  0x14   :  { %s5612_s13 = smov 192   ;;  %s5613_s14 = smov 12  }
  0x15   :  { %48 = dma.hbm_to_vmem [thread:$0]  %s6204_s2, 6144, %s43_s22, [#allocation6], %s5612_s13, %s5612_s13, %s5613_s14  }
  0x16   :  { %s5614_s17 = smov [#allocation8]   ;;  %s5401_s21 = scalar_lea.hbm %s6206_s4, 2048 }
  0x17   :  { %s66_s18 = sshll.u32 %s5614_s17, 4  ;;  %p5402_p8 = scmp.ne.s32.totalorder %s6206_s4, %s5401_s21  ;;  %s67_s18 = int_to_ptr.vmem [resolvable:$true] %s66_s18 }
  0x18   :  { %p5405_p9 = scmp.lt.u32.totalorder %s5401_s21, %s6206_s4 }
  0x1a   :  { %p5407_p10 = pnand %p5405_p9, %p5402_p8 }
  0x1c   :  { %5410 = shalt.err (!%p5407_p10)
}
  0x1d   :  { %s5411_s27 = scalar_lea.vmem %s67_s18, 2048  ;;  %p5416_p12 = scmp.lt.s32.totalorder %s67_s18, %s67_s18 }
  0x1e   :  { %p5412_p11 = scmp.ne.s32.totalorder %s67_s18, %s5411_s27  ;;  %p5417_p13 = scmp.lt.s32.totalorder %s5411_s27, %s5411_s27 }
  0x20   :  { %p5418_p0 = por %p5417_p13, %p5416_p12 }
  0x22   :  { %p5419_p1 = pnand %p5418_p0, %p5412_p11 }
  0x24   :  { %5422 = shalt.err (!%p5419_p1)
}
  0x25   :  { %s5615_s2 = smov 64   ;;  %s5616_s22 = smov 4  }
  0x26   :  { %72 = dma.hbm_to_vmem [thread:$0]  %s6206_s4, 2048, %s67_s18, [#allocation9], %s5615_s2, %s5615_s2, %s5616_s22  }
  0x27   :  { %s5617_s30 = smov [#allocation11]   ;;  %s5423_s16 = scalar_lea.hbm %s6208_s6, 8192 }
  0x28   :  { %s90_s13 = sshll.u32 %s5617_s30, 4  ;;  %p5424_p2 = scmp.ne.s32.totalorder %s6208_s6, %s5423_s16  ;;  %s91_s13 = int_to_ptr.vmem [resolvable:$true] %s90_s13 }
  0x29   :  { %p5427_p3 = scmp.lt.u32.totalorder %s5423_s16, %s6208_s6 }
  0x2b   :  { %p5429_p4 = pnand %p5427_p3, %p5424_p2 }
  0x2d   :  { %5432 = shalt.err (!%p5429_p4)
}
  0x2e   :  { %s5433_s23 = scalar_lea.vmem %s91_s13, 8192  ;;  %p5438_p6 = scmp.lt.s32.totalorder %s91_s13, %s91_s13 }
  0x2f   :  { %p5434_p5 = scmp.ne.s32.totalorder %s91_s13, %s5433_s23  ;;  %p5439_p7 = scmp.lt.s32.totalorder %s5433_s23, %s5433_s23 }
  0x31   :  { %p5440_p8 = por %p5439_p7, %p5438_p6 }
  0x33   :  { %p5441_p9 = pnand %p5440_p8, %p5434_p5 }
  0x35   :  { %5444 = shalt.err (!%p5441_p9)
}
  0x36   :  { %s5618_s4 = smov 256   ;;  %s5619_s18 = smov 16  }
  0x37   :  { %96 = dma.hbm_to_vmem [thread:$0]  %s6208_s6, 8192, %s91_s13, [#allocation12], %s5618_s4, %s5618_s4, %s5619_s18  }
  0x38   :  { %s5620_s26 = smov [#allocation14]   ;;  %s5621_s28 = smov [#allocation2]  }
  0x39   :  { %s115_s27 = sshll.u32 %s5620_s26, 4  ;;  %s28_s29 = sshll.u32 %s5621_s28, 4  ;;  %s116_s27 = int_to_ptr.vmem [resolvable:$true] %s115_s27  ;;  %s29_s29 = int_to_ptr.vmem [resolvable:$true] %s28_s29 }
  0x3a   :  { %s5445_s15 = scalar_lea.hbm %s6210_s8, 16 }
  0x3b   :  { %p5446_p10 = scmp.ne.s32.totalorder %s6210_s8, %s5445_s15  ;;  %p5449_p11 = scmp.lt.u32.totalorder %s5445_s15, %s6210_s8 }
  0x3d   :  { %p5451_p12 = pnand %p5449_p11, %p5446_p10 }
  0x3f   :  { %5454 = shalt.err (!%p5451_p12)
}
  0x40   :  { %s5455_s6 = scalar_lea.vmem %s116_s27, 16  ;;  %s5459_s13 = scalar_lea.vmem %s116_s27, 32 }
  0x41   :  { %p5456_p13 = scmp.ne.s32.totalorder %s116_s27, %s5455_s6  ;;  %p5460_p0 = scmp.lt.s32.totalorder %s116_s27, %s116_s27 }
  0x42   :  { %p5461_p1 = scmp.lt.s32.totalorder %s5459_s13, %s5455_s6 }
  0x44   :  { %p5462_p2 = por %p5461_p1, %p5460_p0 }
  0x46   :  { %p5463_p3 = pnand %p5462_p2, %p5456_p13 }
  0x48   :  { %5466 = shalt.err (!%p5463_p3)
}
  0x49   :  { %118 = dma.hbm_to_vmem [thread:$0]  %s6210_s8, 16, %s116_s27, [#allocation15]  }
  0x4a   :  { %s5467_s25 = scalar_lea.hbm %s6202_s0, 256 }
  0x4b   :  { %p5468_p4 = scmp.ne.s32.totalorder %s6202_s0, %s5467_s25  ;;  %p5471_p5 = scmp.lt.u32.totalorder %s5467_s25, %s6202_s0 }
  0x4d   :  { %p5473_p6 = pnand %p5471_p5, %p5468_p4 }
  0x4f   :  { %5476 = shalt.err (!%p5473_p6)
}
  0x50   :  { %s5477_s15 = scalar_lea.vmem %s29_s29, 256  ;;  %p5482_p8 = scmp.lt.s32.totalorder %s29_s29, %s29_s29 }
  0x51   :  { %p5478_p7 = scmp.ne.s32.totalorder %s29_s29, %s5477_s15  ;;  %p5483_p9 = scmp.lt.s32.totalorder %s5477_s15, %s5477_s15 }
  0x53   :  { %p5484_p10 = por %p5483_p9, %p5482_p8 }
  0x55   :  { %p5485_p11 = pnand %p5484_p10, %p5478_p7 }
  0x57   :  { %5488 = shalt.err (!%p5485_p11)
}
  0x58   :  { %s5622_s8 = smov 128   ;;  %s5623_s27 = smov 8  }
  0x59   :  { %34 = dma.hbm_to_vmem [thread:$0]  %s6202_s0, 256, %s29_s29, [#allocation3], %s5622_s8, %s5622_s8, %s5623_s27  }
  0x5a   :  { %s5624_s19 = smov [#allocation7]   ;;  %s5625_s6 = smov [#allocation10]  }
  0x5b   :  { %s54_s20 = sshll.u32 %s5624_s19, 4  ;;  %s78_s13 = sshll.u32 %s5625_s6, 4  ;;  %s55_s20 = int_to_ptr.vmem [resolvable:$true] %s54_s20  ;;  %s79_s13 = int_to_ptr.vmem [resolvable:$true] %s78_s13 }
  0x5c   :  { %s5489_s4 = scalar_lea.hbm %s6205_s3, 4096 }
  0x5d   :  { %p5490_p12 = scmp.ne.s32.totalorder %s6205_s3, %s5489_s4  ;;  %p5493_p13 = scmp.lt.u32.totalorder %s5489_s4, %s6205_s3 }
  0x5f   :  { %p5495_p0 = pnand %p5493_p13, %p5490_p12 }
  0x61   :  { %5498 = shalt.err (!%p5495_p0)
}
  0x62   :  { %s5499_s0 = scalar_lea.vmem %s55_s20, 4096  ;;  %p5504_p2 = scmp.lt.s32.totalorder %s55_s20, %s55_s20 }
  0x63   :  { %p5500_p1 = scmp.ne.s32.totalorder %s55_s20, %s5499_s0  ;;  %p5505_p3 = scmp.lt.s32.totalorder %s5499_s0, %s5499_s0 }
  0x65   :  { %p5506_p4 = por %p5505_p3, %p5504_p2 }
  0x67   :  { %p5507_p5 = pnand %p5506_p4, %p5500_p1 }
  0x69   :  { %5510 = shalt.err (!%p5507_p5)
}
  0x6a   :  { %60 = dma.hbm_to_vmem [thread:$0]  %s6205_s3, 4096, %s55_s20, [#allocation6], %s5622_s8, %s5622_s8, %s5623_s27  }
  0x6b   :  { %s5511_s16 = scalar_lea.hbm %s6207_s5, 32 }
  0x6c   :  { %p5512_p6 = scmp.ne.s32.totalorder %s6207_s5, %s5511_s16  ;;  %p5515_p7 = scmp.lt.u32.totalorder %s5511_s16, %s6207_s5 }
  0x6e   :  { %p5517_p8 = pnand %p5515_p7, %p5512_p6 }
  0x70   :  { %5520 = shalt.err (!%p5517_p8)
}
  0x71   :  { %s5521_s23 = scalar_lea.vmem %s79_s13, 32  ;;  %p5526_p10 = scmp.lt.s32.totalorder %s79_s13, %s79_s13 }
  0x72   :  { %p5522_p9 = scmp.ne.s32.totalorder %s79_s13, %s5521_s23  ;;  %p5527_p11 = scmp.lt.s32.totalorder %s5521_s23, %s5521_s23 }
  0x74   :  { %p5528_p12 = por %p5527_p11, %p5526_p10 }
  0x76   :  { %p5529_p13 = pnand %p5528_p12, %p5522_p9 }
  0x78   :  { %5532 = shalt.err (!%p5529_p13)
}
  0x79   :  { %s5626_s3 = smov 1   ;;  %s5627_s24 = smov [#allocation13]  }
  0x7a   :  { %84 = dma.hbm_to_vmem [thread:$0]  %s6207_s5, 32, %s79_s13, [#allocation9], %s5619_s18, %s5619_s18, %s5626_s3  }
  0x7b   :  { %s102_s25 = sshll.u32 %s5627_s24, 4  ;;  %s5628_s26 = smov [#allocation16]   ;;  %s103_s25 = int_to_ptr.vmem [resolvable:$true] %s102_s25 }
  0x7c   :  { %s128_s28 = sshll.u32 %s5628_s26, 4  ;;  %s5533_s30 = scalar_lea.hbm %s6209_s7, 4096  ;;  %s5796_s28 = int_to_ptr.vmem [resolvable:$true] %s128_s28 }
  0x7d   :  { %p5534_p0 = scmp.ne.s32.totalorder %s6209_s7, %s5533_s30  ;;  %p5537_p1 = scmp.lt.u32.totalorder %s5533_s30, %s6209_s7 }
  0x7f   :  { %p5539_p2 = pnand %p5537_p1, %p5534_p0 }
  0x81   :  { %5542 = shalt.err (!%p5539_p2)
}
  0x82   :  { %s5543_s5 = scalar_lea.vmem %s103_s25, 4096  ;;  %p5548_p4 = scmp.lt.s32.totalorder %s103_s25, %s103_s25 }
  0x83   :  { %p5544_p3 = scmp.ne.s32.totalorder %s103_s25, %s5543_s5  ;;  %p5549_p5 = scmp.lt.s32.totalorder %s5543_s5, %s5543_s5 }
  0x85   :  { %p5550_p6 = por %p5549_p5, %p5548_p4 }
  0x87   :  { %p5551_p7 = pnand %p5550_p6, %p5544_p3 }
  0x89   :  { %5554 = shalt.err (!%p5551_p7)
}
  0x8a   :  { %108 = dma.hbm_to_vmem [thread:$0]  %s6209_s7, 4096, %s103_s25, [#allocation12], %s5615_s2, %s5615_s2, %s5616_s22  }
  0x8b   :  { %s5555_s21 = scalar_lea.hbm %s6213_s11, 256 }
  0x8c   :  { %p5556_p8 = scmp.ne.s32.totalorder %s6213_s11, %s5555_s21  ;;  %p5559_p9 = scmp.lt.u32.totalorder %s5555_s21, %s6213_s11 }
  0x8e   :  { %p5561_p10 = pnand %p5559_p9, %p5556_p8 }
  0x90   :  { %5564 = shalt.err (!%p5561_p10)
}
  0x91   :  { %s5565_s24 = scalar_lea.vmem %s5796_s28, 256  ;;  %p5570_p12 = scmp.lt.s32.totalorder %s5796_s28, %s5796_s28 }
  0x92   :  { %p5566_p11 = scmp.ne.s32.totalorder %s5796_s28, %s5565_s24  ;;  %p5571_p13 = scmp.lt.s32.totalorder %s5565_s24, %s5565_s24 }
  0x94   :  { %p5572_p0 = por %p5571_p13, %p5570_p12 }
  0x96   :  { %p5573_p1 = pnand %p5572_p0, %p5566_p11 }
  0x98   :  { %5576 = shalt.err (!%p5573_p1)
}
  0x99   :  { %134 = dma.hbm_to_vmem [thread:$0]  %s6213_s11, 256, %s5796_s28, [#allocation15], %s5622_s8, %s5622_s8, %s5623_s27  }
  0x9a   :  { %5599 = dma.done.wait [#allocation3], 256  }
  0x9b   :  { %5600 = vsyncadd [#allocation3], 4294967040 }
  0x9c   :  { %5601 = dma.done.wait [#allocation6], 10240  }
  0x9d   :  { %5602 = vsyncadd [#allocation6], 4294957056 }
  0x9e   :  { %5603 = dma.done.wait [#allocation9], 2080  }
  0x9f   :  { %5604 = vsyncadd [#allocation9], 4294965216 }
  0xa0   :  { %5605 = dma.done.wait [#allocation12], 12288  }
  0xa1   :  { %5606 = vsyncadd [#allocation12], 4294955008 }
  0xa2   :  { %5607 = dma.done.wait [#allocation15], 272  }
  0xa3   :  { %5608 = vsyncadd [#allocation15], 4294967024  ;;  %v5629_v0 = vmov 0.0   ;;  %v5834_v1 = vld [vmem:[#allocation2] sm:$0xff]  ;;  %v5836_v2 = vld [vmem:[#allocation2 + $0x8] sm:$0xff]  ;;  %v5630_v27 = vmov 0  }
  0xa4   :  { %4619 = vmatprep.subr.bf16.mxu1 %v5629_v0  ;;  %v174_v3 = vmul.f32 %v5834_v1, %v5834_v1  ;;  %171 = vst [vmem:[#allocation17] sm:$0xff] %v5834_v1  ;;  %172 = vst [vmem:[#allocation17 + $0x8] sm:$0xff] %v5836_v2  ;;  %v4999_v4 = vld [vmem:[#allocation5 + $0x4] ss:$12 sps:$4 sm:$0xff]   ;;  %v5001_v5 = vld [vmem:[#allocation5] ss:$12 sps:$4 sm:$0xff]   ;;  %v175_v7 = vmul.f32 %v5836_v2, %v5836_v2  ;;  %390 = vmatprep.mubr.bf16.mxu0 %v5630_v27 }
  0xa5   :  { %v5002_v6 = vld [vmem:[#allocation5 + $0x8] ss:$12 sps:$4 sm:$0xff]   ;;  %358 = vmatprep.subr.bf16.mxu0 %v4999_v4  ;;  %v5005_v9 = vld [vmem:[#allocation5 + $0x18] ss:$12 sps:$4 sm:$0xff]   ;;  %v5006_v10 = vld [vmem:[#allocation5 + $0x20] ss:$12 sps:$4 sm:$0xff]  }
  0xa6   :  { %176 = vadd.xlane.f32.xlu0 %v174_v3  ;;  %v5003_v8 = vld [vmem:[#allocation5 + $0x1c] ss:$12 sps:$4 sm:$0xff]   ;;  %359 = vmatpush1.bf16.msra.mxu0 %v5001_v5  ;;  %v5007_v11 = vld [vmem:[#allocation5 + $0x34] ss:$12 sps:$4 sm:$0xff]   ;;  %v5010_v13 = vld [vmem:[#allocation5 + $0x38] ss:$12 sps:$4 sm:$0xff]  }
  0xa7   :  { %4620 = vmatpush3.bf16.msra.mxu1 %v5002_v6  ;;  %360 = vmatprep.subr.bf16.mxu0 %v5003_v8  ;;  %v5009_v12 = vld [vmem:[#allocation5 + $0x30] ss:$12 sps:$4 sm:$0xff]   ;;  %v5011_v14 = vld [vmem:[#allocation5 + $0x4c] ss:$12 sps:$4 sm:$0xff]   ;;  %v5013_v15 = vld [vmem:[#allocation5 + $0x48] ss:$12 sps:$4 sm:$0xff]  }
  0xa8   :  { %4621 = vmatprep.subr.bf16.mxu1 %v5629_v0  ;;  %v5014_v16 = vld [vmem:[#allocation5 + $0x50] ss:$12 sps:$4 sm:$0xff]   ;;  %v5017_v18 = vld [vmem:[#allocation5 + $0x60] ss:$12 sps:$4 sm:$0xff]   ;;  %v5018_v19 = vld [vmem:[#allocation5 + $0x68] ss:$12 sps:$4 sm:$0xff]  }
  0xa9   :  { %v5015_v17 = vld [vmem:[#allocation5 + $0x64] ss:$12 sps:$4 sm:$0xff]   ;;  %v5019_v20 = vld [vmem:[#allocation5 + $0x7c] ss:$12 sps:$4 sm:$0xff]   ;;  %v5022_v22 = vld [vmem:[#allocation5 + $0x80] ss:$12 sps:$4 sm:$0xff]  }
  0xaa   :  { %178 = vadd.xlane.f32.xlu0 %v175_v7  ;;  %361 = vmatpush1.bf16.msra.mxu0 %v5005_v9  ;;  %v5021_v21 = vld [vmem:[#allocation5 + $0x78] ss:$12 sps:$4 sm:$0xff]   ;;  %v5023_v23 = vld [vmem:[#allocation5 + $0x94] ss:$12 sps:$4 sm:$0xff]   ;;  %v5025_v24 = vld [vmem:[#allocation5 + $0x90] ss:$12 sps:$4 sm:$0xff]  }
  0xab   :  { %4622 = vmatpush3.bf16.msra.mxu1 %v5006_v10  ;;  %362 = vmatprep.subr.bf16.mxu0 %v5007_v11  ;;  %v5026_v25 = vld [vmem:[#allocation5 + $0x98] ss:$12 sps:$4 sm:$0xff]   ;;  %vm5631_vm0 = vmmov 0   ;;  %v5029_v28 = vld [vmem:[#allocation5 + $0xa8] ss:$12 sps:$4 sm:$0xff]   ;;  %vm593_vm1 = vcmask 261120  }
  0xac   :  { %4623 = vmatprep.subr.bf16.mxu1 %v5629_v0  ;;  %v5027_v26 = vld [vmem:[#allocation5 + $0xac] ss:$12 sps:$4 sm:$0xff]   ;;  %4635 = vmatprep.mubr.msk.bf16.mxu1 %vm5631_vm0, %v5629_v0  ;;  %v5030_v29 = vld [vmem:[#allocation5 + $0xb0] ss:$12 sps:$4 sm:$0xff]   ;;  %v5031_v44 = vld [vmem:[#allocation7] ss:$8 sps:$4 sm:$0xff]  }
  0xad   :  { %v5033_v30 = vld [vmem:[#allocation7 + $0x4] ss:$8 sps:$4 sm:$0xff]   ;;  %v4207_v40 = vld [vmem:[%s6203_s1] ss:$0 sm:$0xff]  ;;  %v5036_v46 = vld [vmem:[#allocation7 + $0x14] ss:$8 sps:$4 sm:$0xff]  }
  0xae   :  { %363 = vmatpush1.bf16.msra.mxu0 %v5009_v12  ;;  %v5034_v47 = vld [vmem:[#allocation7 + $0x10] ss:$8 sps:$4 sm:$0xff]   ;;  %v5039_v48 = vld [vmem:[#allocation7 + $0x24] ss:$8 sps:$4 sm:$0xff]   ;;  %v5037_v49 = vld [vmem:[#allocation7 + $0x20] ss:$8 sps:$4 sm:$0xff]  }
  0xaf   :  { %4624 = vmatpush3.bf16.msra.mxu1 %v5010_v13  ;;  %364 = vmatprep.subr.bf16.mxu0 %v5011_v14  ;;  %v5042_v50 = vld [vmem:[#allocation7 + $0x34] ss:$8 sps:$4 sm:$0xff]   ;;  %v5040_v51 = vld [vmem:[#allocation7 + $0x30] ss:$8 sps:$4 sm:$0xff]   ;;  %v5045_v52 = vld [vmem:[#allocation7 + $0x44] ss:$8 sps:$4 sm:$0xff]  }
  0xb0   :  { %4625 = vmatprep.subr.bf16.mxu1 %v5629_v0  ;;  %v5043_v53 = vld [vmem:[#allocation7 + $0x40] ss:$8 sps:$4 sm:$0xff]   ;;  %v5048_v54 = vld [vmem:[#allocation7 + $0x54] ss:$8 sps:$4 sm:$0xff]   ;;  %v5046_v55 = vld [vmem:[#allocation7 + $0x50] ss:$8 sps:$4 sm:$0xff]  }
  0xb1   :  { %v5051_v56 = vld [vmem:[#allocation7 + $0x64] ss:$8 sps:$4 sm:$0xff]   ;;  %v5049_v57 = vld [vmem:[#allocation7 + $0x60] ss:$8 sps:$4 sm:$0xff]   ;;  %v5054_v58 = vld [vmem:[#allocation7 + $0x74] ss:$8 sps:$4 sm:$0xff]  }
  0xb2   :  { %365 = vmatpush1.bf16.msra.mxu0 %v5013_v15  ;;  %v5052_v59 = vld [vmem:[#allocation7 + $0x70] ss:$8 sps:$4 sm:$0xff]   ;;  %vm5885_vm2 = vmpackc.low %vm593_vm1, %vm593_vm1  ;;  %vm685_vm3 = vcmask 130048   ;;  %s5632_s17 = smov 96   ;;  %s5633_s5 = smov 32  }
  0xb3   :  { %4626 = vmatpush3.bf16.msra.mxu1 %v5014_v16  ;;  %366 = vmatprep.subr.bf16.mxu0 %v5015_v17  ;;  %v165_v7 = vld [vmem:[%s6211_s9] sm:$0xff]  ;;  %v166_v9 = vld [vmem:[%s6211_s9 + $0x8] sm:$0xff] }
  0xb4   :  { %4627 = vmatprep.subr.bf16.mxu1 %v5629_v0  ;;  %v167_v8 = vld [vmem:[%s6212_s10] sm:$0xff]  ;;  %v168_v11 = vld [vmem:[%s6212_s10 + $0x8] sm:$0xff] }
  0xb6   :  { %367 = vmatpush1.bf16.msra.mxu0 %v5017_v18 }
  0xb7   :  { %4628 = vmatpush3.bf16.msra.mxu1 %v5018_v19  ;;  %368 = vmatprep.subr.bf16.mxu0 %v5019_v20 }
  0xb8   :  { %4629 = vmatprep.subr.bf16.mxu1 %v5629_v0 }
  0xba   :  { %369 = vmatpush1.bf16.msra.mxu0 %v5021_v21 }
  0xbb   :  { %4630 = vmatpush3.bf16.msra.mxu1 %v5022_v22  ;;  %370 = vmatprep.subr.bf16.mxu0 %v5023_v23 }
  0xbc   :  { %4631 = vmatprep.subr.bf16.mxu1 %v5629_v0 }
  0xbe   :  { %371 = vmatpush1.bf16.msra.mxu0 %v5025_v24 }
  0xbf   :  { %4632 = vmatpush3.bf16.msra.mxu1 %v5026_v25  ;;  %372 = vmatprep.subr.bf16.mxu0 %v5027_v26 }
  0xc0   :  { %4633 = vmatprep.subr.bf16.mxu1 %v5629_v0 }
  0xc2   :  { %373 = vmatpush1.bf16.msra.mxu0 %v5029_v28 }
  0xc3   :  { %4634 = vmatpush3.bf16.msra.mxu1 %v5030_v29  ;;  %538 = vmatprep.subr.bf16.mxu0 %v5033_v30 }
 0x133   :  { %v177_v31 = vpop.xlane.xlu0 %176 }
 0x134   :  { %v181_v32 = vmul.f32 0.0078125, %v177_v31 }
 0x136   :  { %v183_v33 = vadd.f32 1e-06, %v181_v32 }
 0x137   :  { %v179_v34 = vpop.xlane.xlu0 %178 }
 0x138   :  { %5255 = vrsqrt.f32 %v183_v33  ;;  %v182_v35 = vmul.f32 0.0078125, %v179_v34  ;;  %v5897_v33 = vld [vmem:[#allocation16] sm:$0xff] }
 0x13a   :  { %v184_v36 = vadd.f32 1e-06, %v182_v35 }
 0x13c   :  { %5257 = vrsqrt.f32 %v184_v36  ;;  %v5899_v36 = vld [vmem:[#allocation16 + $0x8] sm:$0xff] }
 0x142   :  { %v5256_v37 = vpop.eup %5255 }
 0x143   :  { %v187_v38 = vmul.f32 %v5256_v37, %v5834_v1 }
 0x145   :  { %v195_v42 = vmul.f32 %v4207_v40, %v187_v38 }
 0x146   :  { %v5258_v39 = vpop.eup %5257 }
 0x147   :  { %v188_v41 = vmul.f32 %v5258_v39, %v5836_v2 }
 0x149   :  { %v196_v43 = vmul.f32 %v4207_v40, %v188_v41 }
 0x14b   :  { %v197_v45 = vpack.c.bf16 %v196_v43, %v195_v42 }
 0x14d   :  { %391 = vmatmul.mubr.bf16.vlgmr.msra.gmra.mrb[0].mxu0 %v197_v45  ;;  %4636 = vmatmul.mubr.bf16.vlgmr.msra.gmra.mrb[0].mxu1 %v197_v45 }
 0x14e   :  { %539 = vmatpush1.bf16.msra.mxu0 %v5031_v44  ;;  %570 = vmatprep.mubr.bf16.mxu0 %v5630_v27 }
 0x14f   :  { %540 = vmatprep.subr.bf16.mxu0 %v5036_v46 }
 0x152   :  { %541 = vmatpush1.bf16.msra.mxu0 %v5034_v47 }
 0x153   :  { %542 = vmatprep.subr.bf16.mxu0 %v5039_v48 }
 0x156   :  { %543 = vmatpush1.bf16.msra.mxu0 %v5037_v49 }
 0x157   :  { %544 = vmatprep.subr.bf16.mxu0 %v5042_v50 }
 0x15a   :  { %545 = vmatpush1.bf16.msra.mxu0 %v5040_v51  ;;  %v5055_v51 = vld [vmem:[#allocation8] sm:$0xff]  }
 0x15b   :  { %546 = vmatprep.subr.bf16.mxu0 %v5045_v52 }
 0x15e   :  { %547 = vmatpush1.bf16.msra.mxu0 %v5043_v53 }
 0x15f   :  { %548 = vmatprep.subr.bf16.mxu0 %v5048_v54 }
 0x162   :  { %549 = vmatpush1.bf16.msra.mxu0 %v5046_v55 }
 0x163   :  { %550 = vmatprep.subr.bf16.mxu0 %v5051_v56 }
 0x166   :  { %551 = vmatpush1.bf16.msra.mxu0 %v5049_v57 }
 0x167   :  { %552 = vmatprep.subr.bf16.mxu0 %v5054_v58 }
 0x16a   :  { %553 = vmatpush1.bf16.msra.mxu0 %v5052_v59 }
 0x16b   :  { %4675 = vmatprep.subr.bf16.mxu0 %v5629_v0 }
 0x16d   :  { %571 = vmatmul.mubr.bf16.vlgmr.msra.gmra.mrb[4].mxu0 %v197_v45 }
 0x16e   :  { %4679 = vmatprep.mubr.msk.bf16.mxu0 %vm5631_vm0, %v5629_v0  ;;  %4676 = vmatpush3.bf16.msra.mxu0 %v5055_v51 }
 0x16f   :  { %4677 = vmatprep.subr.bf16.mxu0 %v5629_v0 }
 0x220   :  { %v392_v60 = vpop.f32.mrb[0].mxu0  ;;  %v435_v61 = vpop.f32.mrb[0].mxu1 }
 0x221   :  { %v394_v62 = vpop.f32.mrb[1].mxu0  ;;  %v4637_v63 = vpop.f32.mrb[1].mxu1  ;;  %v581_v12 = vmul.f32 %v392_v60, %v165_v7 }
 0x222   :  { %v396_v1 = vpop.f32.mrb[2].mxu0  ;;  %v438_v2 = vpop.f32.mrb[2].mxu1  ;;  %v587_v15 = vmul.f32 %v394_v62, %v165_v7 }
 0x223   :  { %v398_v3 = vpop.f32.mrb[3].mxu0  ;;  %v4638_v4 = vpop.f32.mrb[3].mxu1  ;;  %v4841_v5 = vpack.c.bf16 %v438_v2, %v435_v61  ;;  %v5863_v6 = vpack.i.bf16 %v438_v2, %v435_v61  ;;  %v582_v18 = vmul.f32 %v396_v1, %v166_v9  ;;  %v5056_v1 = vld [vmem:[#allocation8 + $0x8] sm:$0xff]  }
 0x224   :  { %v588_v22 = vmul.f32 %v398_v3, %v166_v9  ;;  %4678 = vmatpush3.bf16.msra.mxu0 %v5056_v1 }
 0x225   :  { %4697 = vmatprep.subr.bf16.mxu0 %v5629_v0 }
 0x240   :  { %v572_v10 = vpop.f32.mrb[4].mxu0 }
 0x241   :  { %v583_v13 = vmul.f32 %v572_v10, %v167_v8  ;;  %v574_v14 = vpop.f32.mrb[5].mxu0 }
 0x242   :  { %v589_v16 = vmul.f32 %v574_v14, %v167_v8  ;;  %v576_v17 = vpop.f32.mrb[6].mxu0 }
 0x243   :  { %v5877_v19 = vadd.f32 %v583_v13, %v581_v12  ;;  %v584_v20 = vmul.f32 %v576_v17, %v168_v11  ;;  %v578_v21 = vpop.f32.mrb[7].mxu0 }
 0x244   :  { %v591_v23 = vadd.f32 %v589_v16, %v587_v15  ;;  %v590_v24 = vmul.f32 %v578_v21, %v168_v11 }
 0x245   :  { %v5879_v25 = vadd.f32 %v584_v20, %v582_v18  ;;  %4643 = vmatprep.mubr.msk.f32.mxu1 %vm593_vm1, %v5877_v19 }
 0x246   :  { %v592_v26 = vadd.f32 %v590_v24, %v588_v22 }
 0x248   :  { %v4835_v29 = vpack.c.bf16 %v592_v26, %v591_v23  ;;  %v5889_v30 = vpack.i.bf16 %v592_v26, %v591_v23 }
 0x24a   :  { %4837 = vmatprep.subr.msk.bf16.mxu1 %vm5885_vm2, %v4835_v29 }
 0x24b   :  { %4840 = vmatpush3.bf16.xpose.msk.msra.mxu1 %vm5885_vm2, %v4835_v29 }
 0x24c   :  { %4842 = vmatprep.subr.bf16.mxu1 %v4841_v5 }
 0x252   :  { %4644 = vmatmul.mubr.msk.f32.vlgmr.msra.gmra.mrb[4].mxu1 %vm593_vm1, %v5879_v25 }
 0x253   :  { %4844 = vmatpush3.bf16.msra.mxu1 %v4841_v5 }
 0x325   :  { %v4645_v31 = vpop.f32.mrb[4].mxu1 }
 0x326   :  { %v672_v32 = vpop.f32.mrb[5].mxu1  ;;  %v682_v34 = vmul.f32 0.17677669, %v4645_v31 }
 0x327   :  { %v681_v35 = vmul.f32 0.17677669, %v672_v32 }
 0x328   :  { %v684_v39 = vadd.f32 %v682_v34, %v5899_v36 }
 0x329   :  { %v683_v37 = vadd.f32 %v681_v35, %v5897_v33 }
 0x32a   :  { %v689_v40 = vsel %vm685_vm3, %v684_v39, -inf }
 0x32b   :  { %v686_v38 = vsel %vm685_vm3, %v683_v37, -inf }
 0x32c   :  { %687 = vmax.xlane.f32.xlu1 %v686_v38 }
 0x330   :  { %690 = vmax.xlane.f32.xlu1 %v689_v40 }
 0x3b9   :  { %v688_v41 = vpop.xlane.xlu1 %687 }
 0x3ba   :  { %v692_v42 = vsub.f32 %v683_v37, %v688_v41 }
 0x3bc   :  { %v694_v43 = vmul.f32 1.442695, %v692_v42 }
 0x3bd   :  { %v691_v44 = vpop.xlane.xlu1 %690 }
 0x3be   :  { %5259 = vpow2.f32 %v694_v43  ;;  %v693_v45 = vsub.f32 %v684_v39, %v691_v44 }
 0x3c0   :  { %v696_v46 = vmul.f32 1.442695, %v693_v45  ;;  %v5057_v45 = vld [vmem:[#allocation8 + $0x10] sm:$0xff]  }
 0x3c2   :  { %5261 = vpow2.f32 %v696_v46 }
 0x3c8   :  { %v5260_v47 = vpop.eup %5259 }
 0x3c9   :  { %v698_v48 = vsel %vm685_vm3, %v5260_v47, 0.0 }
 0x3ca   :  { %699 = vadd.xlane.f32.xlu0 %v698_v48 }
 0x3cc   :  { %v5262_v49 = vpop.eup %5261 }
 0x3cd   :  { %v701_v50 = vsel %vm685_vm3, %v5262_v49, 0.0 }
 0x3ce   :  { %702 = vadd.xlane.f32.xlu1 %v701_v50 }
 0x3df   :  { %794 = vrot.lane.b32.xlu1 %v5877_v19, %s5632_s17 }
 0x3e0   :  { %4940 = vrot.lane.b32.xlu0 %v5889_v30, %s5632_s17 }
 0x3e3   :  { %796 = vrot.lane.b32.xlu1 %v5879_v25, %s5632_s17 }
 0x457   :  { %v700_v52 = vpop.xlane.xlu0 %699 }
 0x458   :  { %5263 = vrcp.f32 %v700_v52 }
 0x45b   :  { %v4941_v53 = vpop.permute.xlu0 %4940  ;;  %v703_v54 = vpop.xlane.xlu1 %702 }
 0x45c   :  { %v4943_v55 = vunpack.i.h.bf16 %v4941_v53  ;;  %v4942_v56 = vunpack.i.l.bf16 %v4941_v53  ;;  %5265 = vrcp.f32 %v703_v54 }
 0x45e   :  { %v4845_v57 = vpack.c.bf16 %v4943_v55, %v4942_v56 }
 0x45f   :  { %v795_v62 = vpop.permute.xlu1 %794 }
 0x460   :  { %4847 = vmatprep.subr.msk.bf16.mxu1 %vm5885_vm2, %v4845_v57 }
 0x462   :  { %v5264_v58 = vpop.eup %5263 }
 0x463   :  { %v706_v59 = vmul.f32 %v5264_v58, %v5260_v47  ;;  %v797_v63 = vpop.permute.xlu1 %796 }
 0x465   :  { %4650 = vmatprep.mubr.msk.f32.mxu1 %vm685_vm3, %v706_v59 }
 0x466   :  { %v5266_v60 = vpop.eup %5265 }
 0x467   :  { %v707_v61 = vmul.f32 %v5266_v60, %v5262_v49  ;;  %v5058_v49 = vld [vmem:[#allocation8 + $0x18] sm:$0xff]  }
 0x469   :  { %4651 = vmatmul.mubr.msk.f32.vlgmr.msra.gmra.mrb[6].mxu1 %vm685_vm3, %v707_v61 }
 0x46a   :  { %4850 = vmatpush3.bf16.xpose.msk.msra.mxu1 %vm5885_vm2, %v4845_v57  ;;  %4657 = vmatprep.mubr.msk.f32.mxu1 %vm593_vm1, %v795_v62 }
 0x471   :  { %4658 = vmatmul.mubr.msk.f32.vlgmr.msra.gmra.mrb[8].mxu1 %vm593_vm1, %v797_v63 }
 0x53c   :  { %v4652_v2 = vpop.f32.mrb[6].mxu1 }
 0x53d   :  { %v780_v3 = vpop.f32.mrb[7].mxu1 }
 0x53e   :  { %v789_v4 = vpack.c.bf16 %v4652_v2, %v780_v3 }
 0x540   :  { %4680 = vmatmul.mubr.msk.bf16.vlgmr.msra.gmra.mrb[8].mxu0 %vm593_vm1, %v789_v4 }
 0x541   :  { %4701 = vmatprep.mubr.msk.bf16.mxu0 %vm5631_vm0, %v5629_v0 }
 0x544   :  { %v4659_v5 = vpop.f32.mrb[8].mxu1 }
 0x545   :  { %v886_v7 = vmul.f32 0.17677669, %v4659_v5  ;;  %v876_v8 = vpop.f32.mrb[9].mxu1 }
 0x546   :  { %v885_v9 = vmul.f32 0.17677669, %v876_v8 }
 0x547   :  { %v888_v10 = vadd.f32 %v886_v7, %v5899_v36 }
 0x548   :  { %v887_v11 = vadd.f32 %v885_v9, %v5897_v33 }
 0x549   :  { %v892_v12 = vsel %vm685_vm3, %v888_v10, -inf }
 0x54a   :  { %893 = vmax.xlane.f32.xlu0 %v892_v12  ;;  %v889_v13 = vsel %vm685_vm3, %v887_v11, -inf }
 0x54b   :  { %890 = vmax.xlane.f32.xlu1 %v889_v13 }
 0x55c   :  { %4945 = vrot.lane.b32.xlu1 %v5863_v6, %s5632_s17 }
 0x560   :  { %1118 = vrot.lane.b32.xlu1 %v5877_v19, %s5615_s2 }
 0x564   :  { %1120 = vrot.lane.b32.xlu1 %v5879_v25, %s5615_s2 }
 0x5d7   :  { %v894_v14 = vpop.xlane.xlu0 %893 }
 0x5d8   :  { %v896_v15 = vsub.f32 %v888_v10, %v894_v14  ;;  %v891_v16 = vpop.xlane.xlu1 %890 }
 0x5d9   :  { %v895_v17 = vsub.f32 %v887_v11, %v891_v16 }
 0x5da   :  { %v899_v18 = vmul.f32 1.442695, %v896_v15 }
 0x5db   :  { %v897_v20 = vmul.f32 1.442695, %v895_v17 }
 0x5dc   :  { %v4946_v21 = vpop.permute.xlu1 %4945 }
 0x5dd   :  { %5267 = vpow2.f32 %v897_v20  ;;  %v4948_v22 = vunpack.i.h.bf16 %v4946_v21  ;;  %v4947_v23 = vunpack.i.l.bf16 %v4946_v21  ;;  %v5059_v21 = vld [vmem:[#allocation8 + $0x20] sm:$0xff]  }
 0x5de   :  { %5269 = vpow2.f32 %v899_v18  ;;  %4698 = vmatpush3.bf16.msra.mxu0 %v5059_v21  ;;  %v5074_v21 = vld [vmem:[#allocation11 + $0x2c] ss:$16 sps:$4 sm:$0xff]  }
 0x5df   :  { %v4851_v24 = vpack.c.bf16 %v4948_v22, %v4947_v23  ;;  %4699 = vmatprep.subr.bf16.mxu0 %v5629_v0 }
 0x5e0   :  { %v1119_v54 = vpop.permute.xlu1 %1118 }
 0x5e1   :  { %4852 = vmatprep.subr.bf16.mxu1 %v4851_v24 }
 0x5e2   :  { %4854 = vmatpush3.bf16.msra.mxu1 %v4851_v24 }
 0x5e3   :  { %4667 = vmatprep.subr.bf16.mxu1 %v5629_v0 }
 0x5e4   :  { %v1121_v55 = vpop.permute.xlu1 %1120 }
 0x5e7   :  { %v5268_v26 = vpop.eup %5267 }
 0x5e8   :  { %v901_v29 = vsel %vm685_vm3, %v5268_v26, 0.0  ;;  %v5270_v31 = vpop.eup %5269 }
 0x5e9   :  { %902 = vadd.xlane.f32.xlu0 %v901_v29  ;;  %v904_v32 = vsel %vm685_vm3, %v5270_v31, 0.0 }
 0x5ed   :  { %905 = vadd.xlane.f32.xlu0 %v904_v32 }
 0x603   :  { %4950 = vrot.lane.b32.xlu0 %v5889_v30, %s5615_s2 }
 0x613   :  { %v1111_v34 = vpop.f32.mrb[8].mxu0 }
 0x614   :  { %v4681_v35 = vpop.f32.mrb[9].mxu0 }
 0x615   :  { %v1114_v37 = vpop.f32.mrb[10].mxu0 }
 0x616   :  { %v4682_v38 = vpop.f32.mrb[11].mxu0 }
 0x676   :  { %v903_v39 = vpop.xlane.xlu0 %902 }
 0x677   :  { %5271 = vrcp.f32 %v903_v39  ;;  %v5060_v39 = vld [vmem:[#allocation8 + $0x28] sm:$0xff]  }
 0x678   :  { %4700 = vmatpush3.bf16.msra.mxu0 %v5060_v39 }
 0x67a   :  { %v906_v40 = vpop.xlane.xlu0 %905 }
 0x67b   :  { %5273 = vrcp.f32 %v906_v40 }
 0x67e   :  { %v4951_v44 = vpop.permute.xlu0 %4950 }
 0x67f   :  { %v4953_v47 = vunpack.i.h.bf16 %v4951_v44  ;;  %v4952_v48 = vunpack.i.l.bf16 %v4951_v44 }
 0x681   :  { %v5272_v41 = vpop.eup %5271  ;;  %v4855_v50 = vpack.c.bf16 %v4953_v47, %v4952_v48 }
 0x682   :  { %v909_v42 = vmul.f32 %v5272_v41, %v5268_v26 }
 0x684   :  { %4664 = vmatprep.mubr.msk.f32.mxu1 %vm685_vm3, %v909_v42 }
 0x685   :  { %v5274_v43 = vpop.eup %5273 }
 0x686   :  { %v910_v46 = vmul.f32 %v5274_v43, %v5270_v31 }
 0x688   :  { %4665 = vmatmul.mubr.msk.f32.vlgmr.msra.gmra.mrb[10].mxu1 %vm685_vm3, %v910_v46 }
 0x689   :  { %4668 = vmatpush3.bf16.msra.mxu1 %v5057_v45  ;;  %4671 = vmatprep.mubr.msk.bf16.mxu1 %vm5631_vm0, %v5629_v0 }
 0x68a   :  { %4669 = vmatprep.subr.bf16.mxu1 %v5629_v0 }
 0x68d   :  { %4670 = vmatpush3.bf16.msra.mxu1 %v5058_v49 }
 0x68e   :  { %4857 = vmatprep.subr.msk.bf16.mxu1 %vm5885_vm2, %v4855_v50 }
 0x75b   :  { %v4666_v51 = vpop.f32.mrb[10].mxu1 }
 0x75c   :  { %v991_v52 = vpop.f32.mrb[11].mxu1 }
 0x75d   :  { %v1000_v53 = vpack.c.bf16 %v4666_v51, %v991_v52 }
 0x75f   :  { %4672 = vmatmul.mubr.msk.bf16.vlgmr.msra.gmra.mrb[12].mxu1 %vm593_vm1, %v1000_v53 }
 0x760   :  { %4860 = vmatpush3.bf16.xpose.msk.msra.mxu1 %vm5885_vm2, %v4855_v50  ;;  %4687 = vmatprep.mubr.msk.f32.mxu1 %vm593_vm1, %v1119_v54 }
 0x767   :  { %4688 = vmatmul.mubr.msk.f32.vlgmr.msra.gmra.mrb[16].mxu1 %vm593_vm1, %v1121_v55 }
 0x832   :  { %v1055_v56 = vpop.f32.mrb[12].mxu1 }
 0x833   :  { %v5953_v57 = vadd.f32 %v1111_v34, %v1055_v56  ;;  %v4673_v58 = vpop.f32.mrb[13].mxu1 }
 0x834   :  { %v1058_v59 = vpop.f32.mrb[14].mxu1 }
 0x835   :  { %v5955_v60 = vadd.f32 %v1114_v37, %v1058_v59  ;;  %v4674_v61 = vpop.f32.mrb[15].mxu1 }
 0x83a   :  { %v4689_v62 = vpop.f32.mrb[16].mxu1 }
 0x83b   :  { %v1210_v63 = vmul.f32 0.17677669, %v4689_v62  ;;  %v1200_v1 = vpop.f32.mrb[17].mxu1 }
 0x83c   :  { %v1209_v2 = vmul.f32 0.17677669, %v1200_v1 }
 0x83d   :  { %v1212_v3 = vadd.f32 %v1210_v63, %v5899_v36 }
 0x83e   :  { %v1211_v4 = vadd.f32 %v1209_v2, %v5897_v33 }
 0x83f   :  { %v1216_v5 = vsel %vm685_vm3, %v1212_v3, -inf }
 0x840   :  { %1217 = vmax.xlane.f32.xlu0 %v1216_v5  ;;  %v1213_v7 = vsel %vm685_vm3, %v1211_v4, -inf }
 0x841   :  { %1214 = vmax.xlane.f32.xlu1 %v1213_v7 }
 0x852   :  { %4955 = vrot.lane.b32.xlu1 %v5863_v6, %s5615_s2 }
 0x856   :  { %1386 = vrot.lane.b32.xlu1 %v5877_v19, %s5633_s5 }
 0x85a   :  { %1388 = vrot.lane.b32.xlu1 %v5879_v25, %s5633_s5 }
 0x8cd   :  { %v1218_v8 = vpop.xlane.xlu0 %1217 }
 0x8ce   :  { %v1220_v9 = vsub.f32 %v1212_v3, %v1218_v8  ;;  %v1215_v10 = vpop.xlane.xlu1 %1214 }
 0x8cf   :  { %v1219_v11 = vsub.f32 %v1211_v4, %v1215_v10 }
 0x8d0   :  { %v1223_v12 = vmul.f32 1.442695, %v1220_v9 }
 0x8d1   :  { %v1221_v13 = vmul.f32 1.442695, %v1219_v11 }
 0x8d2   :  { %5275 = vpow2.f32 %v1223_v12  ;;  %v4956_v14 = vpop.permute.xlu1 %4955 }
 0x8d3   :  { %v4958_v15 = vunpack.i.h.bf16 %v4956_v14  ;;  %v4957_v16 = vunpack.i.l.bf16 %v4956_v14  ;;  %5277 = vpow2.f32 %v1221_v13  ;;  %v5061_v13 = vld [vmem:[#allocation8 + $0x30] sm:$0xff]  }
 0x8d5   :  { %v4861_v17 = vpack.c.bf16 %v4958_v15, %v4957_v16 }
 0x8d7   :  { %4862 = vmatprep.subr.bf16.mxu1 %v4861_v17 }
 0x8d8   :  { %4864 = vmatpush3.bf16.msra.mxu1 %v4861_v17  ;;  %v5063_v17 = vld [vmem:[#allocation11] ss:$16 sps:$4 sm:$0xff]  }
 0x8dc   :  { %v5276_v18 = vpop.eup %5275 }
 0x8dd   :  { %v1228_v19 = vsel %vm685_vm3, %v5276_v18, 0.0  ;;  %v5278_v20 = vpop.eup %5277 }
 0x8de   :  { %1229 = vadd.xlane.f32.xlu0 %v1228_v19  ;;  %v1225_v25 = vsel %vm685_vm3, %v5278_v20, 0.0  ;;  %v5066_v19 = vld [vmem:[#allocation11 + $0x8] ss:$16 sps:$4 sm:$0xff]  }
 0x8e2   :  { %1226 = vadd.xlane.f32.xlu0 %v1225_v25  ;;  %v5071_v25 = vld [vmem:[#allocation11 + $0x24] ss:$16 sps:$4 sm:$0xff]  }
 0x8f8   :  { %4960 = vrot.lane.b32.xlu0 %v5889_v30, %s5633_s5  ;;  %v1387_v30 = vpop.permute.xlu1 %1386 }
 0x8fc   :  { %v1389_v38 = vpop.permute.xlu1 %1388 }
 0x96b   :  { %v1230_v22 = vpop.xlane.xlu0 %1229 }
 0x96c   :  { %5279 = vrcp.f32 %v1230_v22  ;;  %v5069_v22 = vld [vmem:[#allocation11 + $0x20] ss:$16 sps:$4 sm:$0xff]  }
 0x96f   :  { %v1227_v23 = vpop.xlane.xlu0 %1226 }
 0x970   :  { %5281 = vrcp.f32 %v1227_v23  ;;  %v5072_v23 = vld [vmem:[#allocation11 + $0x28] ss:$16 sps:$4 sm:$0xff]  }
 0x973   :  { %v4961_v24 = vpop.permute.xlu0 %4960 }
 0x974   :  { %v4963_v26 = vunpack.i.h.bf16 %v4961_v24  ;;  %v4962_v29 = vunpack.i.l.bf16 %v4961_v24 }
 0x976   :  { %v4865_v31 = vpack.c.bf16 %v4963_v26, %v4962_v29  ;;  %v5280_v32 = vpop.eup %5279 }
 0x977   :  { %v1234_v37 = vmul.f32 %v5280_v32, %v5276_v18  ;;  %v5065_v18 = vld [vmem:[#allocation11 + $0x4] ss:$16 sps:$4 sm:$0xff]  }
 0x978   :  { %4867 = vmatprep.subr.msk.bf16.mxu1 %vm5885_vm2, %v4865_v31  ;;  %1872 = vmatprep.subr.bf16.mxu0 %v5065_v18  ;;  %v5371_v32 = vld [vmem:[#allocation17] sm:$0xff] }
 0x979   :  { %v5115_v18 = vld [vmem:[#allocation13 + $0x50] sm:$0xff]  }
 0x97a   :  { %v5282_v34 = vpop.eup %5281 }
 0x97b   :  { %v1233_v35 = vmul.f32 %v5282_v34, %v5278_v20  ;;  %v5068_v20 = vld [vmem:[#allocation11 + $0xc] ss:$16 sps:$4 sm:$0xff]  }
 0x97d   :  { %4694 = vmatprep.mubr.msk.f32.mxu1 %vm685_vm3, %v1233_v35 }
 0x97e   :  { %4695 = vmatmul.mubr.msk.f32.vlgmr.msra.gmra.mrb[18].mxu1 %vm685_vm3, %v1234_v37 }
 0x97f   :  { %4870 = vmatpush3.bf16.xpose.msk.msra.mxu1 %vm5885_vm2, %v4865_v31  ;;  %4709 = vmatprep.mubr.msk.f32.mxu1 %vm593_vm1, %v1387_v30  ;;  %v5372_v30 = vld [vmem:[#allocation17 + $0x8] sm:$0xff] }
 0x986   :  { %4710 = vmatmul.mubr.msk.f32.vlgmr.msra.gmra.mrb[20].mxu1 %vm593_vm1, %v1389_v38 }
 0xa51   :  { %v4696_v40 = vpop.f32.mrb[18].mxu1 }
 0xa52   :  { %v1313_v41 = vpop.f32.mrb[19].mxu1 }
 0xa53   :  { %v1322_v42 = vpack.c.bf16 %v4696_v40, %v1313_v41  ;;  %v5077_v41 = vld [vmem:[#allocation11 + $0x44] ss:$16 sps:$4 sm:$0xff]  }
 0xa55   :  { %4702 = vmatmul.mubr.msk.bf16.vlgmr.msra.gmra.mrb[12].mxu0 %vm593_vm1, %v1322_v42  ;;  %v5080_v42 = vld [vmem:[#allocation11 + $0x4c] ss:$16 sps:$4 sm:$0xff]  }
 0xa56   :  { %1904 = vmatprep.mubr.bf16.mxu0 %v5630_v27  ;;  %1873 = vmatpush1.bf16.msra.mxu0 %v5063_v17  ;;  %v5114_v17 = vld [vmem:[#allocation13 + $0x8] sm:$0xff]  }
 0xa57   :  { %1874 = vmatprep.subr.bf16.mxu0 %v5071_v25  ;;  %v5118_v25 = vld [vmem:[#allocation13 + $0x18] sm:$0xff]  }
 0xa59   :  { %v4711_v43 = vpop.f32.mrb[20].mxu1 }
 0xa5a   :  { %v1478_v44 = vmul.f32 0.17677669, %v4711_v43  ;;  %v1468_v45 = vpop.f32.mrb[21].mxu1  ;;  %1875 = vmatpush1.bf16.msra.mxu0 %v5069_v22  ;;  %v5075_v43 = vld [vmem:[#allocation11 + $0x40] ss:$16 sps:$4 sm:$0xff]  }
 0xa5b   :  { %v1477_v46 = vmul.f32 0.17677669, %v1468_v45  ;;  %1876 = vmatprep.subr.bf16.mxu0 %v5077_v41  ;;  %v5083_v45 = vld [vmem:[#allocation11 + $0x64] ss:$16 sps:$4 sm:$0xff]  }
 0xa5c   :  { %v1480_v47 = vadd.f32 %v1478_v44, %v5899_v36  ;;  %v5078_v44 = vld [vmem:[#allocation11 + $0x48] ss:$16 sps:$4 sm:$0xff]   ;;  %v5120_v22 = vld [vmem:[#allocation13 + $0x20] sm:$0xff]  }
 0xa5d   :  { %v1479_v48 = vadd.f32 %v1477_v46, %v5897_v33  ;;  %v5086_v46 = vld [vmem:[#allocation11 + $0x6c] ss:$16 sps:$4 sm:$0xff]  }
 0xa5e   :  { %v1484_v49 = vsel %vm685_vm3, %v1480_v47, -inf  ;;  %1877 = vmatpush1.bf16.msra.mxu0 %v5075_v43 }
 0xa5f   :  { %1485 = vmax.xlane.f32.xlu0 %v1484_v49  ;;  %v1481_v50 = vsel %vm685_vm3, %v1479_v48, -inf  ;;  %1878 = vmatprep.subr.bf16.mxu0 %v5083_v45  ;;  %v5089_v49 = vld [vmem:[#allocation11 + $0x84] ss:$16 sps:$4 sm:$0xff]  }
 0xa60   :  { %1482 = vmax.xlane.f32.xlu1 %v1481_v50  ;;  %v5092_v50 = vld [vmem:[#allocation11 + $0x8c] ss:$16 sps:$4 sm:$0xff]  }
 0xa71   :  { %4965 = vrot.lane.b32.xlu1 %v5863_v6, %s5633_s5 }
 0xaec   :  { %v1486_v51 = vpop.xlane.xlu0 %1485 }
 0xaed   :  { %v1488_v52 = vsub.f32 %v1480_v47, %v1486_v51  ;;  %v1483_v53 = vpop.xlane.xlu1 %1482  ;;  %v5081_v47 = vld [vmem:[#allocation11 + $0x60] ss:$16 sps:$4 sm:$0xff]  }
 0xaee   :  { %v1487_v54 = vsub.f32 %v1479_v48, %v1483_v53  ;;  %v5084_v48 = vld [vmem:[#allocation11 + $0x68] ss:$16 sps:$4 sm:$0xff]   ;;  %1879 = vmatpush1.bf16.msra.mxu0 %v5081_v47  ;;  %v5087_v51 = vld [vmem:[#allocation11 + $0x80] ss:$16 sps:$4 sm:$0xff]   ;;  %v5095_v53 = vld [vmem:[#allocation11 + $0xa4] ss:$16 sps:$4 sm:$0xff]  }
 0xaef   :  { %v1491_v55 = vmul.f32 1.442695, %v1488_v52  ;;  %v5090_v52 = vld [vmem:[#allocation11 + $0x88] ss:$16 sps:$4 sm:$0xff]   ;;  %1880 = vmatprep.subr.bf16.mxu0 %v5089_v49 }
 0xaf0   :  { %v1489_v56 = vmul.f32 1.442695, %v1487_v54  ;;  %v5098_v54 = vld [vmem:[#allocation11 + $0xac] ss:$16 sps:$4 sm:$0xff]  }
 0xaf1   :  { %v4966_v58 = vpop.permute.xlu1 %4965 }
 0xaf2   :  { %5283 = vpow2.f32 %v1489_v56  ;;  %v4968_v36 = vunpack.i.h.bf16 %v4966_v58  ;;  %v4967_v59 = vunpack.i.l.bf16 %v4966_v58  ;;  %1881 = vmatpush1.bf16.msra.mxu0 %v5087_v51  ;;  %v5096_v56 = vld [vmem:[#allocation11 + $0xa8] ss:$16 sps:$4 sm:$0xff]   ;;  %v5101_v58 = vld [vmem:[#allocation11 + $0xc4] ss:$16 sps:$4 sm:$0xff]  }
 0xaf3   :  { %5285 = vpow2.f32 %v1491_v55  ;;  %v5093_v55 = vld [vmem:[#allocation11 + $0xa0] ss:$16 sps:$4 sm:$0xff]   ;;  %1882 = vmatprep.subr.bf16.mxu0 %v5095_v53 }
 0xaf4   :  { %v4871_v33 = vpack.c.bf16 %v4968_v36, %v4967_v59  ;;  %v5104_v36 = vld [vmem:[#allocation11 + $0xcc] ss:$16 sps:$4 sm:$0xff]   ;;  %v5099_v59 = vld [vmem:[#allocation11 + $0xc0] ss:$16 sps:$4 sm:$0xff]  }
 0xaf6   :  { %4872 = vmatprep.subr.bf16.mxu1 %v4871_v33  ;;  %1883 = vmatpush1.bf16.msra.mxu0 %v5093_v55 }
 0xaf7   :  { %4874 = vmatpush3.bf16.msra.mxu1 %v4871_v33  ;;  %v5102_v33 = vld [vmem:[#allocation11 + $0xc8] ss:$16 sps:$4 sm:$0xff]   ;;  %1884 = vmatprep.subr.bf16.mxu0 %v5101_v58 }
 0xaf8   :  { %4719 = vmatprep.subr.bf16.mxu1 %v5629_v0 }
 0xafa   :  { %1885 = vmatpush1.bf16.msra.mxu0 %v5099_v59 }
 0xafc   :  { %v5284_v61 = vpop.eup %5283 }
 0xafd   :  { %v1493_v62 = vsel %vm685_vm3, %v5284_v61, 0.0  ;;  %v5286_v6 = vpop.eup %5285 }
 0xafe   :  { %1494 = vadd.xlane.f32.xlu0 %v1493_v62  ;;  %v1496_v63 = vsel %vm685_vm3, %v5286_v6, 0.0  ;;  %v5110_v62 = vld [vmem:[#allocation11 + $0xec] ss:$16 sps:$4 sm:$0xff]  }
 0xb02   :  { %1497 = vadd.xlane.f32.xlu0 %v1496_v63  ;;  %v5108_v63 = vld [vmem:[#allocation11 + $0xe8] ss:$16 sps:$4 sm:$0xff]  }
 0xb28   :  { %v1377_v1 = vpop.f32.mrb[12].mxu0 }
 0xb29   :  { %v1384_v2 = vadd.f32 %v1377_v1, %v5953_v57  ;;  %v4703_v3 = vpop.f32.mrb[13].mxu0  ;;  %v5062_v57 = vld [vmem:[#allocation8 + $0x38] sm:$0xff]  }
 0xb2a   :  { %v1380_v4 = vpop.f32.mrb[14].mxu0 }
 0xb2b   :  { %v1385_v5 = vadd.f32 %v1380_v4, %v5955_v60  ;;  %v4704_v7 = vpop.f32.mrb[15].mxu0 }
 0xb8b   :  { %v1495_v8 = vpop.xlane.xlu0 %1494 }
 0xb8c   :  { %5287 = vrcp.f32 %v1495_v8 }
 0xb8f   :  { %v1498_v9 = vpop.xlane.xlu0 %1497 }
 0xb90   :  { %5289 = vrcp.f32 %v1498_v9 }
 0xb96   :  { %v5288_v10 = vpop.eup %5287 }
 0xb97   :  { %v1501_v11 = vmul.f32 %v5288_v10, %v5284_v61  ;;  %v5107_v61 = vld [vmem:[#allocation11 + $0xe4] ss:$16 sps:$4 sm:$0xff]  }
 0xb98   :  { %1886 = vmatprep.subr.bf16.mxu0 %v5107_v61 }
 0xb99   :  { %4716 = vmatprep.mubr.msk.f32.mxu1 %vm685_vm3, %v1501_v11  ;;  %v4284_v11 = vld [vmem:[#allocation10] ss:$0 sm:$0xff] }
 0xb9a   :  { %v5290_v12 = vpop.eup %5289 }
 0xb9b   :  { %v1502_v14 = vmul.f32 %v5290_v12, %v5286_v6  ;;  %v5105_v6 = vld [vmem:[#allocation11 + $0xe0] ss:$16 sps:$4 sm:$0xff]  }
 0xb9c   :  { %1887 = vmatpush1.bf16.msra.mxu0 %v5105_v6 }
 0xb9d   :  { %4717 = vmatmul.mubr.msk.f32.vlgmr.msra.gmra.mrb[22].mxu1 %vm685_vm3, %v1502_v14 }
 0xb9e   :  { %4720 = vmatpush3.bf16.msra.mxu1 %v5061_v13  ;;  %4723 = vmatprep.mubr.msk.bf16.mxu1 %vm5631_vm0, %v5629_v0 }
 0xb9f   :  { %4721 = vmatprep.subr.bf16.mxu1 %v5629_v0 }
 0xba2   :  { %4722 = vmatpush3.bf16.msra.mxu1 %v5062_v57 }
 0xba3   :  { %1915 = vmatprep.subr.bf16.mxu1 %v5068_v20  ;;  %v5117_v20 = vld [vmem:[#allocation13 + $0x58] sm:$0xff]  }
 0xc70   :  { %v4718_v60 = vpop.f32.mrb[22].mxu1 }
 0xc71   :  { %v1581_v15 = vpop.f32.mrb[23].mxu1 }
 0xc72   :  { %v1590_v16 = vpack.c.bf16 %v4718_v60, %v1581_v15  ;;  %v5111_v60 = vld [vmem:[#allocation13 + $0x40] sm:$0xff]  }
 0xc73   :  { %v5112_v15 = vld [vmem:[#allocation13] sm:$0xff]   ;;  %4522 = vmatprep.subr.bf16.mxu0 %v5111_v60 }
 0xc74   :  { %4724 = vmatmul.mubr.msk.bf16.vlgmr.msra.gmra.mrb[24].mxu1 %vm593_vm1, %v1590_v16  ;;  %v5113_v16 = vld [vmem:[#allocation13 + $0x48] sm:$0xff]  }
 0xc75   :  { %1947 = vmatprep.mubr.bf16.mxu1 %v5630_v27  ;;  %1916 = vmatpush1.bf16.msra.mxu1 %v5066_v19  ;;  %v5116_v19 = vld [vmem:[#allocation13 + $0x10] sm:$0xff]  }
 0xc76   :  { %1917 = vmatprep.subr.bf16.mxu1 %v5074_v21  ;;  %v5119_v21 = vld [vmem:[#allocation13 + $0x60] sm:$0xff]  }
 0xc79   :  { %1918 = vmatpush1.bf16.msra.mxu1 %v5072_v23  ;;  %v5121_v23 = vld [vmem:[#allocation13 + $0x68] sm:$0xff]  }
 0xc7a   :  { %1919 = vmatprep.subr.bf16.mxu1 %v5080_v42 }
 0xc7d   :  { %1920 = vmatpush1.bf16.msra.mxu1 %v5078_v44 }
 0xc7e   :  { %1921 = vmatprep.subr.bf16.mxu1 %v5086_v46 }
 0xc81   :  { %1922 = vmatpush1.bf16.msra.mxu1 %v5084_v48 }
 0xc82   :  { %1923 = vmatprep.subr.bf16.mxu1 %v5092_v50 }
 0xc85   :  { %1924 = vmatpush1.bf16.msra.mxu1 %v5090_v52 }
 0xc86   :  { %1925 = vmatprep.subr.bf16.mxu1 %v5098_v54 }
 0xc89   :  { %1926 = vmatpush1.bf16.msra.mxu1 %v5096_v56 }
 0xc8a   :  { %1927 = vmatprep.subr.bf16.mxu1 %v5104_v36 }
 0xc8d   :  { %1928 = vmatpush1.bf16.msra.mxu1 %v5102_v33 }
 0xc8e   :  { %1929 = vmatprep.subr.bf16.mxu1 %v5110_v62 }
 0xc91   :  { %1930 = vmatpush1.bf16.msra.mxu1 %v5108_v63 }
 0xd47   :  { %v1645_v24 = vpop.f32.mrb[24].mxu1 }
 0xd48   :  { %v1652_v26 = vadd.f32 %v1645_v24, %v1384_v2  ;;  %v4725_v29 = vpop.f32.mrb[25].mxu1  ;;  %v5122_v24 = vld [vmem:[#allocation13 + $0x28] sm:$0xff]  }
 0xd49   :  { %v1648_v31 = vpop.f32.mrb[26].mxu1  ;;  %v5124_v29 = vld [vmem:[#allocation13 + $0x30] sm:$0xff]  }
 0xd4a   :  { %v6000_v34 = vadd.f32 %v5371_v32, %v1652_v26  ;;  %v1653_v35 = vadd.f32 %v1648_v31, %v1385_v5  ;;  %v4726_v37 = vpop.f32.mrb[27].mxu1  ;;  %v5123_v26 = vld [vmem:[#allocation13 + $0x70] sm:$0xff]   ;;  %v5125_v31 = vld [vmem:[#allocation13 + $0x78] sm:$0xff]  }
 0xd4b   :  { %v5126_v32 = vld [vmem:[#allocation13 + $0x38] sm:$0xff]  }
 0xd4c   :  { %v6002_v38 = vadd.f32 %v5372_v30, %v1653_v35  ;;  %v1657_v39 = vmul.f32 %v6000_v34, %v6000_v34 }
 0xd4e   :  { %1659 = vadd.xlane.f32.xlu0 %v1657_v39  ;;  %v1658_v40 = vmul.f32 %v6002_v38, %v6002_v38 }
 0xd52   :  { %1661 = vadd.xlane.f32.xlu0 %v1658_v40 }
 0xddb   :  { %v1660_v1 = vpop.xlane.xlu0 %1659 }
 0xddc   :  { %v1663_v2 = vmul.f32 0.0078125, %v1660_v1 }
 0xdde   :  { %v1665_v3 = vadd.f32 1e-06, %v1663_v2 }
 0xddf   :  { %v1662_v4 = vpop.xlane.xlu0 %1661 }
 0xde0   :  { %5291 = vrsqrt.f32 %v1665_v3  ;;  %v1664_v5 = vmul.f32 0.0078125, %v1662_v4 }
 0xde2   :  { %v1666_v7 = vadd.f32 1e-06, %v1664_v5 }
 0xde4   :  { %5293 = vrsqrt.f32 %v1666_v7  ;;  %v5127_v7 = vld [vmem:[#allocation5 + $0xc0] ss:$12 sps:$4 sm:$0xff]  }
 0xdea   :  { %v5292_v8 = vpop.eup %5291 }
 0xdeb   :  { %v1669_v9 = vmul.f32 %v5292_v8, %v6000_v34  ;;  %v5129_v8 = vld [vmem:[#allocation5 + $0xc4] ss:$12 sps:$4 sm:$0xff]  }
 0xdec   :  { %2352 = vmatprep.subr.bf16.mxu1 %v5129_v8  ;;  %v5182_v8 = vld [vmem:[#allocation7 + $0xf4] ss:$8 sps:$4 sm:$0xff]  }
 0xded   :  { %v1677_v13 = vmul.f32 %v4284_v11, %v1669_v9  ;;  %v5130_v9 = vld [vmem:[#allocation5 + $0xc8] ss:$12 sps:$4 sm:$0xff]  }
 0xdee   :  { %v5294_v10 = vpop.eup %5293 }
 0xdef   :  { %v1670_v12 = vmul.f32 %v5294_v10, %v6002_v38  ;;  %v5133_v10 = vld [vmem:[#allocation5 + $0xdc] ss:$12 sps:$4 sm:$0xff]  }
 0xdf1   :  { %v1678_v14 = vmul.f32 %v4284_v11, %v1670_v12  ;;  %v5134_v11 = vld [vmem:[#allocation5 + $0xe0] ss:$12 sps:$4 sm:$0xff]   ;;  %v5131_v12 = vld [vmem:[#allocation5 + $0xd8] ss:$12 sps:$4 sm:$0xff]  }
 0xdf3   :  { %v1679_v57 = vpack.c.bf16 %v1678_v14, %v1677_v13 }
 0xdf5   :  { %1905 = vmatmul.mubr.bf16.vlgmr.msra.gmra.mrb[16].mxu0 %v1679_v57  ;;  %1948 = vmatmul.mubr.bf16.vlgmr.msra.gmra.mrb[28].mxu1 %v1679_v57 }
 0xdf6   :  { %2384 = vmatprep.mubr.bf16.mxu1 %v5630_v27  ;;  %4523 = vmatpush3.bf16.msra.mxu0 %v5112_v15 }
 0xdf7   :  { %4524 = vmatprep.subr.bf16.mxu0 %v5113_v16  ;;  %2353 = vmatpush1.bf16.msra.mxu1 %v5127_v7  ;;  %v5177_v7 = vld [vmem:[#allocation7 + $0xe0] ss:$8 sps:$4 sm:$0xff]  }
 0xdf8   :  { %2354 = vmatprep.subr.bf16.mxu1 %v5133_v10 }
 0xdfa   :  { %4525 = vmatpush3.bf16.msra.mxu0 %v5114_v17 }
 0xdfb   :  { %4526 = vmatprep.subr.bf16.mxu0 %v5115_v18  ;;  %2355 = vmatpush1.bf16.msra.mxu1 %v5131_v12 }
 0xdfe   :  { %4527 = vmatpush3.bf16.msra.mxu0 %v5116_v19 }
 0xdff   :  { %4528 = vmatprep.subr.bf16.mxu0 %v5117_v20 }
 0xe02   :  { %4529 = vmatpush3.bf16.msra.mxu0 %v5118_v25  ;;  %v5137_v25 = vld [vmem:[#allocation5 + $0xf4] ss:$12 sps:$4 sm:$0xff]  }
 0xe03   :  { %4530 = vmatprep.subr.bf16.mxu0 %v5119_v21  ;;  %v5135_v21 = vld [vmem:[#allocation5 + $0xf0] ss:$12 sps:$4 sm:$0xff]   ;;  %2356 = vmatprep.subr.bf16.mxu1 %v5137_v25 }
 0xe04   :  { %2357 = vmatpush1.bf16.msra.mxu1 %v5135_v21  ;;  %v5373_v25 = vld [vmem:[%s6211_s9] sm:$0xff] }
 0xe06   :  { %4531 = vmatpush3.bf16.msra.mxu0 %v5120_v22  ;;  %v5141_v22 = vld [vmem:[#allocation5 + $0x10c] ss:$12 sps:$4 sm:$0xff]  }
 0xe07   :  { %4532 = vmatprep.subr.bf16.mxu0 %v5121_v23  ;;  %v5139_v23 = vld [vmem:[#allocation5 + $0x108] ss:$12 sps:$4 sm:$0xff]   ;;  %2358 = vmatprep.subr.bf16.mxu1 %v5141_v22 }
 0xe08   :  { %2359 = vmatpush1.bf16.msra.mxu1 %v5139_v23 }
 0xe0a   :  { %4533 = vmatpush3.bf16.msra.mxu0 %v5122_v24  ;;  %v5145_v24 = vld [vmem:[#allocation5 + $0x124] ss:$12 sps:$4 sm:$0xff]  }
 0xe0b   :  { %4534 = vmatprep.subr.bf16.mxu0 %v5123_v26  ;;  %v5143_v26 = vld [vmem:[#allocation5 + $0x120] ss:$12 sps:$4 sm:$0xff]   ;;  %2360 = vmatprep.subr.bf16.mxu1 %v5145_v24 }
 0xe0c   :  { %2361 = vmatpush1.bf16.msra.mxu1 %v5143_v26 }
 0xe0e   :  { %4535 = vmatpush3.bf16.msra.mxu0 %v5124_v29  ;;  %v5146_v29 = vld [vmem:[#allocation5 + $0x128] ss:$12 sps:$4 sm:$0xff]  }
 0xe0f   :  { %4536 = vmatprep.subr.bf16.mxu0 %v5125_v31  ;;  %v5149_v31 = vld [vmem:[#allocation5 + $0x13c] ss:$12 sps:$4 sm:$0xff]  }
 0xe10   :  { %2362 = vmatprep.subr.bf16.mxu1 %v5149_v31 }
 0xe12   :  { %4537 = vmatpush3.bf16.msra.mxu0 %v5126_v32  ;;  %v5147_v32 = vld [vmem:[#allocation5 + $0x138] ss:$12 sps:$4 sm:$0xff]  }
 0xe13   :  { %4727 = vmatprep.subr.bf16.mxu0 %v5629_v0  ;;  %2363 = vmatpush1.bf16.msra.mxu1 %v5147_v32 }
 0xec8   :  { %v1906_v35 = vpop.f32.mrb[16].mxu0  ;;  %v1949_v37 = vpop.f32.mrb[28].mxu1 }
 0xec9   :  { %v4317_v30 = vmul.f32 -1.442695, %v1906_v35  ;;  %v1908_v39 = vpop.f32.mrb[17].mxu0  ;;  %v1951_v40 = vpop.f32.mrb[29].mxu1 }
 0xeca   :  { %v4318_v41 = vmul.f32 -1.442695, %v1908_v39  ;;  %v1910_v42 = vpop.f32.mrb[18].mxu0  ;;  %v1953_v43 = vpop.f32.mrb[30].mxu1 }
 0xecb   :  { %5295 = vpow2.f32 %v4317_v30  ;;  %v4319_v44 = vmul.f32 -1.442695, %v1910_v42  ;;  %v1912_v45 = vpop.f32.mrb[19].mxu0  ;;  %v1955_v46 = vpop.f32.mrb[31].mxu1  ;;  %v5151_v30 = vld [vmem:[#allocation5 + $0x150] ss:$12 sps:$4 sm:$0xff]  }
 0xecc   :  { %5297 = vpow2.f32 %v4318_v41  ;;  %v4320_v47 = vmul.f32 -1.442695, %v1912_v45  ;;  %v5155_v41 = vld [vmem:[#allocation5 + $0x168] ss:$12 sps:$4 sm:$0xff]  }
 0xecd   :  { %5299 = vpow2.f32 %v4319_v44 }
 0xece   :  { %5301 = vpow2.f32 %v4320_v47 }
 0xed5   :  { %v5296_v48 = vpop.eup %5295 }
 0xed6   :  { %v5298_v49 = vpop.eup %5297  ;;  %v1970_v50 = vadd.f32 1.0, %v5296_v48 }
 0xed7   :  { %v5300_v51 = vpop.eup %5299  ;;  %v1971_v52 = vadd.f32 1.0, %v5298_v49 }
 0xed8   :  { %v5302_v53 = vpop.eup %5301  ;;  %5303 = vrcp.f32 %v1970_v50  ;;  %v1972_v54 = vadd.f32 1.0, %v5300_v51 }
 0xed9   :  { %5305 = vrcp.f32 %v1971_v52  ;;  %v1973_v55 = vadd.f32 1.0, %v5302_v53  ;;  %v4338_v53 = vld [vmem:[%s6203_s1 + $0x1] ss:$0 sm:$0xff] }
 0xeda   :  { %5307 = vrcp.f32 %v1972_v54 }
 0xedb   :  { %5309 = vrcp.f32 %v1973_v55 }
 0xee2   :  { %v5304_v56 = vpop.eup %5303 }
 0xee3   :  { %v5306_v58 = vpop.eup %5305  ;;  %v1982_v36 = vmul.f32 %v5304_v56, %v1906_v35  ;;  %v5150_v35 = vld [vmem:[#allocation5 + $0x140] ss:$12 sps:$4 sm:$0xff]  }
 0xee4   :  { %v5308_v59 = vpop.eup %5307  ;;  %v1983_v33 = vmul.f32 %v5306_v58, %v1908_v39  ;;  %v5154_v39 = vld [vmem:[#allocation5 + $0x158] ss:$12 sps:$4 sm:$0xff]   ;;  %v5159_v58 = vld [vmem:[#allocation7 + $0x80] ss:$8 sps:$4 sm:$0xff]  }
 0xee5   :  { %v5310_v61 = vpop.eup %5309  ;;  %v1986_v62 = vmul.f32 %v1982_v36, %v1949_v37  ;;  %v1984_v6 = vmul.f32 %v5308_v59, %v1910_v42  ;;  %v5153_v37 = vld [vmem:[#allocation5 + $0x154] ss:$12 sps:$4 sm:$0xff]   ;;  %v5158_v42 = vld [vmem:[#allocation5 + $0x170] ss:$12 sps:$4 sm:$0xff]  }
 0xee6   :  { %v1987_v63 = vmul.f32 %v1983_v33, %v1951_v40  ;;  %v1985_v1 = vmul.f32 %v5310_v61, %v1912_v45  ;;  %2364 = vmatprep.subr.bf16.mxu1 %v5153_v37  ;;  %v5157_v40 = vld [vmem:[#allocation5 + $0x16c] ss:$12 sps:$4 sm:$0xff]   ;;  %v5164_v59 = vld [vmem:[#allocation7 + $0x94] ss:$8 sps:$4 sm:$0xff]  }
 0xee7   :  { %v1988_v2 = vmul.f32 %v1984_v6, %v1953_v43  ;;  %2365 = vmatpush1.bf16.msra.mxu1 %v5151_v30  ;;  %v5161_v43 = vld [vmem:[#allocation7 + $0x84] ss:$8 sps:$4 sm:$0xff]   ;;  %v5162_v33 = vld [vmem:[#allocation7 + $0x90] ss:$8 sps:$4 sm:$0xff]   ;;  %v5170_v6 = vld [vmem:[#allocation7 + $0xb4] ss:$8 sps:$4 sm:$0xff]  }
 0xee8   :  { %v1989_v3 = vmul.f32 %v1985_v1, %v1955_v46  ;;  %2366 = vmatprep.subr.bf16.mxu1 %v5157_v40  ;;  %v5167_v61 = vld [vmem:[#allocation7 + $0xa4] ss:$8 sps:$4 sm:$0xff]  }
 0xee9   :  { %v1990_v4 = vpack.c.bf16 %v1988_v2, %v1986_v62  ;;  %v5165_v62 = vld [vmem:[#allocation7 + $0xa0] ss:$8 sps:$4 sm:$0xff]   ;;  %v5173_v1 = vld [vmem:[#allocation7 + $0xc4] ss:$8 sps:$4 sm:$0xff]  }
 0xeea   :  { %v1991_v5 = vpack.c.bf16 %v1989_v3, %v1987_v63  ;;  %v5168_v63 = vld [vmem:[#allocation7 + $0xb0] ss:$8 sps:$4 sm:$0xff]   ;;  %v5171_v2 = vld [vmem:[#allocation7 + $0xc0] ss:$8 sps:$4 sm:$0xff]   ;;  %v5176_v3 = vld [vmem:[#allocation7 + $0xd4] ss:$8 sps:$4 sm:$0xff]  }
 0xeeb   :  { %2367 = vmatpush1.bf16.msra.mxu1 %v5155_v41 }
 0xeec   :  { %2152 = vmatprep.mubr.bf16.mxu0 %v1991_v5  ;;  %2533 = vmatprep.subr.bf16.mxu1 %v5161_v43  ;;  %v5179_v5 = vld [vmem:[#allocation7 + $0xe4] ss:$8 sps:$4 sm:$0xff]  }
 0xeed   :  { %2153 = vmatmul.mubr.bf16.vlgmr.msra.gmra.mrb[20].mxu0 %v1990_v4  ;;  %v5174_v4 = vld [vmem:[#allocation7 + $0xd0] ss:$8 sps:$4 sm:$0xff]  }
 0xeee   :  { %4743 = vmatprep.mubr.msk.bf16.mxu0 %vm5631_vm0, %v5629_v0  ;;  %4728 = vmatpush3.bf16.msra.mxu0 %v5130_v9  ;;  %v5180_v9 = vld [vmem:[#allocation7 + $0xf0] ss:$8 sps:$4 sm:$0xff]  }
 0xeef   :  { %4729 = vmatprep.subr.bf16.mxu0 %v5629_v0 }
 0xef2   :  { %4730 = vmatpush3.bf16.msra.mxu0 %v5134_v11 }
 0xef3   :  { %4731 = vmatprep.subr.bf16.mxu0 %v5629_v0 }
 0xfc0   :  { %v4538_v13 = vpop.f32.mrb[20].mxu0 }
 0xfc1   :  { %v4539_v14 = vpop.f32.mrb[21].mxu0 }
 0xfc2   :  { %v4540_v57 = vadd.f32 %v4539_v14, %v4538_v13  ;;  %v4541_v60 = vpop.f32.mrb[22].mxu0 }
 0xfc3   :  { %v4542_v15 = vpop.f32.mrb[23].mxu0 }
 0xfc4   :  { %v6017_v16 = vadd.f32 %v4540_v57, %v6000_v34  ;;  %v4543_v17 = vadd.f32 %v4542_v15, %v4541_v60  ;;  %v5138_v34 = vld [vmem:[#allocation5 + $0xf8] ss:$12 sps:$4 sm:$0xff]  }
 0xfc5   :  { %4732 = vmatpush3.bf16.msra.mxu0 %v5138_v34  ;;  %v5374_v34 = vld [vmem:[%s6212_s10] sm:$0xff] }
 0xfc6   :  { %2164 = vst [vmem:[#allocation17 + $0x10] sm:$0xff] %v6017_v16  ;;  %v6021_v18 = vadd.f32 %v4543_v17, %v6002_v38  ;;  %v2168_v19 = vmul.f32 %v6017_v16, %v6017_v16  ;;  %4733 = vmatprep.subr.bf16.mxu0 %v5629_v0  ;;  %v5142_v38 = vld [vmem:[#allocation5 + $0x110] ss:$12 sps:$4 sm:$0xff]  }
 0xfc8   :  { %2165 = vst [vmem:[#allocation17 + $0x18] sm:$0xff] %v6021_v18  ;;  %2170 = vadd.xlane.f32.xlu0 %v2168_v19  ;;  %v2169_v20 = vmul.f32 %v6021_v18, %v6021_v18 }
 0xfc9   :  { %4734 = vmatpush3.bf16.msra.mxu0 %v5142_v38 }
 0xfca   :  { %4735 = vmatprep.subr.bf16.mxu0 %v5629_v0 }
 0xfcc   :  { %2172 = vadd.xlane.f32.xlu0 %v2169_v20 }
 0xfcd   :  { %4736 = vmatpush3.bf16.msra.mxu0 %v5146_v29  ;;  %v5375_v29 = vld [vmem:[%s6211_s9 + $0x8] sm:$0xff]  ;;  %s5634_s9 = smov [#allocation17]  }
 0xfce   :  { %4737 = vmatprep.subr.bf16.mxu0 %v5629_v0 }
 0xfd1   :  { %4738 = vmatpush3.bf16.msra.mxu0 %v5150_v35  ;;  %v5376_v35 = vld [vmem:[%s6212_s10 + $0x8] sm:$0xff]  ;;  %s4191_s10 = sshll.u32 %s5634_s9, 4  ;;  %s4192_s10 = int_to_ptr.vmem [resolvable:$true] %s4191_s10 }
 0xfd2   :  { %4739 = vmatprep.subr.bf16.mxu0 %v5629_v0  ;;  %p5582_p3 = scmp.lt.s32.totalorder %s4192_s10, %s4192_s10 }
 0xfd5   :  { %4740 = vmatpush3.bf16.msra.mxu0 %v5154_v39 }
 0xfd6   :  { %4741 = vmatprep.subr.bf16.mxu0 %v5629_v0 }
 0xfd9   :  { %4742 = vmatpush3.bf16.msra.mxu0 %v5158_v42 }
0x1055   :  { %v2171_v44 = vpop.xlane.xlu0 %2170 }
0x1056   :  { %v2174_v45 = vmul.f32 0.0078125, %v2171_v44 }
0x1058   :  { %v2176_v46 = vadd.f32 1e-06, %v2174_v45 }
0x1059   :  { %v2173_v47 = vpop.xlane.xlu0 %2172 }
0x105a   :  { %5311 = vrsqrt.f32 %v2176_v46  ;;  %v2175_v48 = vmul.f32 0.0078125, %v2173_v47 }
0x105c   :  { %v2177_v49 = vadd.f32 1e-06, %v2175_v48 }
0x105e   :  { %5313 = vrsqrt.f32 %v2177_v49 }
0x1064   :  { %v5312_v50 = vpop.eup %5311 }
0x1065   :  { %v2180_v51 = vmul.f32 %v5312_v50, %v6017_v16 }
0x1067   :  { %v2188_v55 = vmul.f32 %v4338_v53, %v2180_v51 }
0x1068   :  { %v5314_v52 = vpop.eup %5313 }
0x1069   :  { %v2181_v54 = vmul.f32 %v5314_v52, %v6021_v18 }
0x106b   :  { %v2189_v56 = vmul.f32 %v4338_v53, %v2181_v54 }
0x106d   :  { %v2190_v36 = vpack.c.bf16 %v2189_v56, %v2188_v55  ;;  %v6082_v56 = vld [vmem:[#allocation16 + $0x8] sm:$0xff] }
0x106f   :  { %2385 = vmatmul.mubr.bf16.vlgmr.msra.gmra.mrb[32].mxu1 %v2190_v36  ;;  %4744 = vmatmul.mubr.bf16.vlgmr.msra.gmra.mrb[24].mxu0 %v2190_v36 }
0x1070   :  { %2534 = vmatpush1.bf16.msra.mxu1 %v5159_v58  ;;  %2565 = vmatprep.mubr.bf16.mxu1 %v5630_v27 }
0x1071   :  { %2535 = vmatprep.subr.bf16.mxu1 %v5164_v59 }
0x1074   :  { %2536 = vmatpush1.bf16.msra.mxu1 %v5162_v33 }
0x1075   :  { %2537 = vmatprep.subr.bf16.mxu1 %v5167_v61 }
0x1078   :  { %2538 = vmatpush1.bf16.msra.mxu1 %v5165_v62 }
0x1079   :  { %2539 = vmatprep.subr.bf16.mxu1 %v5170_v6 }
0x107c   :  { %2540 = vmatpush1.bf16.msra.mxu1 %v5168_v63 }
0x107d   :  { %2541 = vmatprep.subr.bf16.mxu1 %v5173_v1 }
0x1080   :  { %2542 = vmatpush1.bf16.msra.mxu1 %v5171_v2 }
0x1081   :  { %2543 = vmatprep.subr.bf16.mxu1 %v5176_v3 }
0x1084   :  { %2544 = vmatpush1.bf16.msra.mxu1 %v5174_v4 }
0x1085   :  { %2545 = vmatprep.subr.bf16.mxu1 %v5179_v5 }
0x1088   :  { %2546 = vmatpush1.bf16.msra.mxu1 %v5177_v7 }
0x1089   :  { %2547 = vmatprep.subr.bf16.mxu1 %v5182_v8 }
0x108c   :  { %2548 = vmatpush1.bf16.msra.mxu1 %v5180_v9 }
0x108f   :  { %2566 = vmatmul.mubr.bf16.vlgmr.msra.gmra.mrb[36].mxu1 %v2190_v36  ;;  %v6085_v36 = vld [vmem:[#allocation16] sm:$0xff] }
0x1142   :  { %v2386_v10 = vpop.f32.mrb[32].mxu1  ;;  %v2429_v11 = vpop.f32.mrb[24].mxu0 }
0x1143   :  { %v2388_v12 = vpop.f32.mrb[33].mxu1  ;;  %v4745_v13 = vpop.f32.mrb[25].mxu0  ;;  %v2576_v21 = vmul.f32 %v5373_v25, %v2386_v10 }
0x1144   :  { %v2390_v14 = vpop.f32.mrb[34].mxu1  ;;  %v2432_v57 = vpop.f32.mrb[26].mxu0  ;;  %v2582_v38 = vmul.f32 %v5373_v25, %v2388_v12 }
0x1145   :  { %v2392_v60 = vpop.f32.mrb[35].mxu1  ;;  %v4746_v15 = vpop.f32.mrb[27].mxu0  ;;  %v4881_v17 = vpack.c.bf16 %v2432_v57, %v2429_v11  ;;  %v6039_v19 = vpack.i.bf16 %v2432_v57, %v2429_v11  ;;  %v2577_v31 = vmul.f32 %v5375_v29, %v2390_v14 }
0x1146   :  { %v2583_v39 = vmul.f32 %v5375_v29, %v2392_v60 }
0x1162   :  { %v2567_v20 = vpop.f32.mrb[36].mxu1 }
0x1163   :  { %v2578_v22 = vmul.f32 %v5374_v34, %v2567_v20  ;;  %v2569_v23 = vpop.f32.mrb[37].mxu1 }
0x1164   :  { %v2584_v24 = vmul.f32 %v5374_v34, %v2569_v23  ;;  %v2571_v26 = vpop.f32.mrb[38].mxu1 }
0x1165   :  { %v6050_v32 = vadd.f32 %v2578_v22, %v2576_v21  ;;  %v2579_v37 = vmul.f32 %v5376_v35, %v2571_v26  ;;  %v2573_v30 = vpop.f32.mrb[39].mxu1 }
0x1166   :  { %v2586_v40 = vadd.f32 %v2584_v24, %v2582_v38  ;;  %v2585_v41 = vmul.f32 %v5376_v35, %v2573_v30 }
0x1167   :  { %v6055_v42 = vadd.f32 %v2579_v37, %v2577_v31  ;;  %2788 = vrot.lane.b32.xlu0 %v6050_v32, %s5632_s17  ;;  %4751 = vmatprep.mubr.msk.f32.mxu0 %vm593_vm1, %v6050_v32 }
0x1168   :  { %v2587_v43 = vadd.f32 %v2585_v41, %v2583_v39  ;;  %v5183_v39 = vld [vmem:[#allocation8 + $0x50] sm:$0xff]  }
0x116a   :  { %v6061_v44 = vpack.i.bf16 %v2587_v43, %v2586_v40  ;;  %v4875_v45 = vpack.c.bf16 %v2587_v43, %v2586_v40 }
0x116c   :  { %4970 = vrot.lane.b32.xlu1 %v6061_v44, %s5632_s17  ;;  %4877 = vmatprep.subr.msk.bf16.mxu0 %vm5885_vm2, %v4875_v45 }
0x116d   :  { %4880 = vmatpush3.bf16.xpose.msk.msra.mxu0 %vm5885_vm2, %v4875_v45 }
0x116e   :  { %4882 = vmatprep.subr.bf16.mxu0 %v4881_v17 }
0x1170   :  { %2790 = vrot.lane.b32.xlu1 %v6055_v42, %s5632_s17 }
0x1174   :  { %4752 = vmatmul.mubr.msk.f32.vlgmr.msra.gmra.mrb[28].mxu0 %vm593_vm1, %v6055_v42 }
0x1175   :  { %4884 = vmatpush3.bf16.msra.mxu0 %v4881_v17 }
0x11d9   :  { %v2789_v46 = vpop.permute.xlu0 %2788 }
0x11da   :  { %4765 = vmatprep.mubr.msk.f32.mxu1 %vm593_vm1, %v2789_v46 }
0x11de   :  { %v4971_v47 = vpop.permute.xlu1 %4970 }
0x11df   :  { %v4973_v48 = vunpack.i.h.bf16 %v4971_v47  ;;  %v4972_v49 = vunpack.i.l.bf16 %v4971_v47 }
0x11e1   :  { %v4885_v50 = vpack.c.bf16 %v4973_v48, %v4972_v49 }
0x11e2   :  { %v2791_v51 = vpop.permute.xlu1 %2790 }
0x11e3   :  { %4887 = vmatprep.subr.msk.bf16.mxu1 %vm5885_vm2, %v4885_v50 }
0x11e4   :  { %4890 = vmatpush3.bf16.xpose.msk.msra.mxu1 %vm5885_vm2, %v4885_v50 }
0x11e5   :  { %4775 = vmatprep.subr.bf16.mxu1 %v5629_v0 }
0x11eb   :  { %4766 = vmatmul.mubr.msk.f32.vlgmr.msra.gmra.mrb[40].mxu1 %vm593_vm1, %v2791_v51 }
0x11ec   :  { %4779 = vmatprep.mubr.msk.bf16.mxu1 %vm5631_vm0, %v5629_v0  ;;  %4776 = vmatpush3.bf16.msra.mxu1 %v5183_v39 }
0x11ed   :  { %4777 = vmatprep.subr.bf16.mxu1 %v5629_v0 }
0x1247   :  { %v4753_v52 = vpop.f32.mrb[28].mxu0 }
0x1248   :  { %v2676_v53 = vmul.f32 0.17677669, %v4753_v52  ;;  %v2666_v54 = vpop.f32.mrb[29].mxu0  ;;  %v5184_v52 = vld [vmem:[#allocation8 + $0x58] sm:$0xff]  }
0x1249   :  { %v2675_v55 = vmul.f32 0.17677669, %v2666_v54  ;;  %4778 = vmatpush3.bf16.msra.mxu1 %v5184_v52 }
0x124a   :  { %v2678_v58 = vadd.f32 %v6082_v56, %v2676_v53  ;;  %4783 = vmatprep.subr.bf16.mxu1 %v5629_v0 }
0x124b   :  { %v2677_v59 = vadd.f32 %v6085_v36, %v2675_v55 }
0x124c   :  { %v2682_v33 = vsel %vm685_vm3, %v2678_v58, -inf }
0x124d   :  { %2683 = vmax.xlane.f32.xlu0 %v2682_v33  ;;  %v2679_v61 = vsel %vm685_vm3, %v2677_v59, -inf }
0x124e   :  { %2680 = vmax.xlane.f32.xlu1 %v2679_v61  ;;  %v5185_v61 = vld [vmem:[#allocation8 + $0x40] sm:$0xff]  }
0x12be   :  { %v4767_v62 = vpop.f32.mrb[40].mxu1 }
0x12bf   :  { %v2870_v6 = vpop.f32.mrb[41].mxu1  ;;  %v2880_v63 = vmul.f32 0.17677669, %v4767_v62 }
0x12c0   :  { %v2879_v1 = vmul.f32 0.17677669, %v2870_v6 }
0x12c1   :  { %v2882_v4 = vadd.f32 %v6082_v56, %v2880_v63 }
0x12c2   :  { %v2881_v2 = vadd.f32 %v6085_v36, %v2879_v1  ;;  %v5186_v1 = vld [vmem:[#allocation8 + $0x48] sm:$0xff]  }
0x12c3   :  { %v2886_v5 = vsel %vm685_vm3, %v2882_v4, -inf }
0x12c4   :  { %v2883_v3 = vsel %vm685_vm3, %v2881_v2, -inf }
0x12c5   :  { %2884 = vmax.xlane.f32.xlu1 %v2883_v3 }
0x12c9   :  { %2887 = vmax.xlane.f32.xlu1 %v2886_v5 }
0x12da   :  { %v2684_v7 = vpop.xlane.xlu0 %2683 }
0x12db   :  { %v2686_v8 = vsub.f32 %v2678_v58, %v2684_v7  ;;  %v2681_v9 = vpop.xlane.xlu1 %2680 }
0x12dc   :  { %v2685_v10 = vsub.f32 %v2677_v59, %v2681_v9 }
0x12dd   :  { %v2689_v11 = vmul.f32 1.442695, %v2686_v8 }
0x12de   :  { %v2687_v12 = vmul.f32 1.442695, %v2685_v10 }
0x12df   :  { %5315 = vpow2.f32 %v2689_v11 }
0x12e0   :  { %5317 = vpow2.f32 %v2687_v12 }
0x12e9   :  { %v5316_v13 = vpop.eup %5315 }
0x12ea   :  { %v5318_v14 = vpop.eup %5317  ;;  %v2694_v57 = vsel %vm685_vm3, %v5316_v13, 0.0 }
0x12eb   :  { %2695 = vadd.xlane.f32.xlu0 %v2694_v57  ;;  %v2691_v60 = vsel %vm685_vm3, %v5318_v14, 0.0 }
0x12ec   :  { %2692 = vadd.xlane.f32.xlu1 %v2691_v60 }
0x1352   :  { %v2885_v15 = vpop.xlane.xlu1 %2884 }
0x1353   :  { %v2889_v17 = vsub.f32 %v2881_v2, %v2885_v15 }
0x1355   :  { %v2891_v20 = vmul.f32 1.442695, %v2889_v17 }
0x1356   :  { %v2888_v25 = vpop.xlane.xlu1 %2887 }
0x1357   :  { %5319 = vpow2.f32 %v2891_v20  ;;  %v2890_v21 = vsub.f32 %v2882_v4, %v2888_v25 }
0x1359   :  { %v2893_v34 = vmul.f32 1.442695, %v2890_v21 }
0x135b   :  { %5321 = vpow2.f32 %v2893_v34 }
0x1361   :  { %v5320_v22 = vpop.eup %5319 }
0x1362   :  { %v2895_v23 = vsel %vm685_vm3, %v5320_v22, 0.0 }
0x1363   :  { %2896 = vadd.xlane.f32.xlu1 %v2895_v23 }
0x1365   :  { %v5322_v38 = vpop.eup %5321 }
0x1366   :  { %v2898_v24 = vsel %vm685_vm3, %v5322_v38, 0.0 }
0x1367   :  { %2899 = vadd.xlane.f32.xlu0 %v2898_v24 }
0x1374   :  { %4975 = vrot.lane.b32.xlu1 %v6039_v19, %s5632_s17 }
0x1378   :  { %v2696_v26 = vpop.xlane.xlu0 %2695  ;;  %3112 = vrot.lane.b32.xlu1 %v6050_v32, %s5615_s2 }
0x1379   :  { %5323 = vrcp.f32 %v2696_v26  ;;  %v2693_v29 = vpop.xlane.xlu1 %2692 }
0x137a   :  { %5325 = vrcp.f32 %v2693_v29 }
0x137c   :  { %3114 = vrot.lane.b32.xlu1 %v6055_v42, %s5615_s2 }
0x137d   :  { %4980 = vrot.lane.b32.xlu0 %v6061_v44, %s5615_s2 }
0x1383   :  { %v5324_v31 = vpop.eup %5323 }
0x1384   :  { %v5326_v35 = vpop.eup %5325  ;;  %v2700_v30 = vmul.f32 %v5324_v31, %v5316_v13 }
0x1385   :  { %v2699_v37 = vmul.f32 %v5326_v35, %v5318_v14 }
0x1387   :  { %4758 = vmatprep.mubr.msk.f32.mxu0 %vm685_vm3, %v2699_v37 }
0x1388   :  { %4759 = vmatmul.mubr.msk.f32.vlgmr.msra.gmra.mrb[30].mxu0 %vm685_vm3, %v2700_v30 }
0x13f0   :  { %v2897_v40 = vpop.xlane.xlu1 %2896 }
0x13f1   :  { %5327 = vrcp.f32 %v2897_v40 }
0x13f4   :  { %v2900_v41 = vpop.xlane.xlu0 %2899  ;;  %v4976_v43 = vpop.permute.xlu1 %4975 }
0x13f5   :  { %5329 = vrcp.f32 %v2900_v41  ;;  %v4978_v45 = vunpack.i.h.bf16 %v4976_v43  ;;  %v4977_v46 = vunpack.i.l.bf16 %v4976_v43  ;;  %v5187_v43 = vld [vmem:[#allocation8 + $0x60] sm:$0xff]  }
0x13f7   :  { %v4891_v47 = vpack.c.bf16 %v4978_v45, %v4977_v46 }
0x13f8   :  { %v4981_v59 = vpop.permute.xlu0 %4980  ;;  %v3113_v3 = vpop.permute.xlu1 %3112 }
0x13f9   :  { %4892 = vmatprep.subr.bf16.mxu0 %v4891_v47  ;;  %v4983_v6 = vunpack.i.h.bf16 %v4981_v59  ;;  %v4982_v63 = vunpack.i.l.bf16 %v4981_v59 }
0x13fa   :  { %4894 = vmatpush3.bf16.msra.mxu0 %v4891_v47 }
0x13fb   :  { %v5328_v48 = vpop.eup %5327  ;;  %v4895_v2 = vpack.c.bf16 %v4983_v6, %v4982_v63 }
0x13fc   :  { %v2903_v49 = vmul.f32 %v5328_v48, %v5320_v22  ;;  %v3115_v4 = vpop.permute.xlu1 %3114 }
0x13fe   :  { %4772 = vmatprep.mubr.msk.f32.mxu0 %vm685_vm3, %v2903_v49 }
0x13ff   :  { %v5330_v50 = vpop.eup %5329 }
0x1400   :  { %v2904_v51 = vmul.f32 %v5330_v50, %v5322_v38 }
0x1402   :  { %4773 = vmatmul.mubr.msk.f32.vlgmr.msra.gmra.mrb[32].mxu0 %vm685_vm3, %v2904_v51 }
0x145b   :  { %v4760_v53 = vpop.f32.mrb[30].mxu0 }
0x145c   :  { %v2773_v54 = vpop.f32.mrb[31].mxu0 }
0x145d   :  { %v2782_v55 = vpack.c.bf16 %v4760_v53, %v2773_v54 }
0x14d5   :  { %v4774_v58 = vpop.f32.mrb[32].mxu0 }
0x14d6   :  { %v2985_v33 = vpop.f32.mrb[33].mxu0 }
0x14d7   :  { %v2994_v62 = vpack.c.bf16 %v4774_v58, %v2985_v33  ;;  %v5188_v58 = vld [vmem:[#allocation8 + $0x68] sm:$0xff]  }
0x14d9   :  { %4780 = vmatmul.mubr.msk.bf16.vlgmr.msra.gmra.mrb[44].mxu1 %vm593_vm1, %v2994_v62 }
0x14da   :  { %4784 = vmatpush3.bf16.msra.mxu1 %v5185_v61  ;;  %4787 = vmatprep.mubr.msk.bf16.mxu1 %vm5631_vm0, %v5629_v0 }
0x14db   :  { %4785 = vmatprep.subr.bf16.mxu1 %v5629_v0 }
0x14de   :  { %4786 = vmatpush3.bf16.msra.mxu1 %v5186_v1 }
0x14df   :  { %4897 = vmatprep.subr.msk.bf16.mxu1 %vm5885_vm2, %v4895_v2 }
0x14e1   :  { %4788 = vmatmul.mubr.msk.bf16.vlgmr.msra.gmra.mrb[48].mxu1 %vm593_vm1, %v2782_v55 }
0x14e2   :  { %4795 = vmatprep.mubr.msk.f32.mxu1 %vm593_vm1, %v3113_v3 }
0x14e7   :  { %4900 = vmatpush3.bf16.xpose.msk.msra.mxu1 %vm5885_vm2, %v4895_v2 }
0x14e8   :  { %4805 = vmatprep.subr.bf16.mxu1 %v5629_v0 }
0x14ee   :  { %4796 = vmatmul.mubr.msk.f32.vlgmr.msra.gmra.mrb[42].mxu1 %vm593_vm1, %v3115_v4 }
0x14ef   :  { %4809 = vmatprep.mubr.msk.bf16.mxu1 %vm5631_vm0, %v5629_v0  ;;  %4806 = vmatpush3.bf16.msra.mxu1 %v5187_v43  ;;  %v5202_v43 = vld [vmem:[#allocation11 + $0x12c] ss:$16 sps:$4 sm:$0xff]  }
0x14f0   :  { %4807 = vmatprep.subr.bf16.mxu1 %v5629_v0 }
0x14f3   :  { %4808 = vmatpush3.bf16.msra.mxu1 %v5188_v58  ;;  %v5208_v58 = vld [vmem:[#allocation11 + $0x14c] ss:$16 sps:$4 sm:$0xff]  }
0x14f4   :  { %4827 = vmatprep.subr.bf16.mxu1 %v5629_v0 }
0x15ac   :  { %v3049_v5 = vpop.f32.mrb[44].mxu1 }
0x15ad   :  { %v4781_v7 = vpop.f32.mrb[45].mxu1 }
0x15ae   :  { %v3052_v8 = vpop.f32.mrb[46].mxu1 }
0x15af   :  { %v4782_v9 = vpop.f32.mrb[47].mxu1 }
0x15b4   :  { %v3105_v10 = vpop.f32.mrb[48].mxu1 }
0x15b5   :  { %v6126_v11 = vadd.f32 %v3105_v10, %v3049_v5  ;;  %v4789_v12 = vpop.f32.mrb[49].mxu1 }
0x15b6   :  { %v3108_v13 = vpop.f32.mrb[50].mxu1 }
0x15b7   :  { %v6128_v14 = vadd.f32 %v3108_v13, %v3052_v8  ;;  %v4790_v57 = vpop.f32.mrb[51].mxu1 }
0x15c1   :  { %v4797_v60 = vpop.f32.mrb[42].mxu1 }
0x15c2   :  { %v3204_v15 = vmul.f32 0.17677669, %v4797_v60  ;;  %v3194_v17 = vpop.f32.mrb[43].mxu1 }
0x15c3   :  { %v3203_v20 = vmul.f32 0.17677669, %v3194_v17 }
0x15c4   :  { %v3206_v25 = vadd.f32 %v6082_v56, %v3204_v15 }
0x15c5   :  { %v3205_v21 = vadd.f32 %v6085_v36, %v3203_v20  ;;  %v5189_v20 = vld [vmem:[#allocation8 + $0x70] sm:$0xff]  }
0x15c6   :  { %v3210_v34 = vsel %vm685_vm3, %v3206_v25, -inf }
0x15c7   :  { %3211 = vmax.xlane.f32.xlu0 %v3210_v34  ;;  %v3207_v22 = vsel %vm685_vm3, %v3205_v21, -inf }
0x15c8   :  { %3208 = vmax.xlane.f32.xlu1 %v3207_v22 }
0x15d9   :  { %4985 = vrot.lane.b32.xlu1 %v6039_v19, %s5615_s2  ;;  %s5577_s2 = scalar_lea.vmem %s4192_s10, 768 }
0x15da   :  { %p5578_p2 = scmp.ne.s32.totalorder %s4192_s10, %s5577_s2  ;;  %p5583_p4 = scmp.lt.s32.totalorder %s5577_s2, %s5577_s2 }
0x15dc   :  { %p5584_p5 = por %p5583_p4, %p5582_p3 }
0x15dd   :  { %3380 = vrot.lane.b32.xlu1 %v6050_v32, %s5633_s5 }
0x15de   :  { %p5585_p6 = pnand %p5584_p5, %p5578_p2 }
0x15e1   :  { %3382 = vrot.lane.b32.xlu1 %v6055_v42, %s5633_s5 }
0x1654   :  { %v3212_v23 = vpop.xlane.xlu0 %3211 }
0x1655   :  { %v3214_v38 = vsub.f32 %v3206_v25, %v3212_v23  ;;  %v3209_v24 = vpop.xlane.xlu1 %3208 }
0x1656   :  { %v3213_v26 = vsub.f32 %v3205_v21, %v3209_v24 }
0x1657   :  { %v3217_v29 = vmul.f32 1.442695, %v3214_v38 }
0x1658   :  { %v3215_v31 = vmul.f32 1.442695, %v3213_v26 }
0x1659   :  { %5331 = vpow2.f32 %v3217_v29  ;;  %v4986_v35 = vpop.permute.xlu1 %4985 }
0x165a   :  { %v4988_v37 = vunpack.i.h.bf16 %v4986_v35  ;;  %v4987_v30 = vunpack.i.l.bf16 %v4986_v35  ;;  %5333 = vpow2.f32 %v3215_v31 }
0x165c   :  { %v4901_v39 = vpack.c.bf16 %v4988_v37, %v4987_v30 }
0x165e   :  { %4902 = vmatprep.subr.bf16.mxu0 %v4901_v39 }
0x165f   :  { %4904 = vmatpush3.bf16.msra.mxu0 %v4901_v39  ;;  %v5191_v39 = vld [vmem:[#allocation11 + $0x100] ss:$16 sps:$4 sm:$0xff]  }
0x1663   :  { %v5332_v40 = vpop.eup %5331 }
0x1664   :  { %v3222_v32 = vsel %vm685_vm3, %v5332_v40, 0.0  ;;  %v5334_v41 = vpop.eup %5333 }
0x1665   :  { %3223 = vadd.xlane.f32.xlu0 %v3222_v32  ;;  %v3219_v42 = vsel %vm685_vm3, %v5334_v41, 0.0  ;;  %v5194_v32 = vld [vmem:[#allocation11 + $0x108] ss:$16 sps:$4 sm:$0xff]  }
0x1669   :  { %3220 = vadd.xlane.f32.xlu0 %v3219_v42  ;;  %v5199_v42 = vld [vmem:[#allocation11 + $0x124] ss:$16 sps:$4 sm:$0xff]  }
0x167f   :  { %4990 = vrot.lane.b32.xlu0 %v6061_v44, %s5633_s5  ;;  %v3381_v44 = vpop.permute.xlu1 %3380 }
0x1683   :  { %v3383_v55 = vpop.permute.xlu1 %3382 }
0x16f2   :  { %v3224_v45 = vpop.xlane.xlu0 %3223 }
0x16f3   :  { %5335 = vrcp.f32 %v3224_v45  ;;  %v5197_v45 = vld [vmem:[#allocation11 + $0x120] ss:$16 sps:$4 sm:$0xff]  }
0x16f6   :  { %v3221_v46 = vpop.xlane.xlu0 %3220 }
0x16f7   :  { %5337 = vrcp.f32 %v3221_v46  ;;  %v5200_v46 = vld [vmem:[#allocation11 + $0x128] ss:$16 sps:$4 sm:$0xff]  }
0x16fa   :  { %v4991_v47 = vpop.permute.xlu0 %4990 }
0x16fb   :  { %v4993_v48 = vunpack.i.h.bf16 %v4991_v47  ;;  %v4992_v49 = vunpack.i.l.bf16 %v4991_v47 }
0x16fd   :  { %v4905_v50 = vpack.c.bf16 %v4993_v48, %v4992_v49  ;;  %v5336_v51 = vpop.eup %5335 }
0x16fe   :  { %v3228_v54 = vmul.f32 %v5336_v51, %v5332_v40  ;;  %v5193_v40 = vld [vmem:[#allocation11 + $0x104] ss:$16 sps:$4 sm:$0xff]  }
0x16ff   :  { %4907 = vmatprep.subr.msk.bf16.mxu0 %vm5885_vm2, %v4905_v50 }
0x1701   :  { %v5338_v52 = vpop.eup %5337 }
0x1702   :  { %v3227_v53 = vmul.f32 %v5338_v52, %v5334_v41  ;;  %v5196_v41 = vld [vmem:[#allocation11 + $0x10c] ss:$16 sps:$4 sm:$0xff]  }
0x1704   :  { %4802 = vmatprep.mubr.msk.f32.mxu0 %vm685_vm3, %v3227_v53 }
0x1705   :  { %4803 = vmatmul.mubr.msk.f32.vlgmr.msra.gmra.mrb[34].mxu0 %vm685_vm3, %v3228_v54 }
0x1706   :  { %4910 = vmatpush3.bf16.xpose.msk.msra.mxu0 %vm5885_vm2, %v4905_v50  ;;  %4817 = vmatprep.mubr.msk.f32.mxu0 %vm593_vm1, %v3381_v44 }
0x170d   :  { %4818 = vmatmul.mubr.msk.f32.vlgmr.msra.gmra.mrb[36].mxu0 %vm593_vm1, %v3383_v55  ;;  %v5205_v55 = vld [vmem:[#allocation11 + $0x144] ss:$16 sps:$4 sm:$0xff]  }
0x17d8   :  { %v4804_v59 = vpop.f32.mrb[34].mxu0 }
0x17d9   :  { %v3307_v33 = vpop.f32.mrb[35].mxu0 }
0x17da   :  { %v3316_v61 = vpack.c.bf16 %v4804_v59, %v3307_v33  ;;  %v5203_v59 = vld [vmem:[#allocation11 + $0x140] ss:$16 sps:$4 sm:$0xff]   ;;  %v5206_v33 = vld [vmem:[#allocation11 + $0x148] ss:$16 sps:$4 sm:$0xff]  }
0x17dc   :  { %4810 = vmatmul.mubr.msk.bf16.vlgmr.msra.gmra.mrb[52].mxu1 %vm593_vm1, %v3316_v61  ;;  %v5214_v61 = vld [vmem:[#allocation11 + $0x16c] ss:$16 sps:$4 sm:$0xff]  }
0x17dd   :  { %4831 = vmatprep.mubr.msk.bf16.mxu1 %vm5631_vm0, %v5629_v0  ;;  %4828 = vmatpush3.bf16.msra.mxu1 %v5189_v20 }
0x17de   :  { %4829 = vmatprep.subr.bf16.mxu1 %v5629_v0  ;;  %v5190_v0 = vld [vmem:[#allocation8 + $0x78] sm:$0xff]  }
0x17e0   :  { %v4819_v62 = vpop.f32.mrb[36].mxu0 }
0x17e1   :  { %v3472_v28 = vmul.f32 0.17677669, %v4819_v62  ;;  %v3462_v6 = vpop.f32.mrb[37].mxu0  ;;  %4830 = vmatpush3.bf16.msra.mxu1 %v5190_v0  ;;  %v5212_v62 = vld [vmem:[#allocation11 + $0x168] ss:$16 sps:$4 sm:$0xff]   ;;  %v5243_v0 = vld [vmem:[#allocation13 + $0xd0] sm:$0xff]  }
0x17e2   :  { %v3471_v63 = vmul.f32 0.17677669, %v3462_v6  ;;  %3911 = vmatprep.subr.bf16.mxu1 %v5196_v41  ;;  %v5220_v6 = vld [vmem:[#allocation11 + $0x18c] ss:$16 sps:$4 sm:$0xff]  }
0x17e3   :  { %v3474_v1 = vadd.f32 %v6082_v56, %v3472_v28  ;;  %v5217_v28 = vld [vmem:[#allocation11 + $0x184] ss:$16 sps:$4 sm:$0xff]   ;;  %v5250_v41 = vld [vmem:[#allocation13 + $0xa8] sm:$0xff]  }
0x17e4   :  { %v3473_v2 = vadd.f32 %v6085_v36, %v3471_v63  ;;  %v5215_v63 = vld [vmem:[#allocation11 + $0x180] ss:$16 sps:$4 sm:$0xff]  }
0x17e5   :  { %v3478_v3 = vsel %vm685_vm3, %v3474_v1, -inf }
0x17e6   :  { %3479 = vmax.xlane.f32.xlu0 %v3478_v3  ;;  %v3475_v4 = vsel %vm685_vm3, %v3473_v2, -inf  ;;  %v5226_v3 = vld [vmem:[#allocation11 + $0x1ac] ss:$16 sps:$4 sm:$0xff]  }
0x17e7   :  { %3476 = vmax.xlane.f32.xlu1 %v3475_v4  ;;  %v5221_v4 = vld [vmem:[#allocation11 + $0x1a0] ss:$16 sps:$4 sm:$0xff]  }
0x17f8   :  { %4995 = vrot.lane.b32.xlu1 %v6039_v19, %s5633_s5 }
0x1873   :  { %v3480_v5 = vpop.xlane.xlu0 %3479 }
0x1874   :  { %v3482_v7 = vsub.f32 %v3474_v1, %v3480_v5  ;;  %v3477_v8 = vpop.xlane.xlu1 %3476  ;;  %v5218_v1 = vld [vmem:[#allocation11 + $0x188] ss:$16 sps:$4 sm:$0xff]  }
0x1875   :  { %v3481_v9 = vsub.f32 %v3473_v2, %v3477_v8  ;;  %v5223_v2 = vld [vmem:[#allocation11 + $0x1a4] ss:$16 sps:$4 sm:$0xff]   ;;  %v5224_v5 = vld [vmem:[#allocation11 + $0x1a8] ss:$16 sps:$4 sm:$0xff]   ;;  %v5232_v8 = vld [vmem:[#allocation11 + $0x1cc] ss:$16 sps:$4 sm:$0xff]  }
0x1876   :  { %v3485_v10 = vmul.f32 1.442695, %v3482_v7  ;;  %v5229_v7 = vld [vmem:[#allocation11 + $0x1c4] ss:$16 sps:$4 sm:$0xff]  }
0x1877   :  { %v3483_v12 = vmul.f32 1.442695, %v3481_v9  ;;  %v5227_v9 = vld [vmem:[#allocation11 + $0x1c0] ss:$16 sps:$4 sm:$0xff]  }
0x1878   :  { %v4996_v13 = vpop.permute.xlu1 %4995 }
0x1879   :  { %5339 = vpow2.f32 %v3483_v12  ;;  %v4998_v56 = vunpack.i.h.bf16 %v4996_v13  ;;  %v4997_v57 = vunpack.i.l.bf16 %v4996_v13  ;;  %v5235_v12 = vld [vmem:[#allocation11 + $0x1e4] ss:$16 sps:$4 sm:$0xff]   ;;  %v5238_v13 = vld [vmem:[#allocation11 + $0x1ec] ss:$16 sps:$4 sm:$0xff]  }
0x187a   :  { %5341 = vpow2.f32 %v3485_v10  ;;  %v5230_v10 = vld [vmem:[#allocation11 + $0x1c8] ss:$16 sps:$4 sm:$0xff]  }
0x187b   :  { %v4911_v36 = vpack.c.bf16 %v4998_v56, %v4997_v57  ;;  %v5233_v56 = vld [vmem:[#allocation11 + $0x1e0] ss:$16 sps:$4 sm:$0xff]   ;;  %v5236_v57 = vld [vmem:[#allocation11 + $0x1e8] ss:$16 sps:$4 sm:$0xff]  }
0x187d   :  { %4912 = vmatprep.subr.bf16.mxu0 %v4911_v36 }
0x187e   :  { %4914 = vmatpush3.bf16.msra.mxu0 %v4911_v36 }
0x187f   :  { %3868 = vmatprep.subr.bf16.mxu0 %v5193_v40  ;;  %v5248_v40 = vld [vmem:[#allocation13 + $0xa0] sm:$0xff]  }
0x1883   :  { %v5340_v60 = vpop.eup %5339 }
0x1884   :  { %v3487_v15 = vsel %vm685_vm3, %v5340_v60, 0.0  ;;  %v5342_v17 = vpop.eup %5341 }
0x1885   :  { %3488 = vadd.xlane.f32.xlu0 %v3487_v15  ;;  %v3490_v19 = vsel %vm685_vm3, %v5342_v17, 0.0 }
0x1889   :  { %3491 = vadd.xlane.f32.xlu0 %v3490_v19 }
0x18af   :  { %v3371_v25 = vpop.f32.mrb[52].mxu1 }
0x18b0   :  { %v3378_v21 = vadd.f32 %v3371_v25, %v6126_v11  ;;  %v4811_v34 = vpop.f32.mrb[53].mxu1 }
0x18b1   :  { %v3374_v22 = vpop.f32.mrb[54].mxu1 }
0x18b2   :  { %v3379_v23 = vadd.f32 %v3374_v22, %v6128_v14  ;;  %v4812_v38 = vpop.f32.mrb[55].mxu1  ;;  %v4415_v22 = vld [vmem:[#allocation10 + $0x1] ss:$0 sm:$0xff] }
0x1912   :  { %v3489_v24 = vpop.xlane.xlu0 %3488 }
0x1913   :  { %5343 = vrcp.f32 %v3489_v24 }
0x1916   :  { %v3492_v26 = vpop.xlane.xlu0 %3491 }
0x1917   :  { %5345 = vrcp.f32 %v3492_v26 }
0x191d   :  { %v5344_v29 = vpop.eup %5343 }
0x191e   :  { %v3495_v31 = vmul.f32 %v5344_v29, %v5340_v60  ;;  %v5239_v29 = vld [vmem:[#allocation13 + $0xc0] sm:$0xff]  }
0x1920   :  { %4824 = vmatprep.mubr.msk.f32.mxu0 %vm685_vm3, %v3495_v31  ;;  %v5240_v31 = vld [vmem:[#allocation13 + $0x80] sm:$0xff]  }
0x1921   :  { %v5346_v35 = vpop.eup %5345 }
0x1922   :  { %v3496_v37 = vmul.f32 %v5346_v35, %v5342_v17  ;;  %v5241_v35 = vld [vmem:[#allocation13 + $0xc8] sm:$0xff]  }
0x1924   :  { %4825 = vmatmul.mubr.msk.f32.vlgmr.msra.gmra.mrb[38].mxu0 %vm685_vm3, %v3496_v37  ;;  %v5242_v37 = vld [vmem:[#allocation13 + $0x88] sm:$0xff]  }
0x1925   :  { %3900 = vmatprep.mubr.bf16.mxu0 %v5630_v27  ;;  %3869 = vmatpush1.bf16.msra.mxu0 %v5191_v39  ;;  %v5247_v39 = vld [vmem:[#allocation13 + $0xe0] sm:$0xff]  }
0x1926   :  { %3870 = vmatprep.subr.bf16.mxu0 %v5199_v42  ;;  %v5251_v42 = vld [vmem:[#allocation13 + $0xf0] sm:$0xff]  }
0x1929   :  { %3871 = vmatpush1.bf16.msra.mxu0 %v5197_v45  ;;  %v5253_v45 = vld [vmem:[#allocation13 + $0xf8] sm:$0xff]  }
0x192a   :  { %3872 = vmatprep.subr.bf16.mxu0 %v5205_v55 }
0x192d   :  { %3873 = vmatpush1.bf16.msra.mxu0 %v5203_v59 }
0x19f7   :  { %v4826_v11 = vpop.f32.mrb[38].mxu0 }
0x19f8   :  { %v3575_v30 = vpop.f32.mrb[39].mxu0 }
0x19f9   :  { %v3584_v14 = vpack.c.bf16 %v4826_v11, %v3575_v30  ;;  %v5244_v11 = vld [vmem:[#allocation13 + $0x90] sm:$0xff]   ;;  %v5245_v30 = vld [vmem:[#allocation13 + $0xd8] sm:$0xff]  }
0x19fb   :  { %4832 = vmatmul.mubr.msk.bf16.vlgmr.msra.gmra.mrb[56].mxu1 %vm593_vm1, %v3584_v14  ;;  %v5246_v14 = vld [vmem:[#allocation13 + $0x98] sm:$0xff]  }
0x19fc   :  { %3943 = vmatprep.mubr.bf16.mxu1 %v5630_v27  ;;  %3912 = vmatpush1.bf16.msra.mxu1 %v5194_v32  ;;  %v5249_v32 = vld [vmem:[#allocation13 + $0xe8] sm:$0xff]  }
0x19fd   :  { %3913 = vmatprep.subr.bf16.mxu1 %v5202_v43  ;;  %v5252_v43 = vld [vmem:[#allocation13 + $0xb0] sm:$0xff]  }
0x1a00   :  { %3914 = vmatpush1.bf16.msra.mxu1 %v5200_v46  ;;  %v5254_v46 = vld [vmem:[#allocation13 + $0xb8] sm:$0xff]  }
0x1a01   :  { %3915 = vmatprep.subr.bf16.mxu1 %v5208_v58 }
0x1a04   :  { %3916 = vmatpush1.bf16.msra.mxu1 %v5206_v33 }
0x1a05   :  { %3917 = vmatprep.subr.bf16.mxu1 %v5214_v61 }
0x1a08   :  { %3918 = vmatpush1.bf16.msra.mxu1 %v5212_v62 }
0x1a09   :  { %3919 = vmatprep.subr.bf16.mxu1 %v5220_v6 }
0x1a0c   :  { %3920 = vmatpush1.bf16.msra.mxu1 %v5218_v1 }
0x1a0d   :  { %3921 = vmatprep.subr.bf16.mxu1 %v5226_v3 }
0x1a10   :  { %3922 = vmatpush1.bf16.msra.mxu1 %v5224_v5 }
0x1a11   :  { %3923 = vmatprep.subr.bf16.mxu1 %v5232_v8 }
0x1a14   :  { %3924 = vmatpush1.bf16.msra.mxu1 %v5230_v10 }
0x1a15   :  { %3925 = vmatprep.subr.bf16.mxu1 %v5238_v13 }
0x1a18   :  { %3926 = vmatpush1.bf16.msra.mxu1 %v5236_v57 }
0x1ace   :  { %v3639_v47 = vpop.f32.mrb[56].mxu1 }
0x1acf   :  { %v3646_v48 = vadd.f32 %v3639_v47, %v3378_v21  ;;  %v4833_v49 = vpop.f32.mrb[57].mxu1 }
0x1ad0   :  { %v3642_v27 = vpop.f32.mrb[58].mxu1 }
0x1ad1   :  { %v6174_v50 = vadd.f32 %v3646_v48, %v6017_v16  ;;  %v3647_v51 = vadd.f32 %v3642_v27, %v3379_v23  ;;  %v4834_v52 = vpop.f32.mrb[59].mxu1  ;;  %v5211_v16 = vld [vmem:[#allocation11 + $0x164] ss:$16 sps:$4 sm:$0xff]  }
0x1ad2   :  { %3874 = vmatprep.subr.bf16.mxu0 %v5211_v16 }
0x1ad3   :  { %v6177_v53 = vadd.f32 %v3647_v51, %v6021_v18  ;;  %v3652_v54 = vmul.f32 %v6174_v50, %v6174_v50  ;;  %v5209_v18 = vld [vmem:[#allocation11 + $0x160] ss:$16 sps:$4 sm:$0xff]  }
0x1ad4   :  { %3875 = vmatpush1.bf16.msra.mxu0 %v5209_v18 }
0x1ad5   :  { %3654 = vadd.xlane.f32.xlu0 %v3652_v54  ;;  %v3653_v44 = vmul.f32 %v6177_v53, %v6177_v53  ;;  %3876 = vmatprep.subr.bf16.mxu0 %v5217_v28 }
0x1ad8   :  { %3877 = vmatpush1.bf16.msra.mxu0 %v5215_v63 }
0x1ad9   :  { %3656 = vadd.xlane.f32.xlu0 %v3653_v44  ;;  %3878 = vmatprep.subr.bf16.mxu0 %v5223_v2 }
0x1adc   :  { %3879 = vmatpush1.bf16.msra.mxu0 %v5221_v4 }
0x1add   :  { %3880 = vmatprep.subr.bf16.mxu0 %v5229_v7 }
0x1ae0   :  { %3881 = vmatpush1.bf16.msra.mxu0 %v5227_v9 }
0x1ae1   :  { %3882 = vmatprep.subr.bf16.mxu0 %v5235_v12 }
0x1ae4   :  { %3883 = vmatpush1.bf16.msra.mxu0 %v5233_v56 }
0x1ae5   :  { %4597 = vmatprep.subr.bf16.mxu0 %v5239_v29 }
0x1b62   :  { %v3655_v36 = vpop.xlane.xlu0 %3654 }
0x1b63   :  { %v3658_v60 = vmul.f32 0.0078125, %v3655_v36 }
0x1b65   :  { %v3660_v15 = vadd.f32 1e-06, %v3658_v60 }
0x1b66   :  { %v3657_v17 = vpop.xlane.xlu0 %3656 }
0x1b67   :  { %5347 = vrsqrt.f32 %v3660_v15  ;;  %v3659_v19 = vmul.f32 0.0078125, %v3657_v17 }
0x1b69   :  { %v3661_v20 = vadd.f32 1e-06, %v3659_v19 }
0x1b6b   :  { %5349 = vrsqrt.f32 %v3661_v20 }
0x1b71   :  { %v5348_v25 = vpop.eup %5347 }
0x1b72   :  { %v3664_v21 = vmul.f32 %v5348_v25, %v6174_v50 }
0x1b74   :  { %v3672_v38 = vmul.f32 %v4415_v22, %v3664_v21 }
0x1b75   :  { %v5350_v34 = vpop.eup %5349 }
0x1b76   :  { %v3665_v23 = vmul.f32 %v5350_v34, %v6177_v53 }
0x1b78   :  { %v3673_v24 = vmul.f32 %v4415_v22, %v3665_v23 }
0x1b7a   :  { %v3674_v26 = vpack.c.bf16 %v3673_v24, %v3672_v38 }
0x1b7c   :  { %3901 = vmatmul.mubr.bf16.vlgmr.msra.gmra.mrb[40].mxu0 %v3674_v26  ;;  %3944 = vmatmul.mubr.bf16.vlgmr.msra.gmra.mrb[60].mxu1 %v3674_v26 }
0x1b7d   :  { %4598 = vmatpush3.bf16.msra.mxu0 %v5240_v31 }
0x1b7e   :  { %4599 = vmatprep.subr.bf16.mxu0 %v5241_v35 }
0x1b81   :  { %4600 = vmatpush3.bf16.msra.mxu0 %v5242_v37 }
0x1b82   :  { %4601 = vmatprep.subr.bf16.mxu0 %v5243_v0 }
0x1b85   :  { %4602 = vmatpush3.bf16.msra.mxu0 %v5244_v11  ;;  %v4468_v11 = vld [vmem:[#allocation14] ss:$0 sm:$0xff] }
0x1b86   :  { %4603 = vmatprep.subr.bf16.mxu0 %v5245_v30 }
0x1b89   :  { %4604 = vmatpush3.bf16.msra.mxu0 %v5246_v14 }
0x1b8a   :  { %4605 = vmatprep.subr.bf16.mxu0 %v5247_v39 }
0x1b8d   :  { %4606 = vmatpush3.bf16.msra.mxu0 %v5248_v40 }
0x1b8e   :  { %4607 = vmatprep.subr.bf16.mxu0 %v5249_v32 }
0x1b91   :  { %4608 = vmatpush3.bf16.msra.mxu0 %v5250_v41 }
0x1b92   :  { %4609 = vmatprep.subr.bf16.mxu0 %v5251_v42 }
0x1b95   :  { %4610 = vmatpush3.bf16.msra.mxu0 %v5252_v43 }
0x1b96   :  { %4611 = vmatprep.subr.bf16.mxu0 %v5253_v45 }
0x1b99   :  { %4612 = vmatpush3.bf16.msra.mxu0 %v5254_v46 }
0x1c4f   :  { %v3902_v47 = vpop.f32.mrb[40].mxu0  ;;  %v3945_v48 = vpop.f32.mrb[60].mxu1 }
0x1c50   :  { %v4448_v49 = vmul.f32 -1.442695, %v3902_v47  ;;  %v3904_v27 = vpop.f32.mrb[41].mxu0  ;;  %v3947_v51 = vpop.f32.mrb[61].mxu1 }
0x1c51   :  { %v4449_v52 = vmul.f32 -1.442695, %v3904_v27  ;;  %v3906_v54 = vpop.f32.mrb[42].mxu0  ;;  %v3949_v44 = vpop.f32.mrb[62].mxu1 }
0x1c52   :  { %5351 = vpow2.f32 %v4448_v49  ;;  %v4450_v55 = vmul.f32 -1.442695, %v3906_v54  ;;  %v3908_v58 = vpop.f32.mrb[43].mxu0  ;;  %v3951_v59 = vpop.f32.mrb[63].mxu1 }
0x1c53   :  { %5353 = vpow2.f32 %v4449_v52  ;;  %v4451_v33 = vmul.f32 -1.442695, %v3908_v58 }
0x1c54   :  { %5355 = vpow2.f32 %v4450_v55 }
0x1c55   :  { %5357 = vpow2.f32 %v4451_v33 }
0x1c5c   :  { %v5352_v16 = vpop.eup %5351 }
0x1c5d   :  { %v5354_v61 = vpop.eup %5353  ;;  %v3966_v18 = vadd.f32 1.0, %v5352_v16 }
0x1c5e   :  { %v5356_v62 = vpop.eup %5355  ;;  %v3967_v28 = vadd.f32 1.0, %v5354_v61 }
0x1c5f   :  { %v5358_v6 = vpop.eup %5357  ;;  %5359 = vrcp.f32 %v3966_v18  ;;  %v3968_v63 = vadd.f32 1.0, %v5356_v62 }
0x1c60   :  { %5361 = vrcp.f32 %v3967_v28  ;;  %v3969_v1 = vadd.f32 1.0, %v5358_v6 }
0x1c61   :  { %5363 = vrcp.f32 %v3968_v63 }
0x1c62   :  { %5365 = vrcp.f32 %v3969_v1 }
0x1c69   :  { %v5360_v2 = vpop.eup %5359 }
0x1c6a   :  { %v5362_v3 = vpop.eup %5361  ;;  %v3978_v4 = vmul.f32 %v5360_v2, %v3902_v47 }
0x1c6b   :  { %v5364_v5 = vpop.eup %5363  ;;  %v3979_v7 = vmul.f32 %v5362_v3, %v3904_v27 }
0x1c6c   :  { %v5366_v8 = vpop.eup %5365  ;;  %v3982_v9 = vmul.f32 %v3978_v4, %v3945_v48  ;;  %v3980_v10 = vmul.f32 %v5364_v5, %v3906_v54 }
0x1c6d   :  { %v3983_v12 = vmul.f32 %v3979_v7, %v3947_v51  ;;  %v3981_v13 = vmul.f32 %v5366_v8, %v3908_v58 }
0x1c6e   :  { %v3984_v56 = vmul.f32 %v3980_v10, %v3949_v44 }
0x1c6f   :  { %v3985_v57 = vmul.f32 %v3981_v13, %v3951_v59 }
0x1c70   :  { %v3986_v36 = vpack.c.bf16 %v3984_v56, %v3982_v9 }
0x1c71   :  { %v3987_v60 = vpack.c.bf16 %v3985_v57, %v3983_v12 }
0x1c73   :  { %4149 = vmatprep.mubr.bf16.mxu0 %v3987_v60 }
0x1c74   :  { %4150 = vmatmul.mubr.bf16.vlgmr.msra.gmra.mrb[44].mxu0 %v3986_v36 }
0x1d47   :  { %v4613_v15 = vpop.f32.mrb[44].mxu0 }
0x1d48   :  { %v4614_v17 = vpop.f32.mrb[45].mxu0 }
0x1d49   :  { %v4615_v19 = vadd.f32 %v4614_v17, %v4613_v15  ;;  %v4616_v20 = vpop.f32.mrb[46].mxu0 }
0x1d4a   :  { %v4617_v25 = vpop.f32.mrb[47].mxu0 }
0x1d4b   :  { %v4158_v21 = vadd.f32 %v4615_v19, %v6174_v50  ;;  %v4618_v34 = vadd.f32 %v4617_v25, %v4616_v20 }
0x1d4d   :  { %v4159_v22 = vadd.f32 %v4618_v34, %v6177_v53  ;;  %v4161_v23 = vmul.f32 %v4158_v21, %v4158_v21 }
0x1d4f   :  { %4163 = vadd.xlane.f32.xlu0 %v4161_v23  ;;  %v4162_v38 = vmul.f32 %v4159_v22, %v4159_v22 }
0x1d53   :  { %4165 = vadd.xlane.f32.xlu0 %v4162_v38 }
0x1ddc   :  { %v4164_v24 = vpop.xlane.xlu0 %4163 }
0x1ddd   :  { %v4167_v26 = vmul.f32 0.0078125, %v4164_v24 }
0x1ddf   :  { %v4169_v29 = vadd.f32 1e-06, %v4167_v26 }
0x1de0   :  { %v4166_v31 = vpop.xlane.xlu0 %4165 }
0x1de1   :  { %5367 = vrsqrt.f32 %v4169_v29  ;;  %v4168_v35 = vmul.f32 0.0078125, %v4166_v31 }
0x1de3   :  { %v4170_v37 = vadd.f32 1e-06, %v4168_v35 }
0x1de5   :  { %5369 = vrsqrt.f32 %v4170_v37 }
0x1deb   :  { %v5368_v0 = vpop.eup %5367 }
0x1dec   :  { %v4173_v30 = vmul.f32 %v5368_v0, %v4158_v21 }
0x1dee   :  { %v4181_v14 = vmul.f32 %v4468_v11, %v4173_v30 }
0x1def   :  { %v5370_v50 = vpop.eup %5369 }
0x1df0   :  { %4184 = vst [vmem:[#allocation17 + $0x20] sm:$0xff] %v4181_v14  ;;  %v4174_v53 = vmul.f32 %v5370_v50, %v4159_v22 }
0x1df2   :  { %v4182_v39 = vmul.f32 %v4468_v11, %v4174_v53 }
0x1df4   :  { %4185 = vst [vmem:[#allocation17 + $0x28] sm:$0xff] %v4182_v39 }
0x1df5   :  { %5588 = shalt.err (!%p5585_p6)
}
0x1df6   :  { %s5589_s22 = scalar_lea.hbm %s6214_s12, 768 }
0x1df7   :  { %p5590_p7 = scmp.ne.s32.totalorder %s6214_s12, %s5589_s22  ;;  %p5593_p8 = scmp.lt.u32.totalorder %s5589_s22, %s6214_s12 }
0x1df9   :  { %p5595_p9 = pnand %p5593_p8, %p5590_p7 }
0x1dfb   :  { %5598 = shalt.err (!%p5595_p9)
}
0x1dfc   :  { %4197 = dma.vmem_to_hbm [thread:$0]  %s4192_s10, 768, %s6214_s12, [#allocation4], %s5622_s8, %s5622_s8, %s5623_s27  }
0x1dfd   :  { %5609 = dma.done.wait [#allocation4], 768  }
0x1dfe   :  { %5610 = vsyncadd [#allocation4], 4294966528 }
0x1dff   :  { %4201 = vsyncpa [#allocation3], 1 }
0x1e00   :  { %4202 = vsyncpa [#allocation6], 1 }
0x1e01   :  { %4203 = vsyncpa [#allocation9], 1 }
0x1e02   :  { %4204 = vsyncpa [#allocation12], 1 }
0x1e03   :  { %4205 = vsyncpa [#allocation15], 1 }
0x1e04   :  { %4206 = vsyncpa [#allocation4], 1 }

</bundles_post_ra>
